<compile_context>
chip_gen: v5e
topology: v5e:2x2
jax: 0.10.0
libtpu: 0.0.40
codegen_flags: <defaults>
</compile_context>

<pallas_src>
import functools

import jax
import jax.numpy as jnp
import numpy as np
from jax import lax
from jax.experimental import pallas as pl
from jax.experimental.pallas import tpu as pltpu


# ----------------------------------------------------------------------------- kernel
def _conv_bn_act_kernel(*refs, KH, KW, H, W, HO, WO, stride, padding,
                        apply_relu, has_residual, has_shortcut, matmul_dtype):
    """One sample: im2col KxK conv + folded BN affine (+ fused 1x1 shortcut /
    residual) (+ ReLU).

    refs = (x, w, scale, bias,
            [xsc, wsc, ssc, bsc],      # fused 1x1 shortcut conv + BN
            [res],                     # plain residual add (identity shortcut)
            out,
            [xp_scratch], [xcol_scratch])
      x:     (H, W, Cin)               unpadded NHWC sample
      w:     (KH*KW*Cin, Cout)         block-diagonal im2col weight (matmul_dtype)
      scale: (1, Cout)  bias: (1, Cout)  folded BN scale / bias (f32, incl. conv bias)
      xsc:   (HO, WO, Csc)             shortcut input (pre-strided in the wrapper)
      wsc:   (Csc, Cout)               shortcut 1x1 block-diagonal weight
      ssc/bsc: (1, Cout)               shortcut folded BN affine
      res:   (HO, WO, Cout)            identity-shortcut residual
      out:   (HO, WO, Cout)
      xp_scratch:   (H+2p, W+2p, Cin)  matmul_dtype, only when padding > 0
      xcol_scratch: (HO*WO, KH*KW*Cin) matmul_dtype, only when KH*KW > 1
    """
    x_ref, w_ref, scale_ref, bias_ref = refs[:4]
    pos = 4
    if has_shortcut:
        xsc_ref, wsc_ref, ssc_ref, bsc_ref = refs[pos:pos + 4]
        pos += 4
    if has_residual:
        res_ref = refs[pos]
        pos += 1
    o_ref = refs[pos]
    pos += 1
    xp_ref = None
    if padding > 0:
        xp_ref = refs[pos]
        pos += 1
    xcol_ref = None
    if KH * KW > 1:
        xcol_ref = refs[pos]
        pos += 1

    cin = x_ref.shape[-1]
    cout = o_ref.shape[-1]
    p = padding

    # ---- stage the (optionally padded) sample in matmul_dtype ------------------
    if p > 0:
        Hp, Wp = H + 2 * p, W + 2 * p
        # Zero only the padding halo (4 thin border stores); the interior is fully
        # overwritten every grid step, so no full-scratch zero-fill is needed.
        zrow = jnp.zeros((p, Wp, cin), matmul_dtype)
        zcol = jnp.zeros((Hp, p, cin), matmul_dtype)
        xp_ref[0:p, :, :] = zrow
        xp_ref[H + p:Hp, :, :] = zrow
        xp_ref[:, 0:p, :] = zcol
        xp_ref[:, W + p:Wp, :] = zcol
        # Cast once on write into the bf16/f32 scratch (no separate full-tensor cast).
        xp_ref[p:p + H, p:p + W, :] = x_ref[...].astype(matmul_dtype)
        src = xp_ref
    else:
        src = x_ref

    # ---- im2col staging + one K-deep MXU matmul --------------------------------
    if KH * KW > 1:
        # TODO(synk): stride > 1 (strided value slice below) is untested by the demo;
        # validate lowering/numerics before enabling stride=2 blocks.
        for kh in range(KH):
            for kw in range(KW):
                xt = src[kh:kh + (HO - 1) * stride + 1,
                         kw:kw + (WO - 1) * stride + 1, :]
                if stride > 1:
                    xt = xt[::stride, ::stride, :]
                tap = kh * KW + kw
                xcol_ref[:, tap * cin:(tap + 1) * cin] = (
                    xt.astype(matmul_dtype).reshape(HO * WO, cin))
        xcol = xcol_ref[...]
    else:
        if stride > 1:
            xcol = src[::stride, ::stride, :].astype(matmul_dtype).reshape(HO * WO, cin)
        else:
            xcol = src[...].astype(matmul_dtype).reshape(HO * WO, cin)

    y = jnp.dot(xcol, w_ref[...], preferred_element_type=jnp.float32)
    y = y * scale_ref[...] + bias_ref[...]                 # (HO*WO, Cout)

    # ---- fused epilogue: shortcut / residual / ReLU -----------------------------
    if has_shortcut:
        xsc = xsc_ref[...].astype(matmul_dtype).reshape(HO * WO, xsc_ref.shape[-1])
        ysc = jnp.dot(xsc, wsc_ref[...], preferred_element_type=jnp.float32)
        y = y + (ysc * ssc_ref[...] + bsc_ref[...])
    if has_residual:
        y = y + res_ref[...].astype(jnp.float32).reshape(HO * WO, cout)
    if apply_relu:
        y = jnp.maximum(y, 0.0)

    # TODO(synk): at the demo's Cout=32 this is a masked (32/128-lane) store; a
    # lane-dense (HO, WO*Cout) out_spec needs a sublane->lane relayout whose Mosaic
    # lowering is not guaranteed at these widths.  At production packed-ResNet
    # widths (Cout = planes*alpha >= 128) the store below is already lane-dense.
    o_ref[...] = y.reshape(HO, WO, cout).astype(o_ref.dtype)


# ----------------------------------------------------------------------------- weight folding
def _fold_conv_bn(weight, conv_bias, bn_w, bn_b, bn_mean, bn_var, groups, eps,
                  matmul_dtype):
    """Grouped conv weight -> block-diagonal dense im2col weight + folded BN affine.

    weight: PyTorch OIHW (Cout, Cin//groups, KH, KW).
    Returns (w_col (KH*KW*Cin, Cout), scale (1,Cout) f32, bias (1,Cout) f32, KH, KW).
    """
    w_np = np.asarray(weight, np.float32)
    Cout, cig, KH, KW = w_np.shape
    Cin = cig * groups
    cog = Cout // groups
    # Grouped conv == dense conv with a block-diagonal weight (channels are
    # group-contiguous).  Built host-side in numpy (no per-group XLA update ops).
    # TODO(synk): for large groups (num_estimators*gamma >= 4) fall back to a
    # per-group grid axis instead of materialising the zero off-diagonal blocks.
    wg = w_np.reshape(groups, cog, cig, KH, KW).transpose(0, 3, 4, 2, 1)  # (G,KH,KW,cig,cog)
    wd = np.zeros((KH, KW, Cin, Cout), np.float32)
    for g in range(groups):
        wd[:, :, g * cig:(g + 1) * cig, g * cog:(g + 1) * cog] = wg[g]
    w_col = jnp.asarray(wd.reshape(KH * KW * Cin, Cout), dtype=matmul_dtype)

    if conv_bias is None:
        conv_bias = jnp.zeros((Cout,), jnp.float32)
    scale = bn_w / jnp.sqrt(bn_var + eps)
    bias = bn_b + scale * (conv_bias - bn_mean)
    return (w_col,
            scale.reshape(1, Cout).astype(jnp.float32),
            bias.reshape(1, Cout).astype(jnp.float32),
            KH, KW)


# ----------------------------------------------------------------------------- wrapper
def packed_conv_bn_act(x, weight, conv_bias, bn_w, bn_b, bn_mean, bn_var, *,
                       groups, stride, padding, relu,
                       residual=None, shortcut=None,
                       eps=1e-5, matmul_dtype=jnp.bfloat16):
    """Packed (grouped) conv + folded eval-BatchNorm, with an optional fused
    epilogue: either a plain residual add (identity shortcut) or a fused
    1x1 packed conv + BN shortcut; optional final ReLU.

    x: NHWC (N,H,W,Cin).  weight: PyTorch OIHW (Cout, Cin//groups, KH, KW).
    shortcut: dict(x=(N,HO,WO,Csc) pre-strided NHWC, w, b, bn_w, bn_b, bn_mean,
                   bn_var, groups) -- fused into this kernel's epilogue.
    """
    N, H, W, Cin = x.shape
    Cout = weight.shape[0]
    w_col, scale2, bias2, KH, KW = _fold_conv_bn(
        weight, conv_bias, bn_w, bn_b, bn_mean, bn_var, groups, eps, matmul_dtype)
    HO = (H + 2 * padding - KH) // stride + 1
    WO = (W + 2 * padding - KW) // stride + 1
    Hp, Wp = H + 2 * padding, W + 2 * padding

    has_res = residual is not None
    has_sc = shortcut is not None

    inputs = [x, w_col, scale2, bias2]
    in_specs = [
        pl.BlockSpec((None, H, W, Cin), lambda n: (n, 0, 0, 0)),
        # Constant index maps -> weight / scale / bias DMA'd once, stay resident.
        # TODO(synk): single-buffer these constants (pipeline_mode=pl.Buffered(1))
        # at production scale to halve their VMEM residency.
        pl.BlockSpec((KH * KW * Cin, Cout), lambda n: (0, 0)),
        pl.BlockSpec((1, Cout), lambda n: (0, 0)),
        pl.BlockSpec((1, Cout), lambda n: (0, 0)),
    ]

    if has_sc:
        xsc = shortcut["x"]
        csc = xsc.shape[-1]
        wsc_col, ssc, bsc, kh_sc, kw_sc = _fold_conv_bn(
            shortcut["w"], shortcut["b"], shortcut["bn_w"], shortcut["bn_b"],
            shortcut["bn_mean"], shortcut["bn_var"], shortcut["groups"], eps,
            matmul_dtype)
        assert kh_sc == 1 and kw_sc == 1, "fused shortcut must be a 1x1 conv"
        assert xsc.shape[1:3] == (HO, WO)
        inputs += [xsc, wsc_col, ssc, bsc]
        in_specs += [
            pl.BlockSpec((None, HO, WO, csc), lambda n: (n, 0, 0, 0)),
            pl.BlockSpec((csc, Cout), lambda n: (0, 0)),
            pl.BlockSpec((1, Cout), lambda n: (0, 0)),
            pl.BlockSpec((1, Cout), lambda n: (0, 0)),
        ]
    if has_res:
        inputs.append(residual)
        in_specs.append(pl.BlockSpec((None, HO, WO, Cout), lambda n: (n, 0, 0, 0)))

    scratch_shapes = []
    if padding > 0:
        scratch_shapes.append(pltpu.VMEM((Hp, Wp, Cin), matmul_dtype))
    if KH * KW > 1:
        scratch_shapes.append(pltpu.VMEM((HO * WO, KH * KW * Cin), matmul_dtype))

    kernel = functools.partial(
        _conv_bn_act_kernel, KH=KH, KW=KW, H=H, W=W, HO=HO, WO=WO,
        stride=stride, padding=padding, apply_relu=relu,
        has_residual=has_res, has_shortcut=has_sc, matmul_dtype=matmul_dtype)

    # TODO(synk): for ResNet-scale spatial sizes add batch blocking (Bt samples per
    # step folded into the matmul M) and/or an HO row-tile grid axis, and set
    # pltpu.CompilerParams(vmem_limit_bytes=...) so blocks fit v7x's 64 MiB VMEM;
    # at these demo shapes one sample per step fits comfortably and keeps the grid
    # length >= 2 for megacore.
    return pl.pallas_call(
        kernel,
        out_shape=jax.ShapeDtypeStruct((N, HO, WO, Cout), x.dtype),
        grid=(N,),
        in_specs=in_specs,
        out_specs=pl.BlockSpec((None, HO, WO, Cout), lambda n: (n, 0, 0, 0)),
        scratch_shapes=scratch_shapes,
        compiler_params=pltpu.CompilerParams(
            dimension_semantics=("parallel",)),
    )(*inputs)


def basic_block_forward(x_nchw, p, *, matmul_dtype=jnp.bfloat16):
    """_BasicBlock.forward.  x_nchw: (N, in_planes*alpha, H, W) float32 (PyTorch NCHW)."""
    x = jnp.transpose(x_nchw, (0, 2, 3, 1))    # single NCHW -> NHWC at block entry

    # conv1 -> bn1 -> dropout(identity, eval) -> relu    (ReLU fused in the kernel)
    out = packed_conv_bn_act(
        x, p["conv1_w"], p["conv1_b"], p["bn1_w"], p["bn1_b"],
        p["bn1_mean"], p["bn1_var"], groups=p["groups1"], stride=p["stride"],
        padding=1, relu=True, matmul_dtype=matmul_dtype)

    # shortcut: fused into conv2's epilogue (1x1 packed conv + bn), or identity add.
    residual = None
    shortcut = None
    if p["has_shortcut"]:
        s = p["stride"]
        xsc = x if s == 1 else x[:, ::s, ::s, :]      # 1x1/stride-s conv == subsample
        shortcut = dict(x=xsc, w=p["sc_w"], b=p["sc_b"], bn_w=p["scbn_w"],
                        bn_b=p["scbn_b"], bn_mean=p["scbn_mean"],
                        bn_var=p["scbn_var"], groups=p["groups_sc"])
    else:
        residual = x

    # conv2 -> bn2 -> (+ shortcut conv+bn | + identity) -> relu, all in one kernel.
    out = packed_conv_bn_act(
        out, p["conv2_w"], p["conv2_b"], p["bn2_w"], p["bn2_b"],
        p["bn2_mean"], p["bn2_var"], groups=p["groups2"], stride=1,
        padding=1, relu=True, residual=residual, shortcut=shortcut,
        matmul_dtype=matmul_dtype)

    return jnp.transpose(out, (0, 3, 1, 2))    # NHWC -> NCHW


# ----------------------------------------------------------------------------- reference
def _conv_ref(x, w, b, groups, stride, padding):
    y = lax.conv_general_dilated(
        x, w, (stride, stride), ((padding, padding), (padding, padding)),
        feature_group_count=groups, dimension_numbers=("NCHW", "OIHW", "NCHW"))
    return y + b[None, :, None, None]


def _bn_ref(x, w, b, mean, var, eps=1e-5):
    s = w / jnp.sqrt(var + eps)
    return (x - mean[None, :, None, None]) * s[None, :, None, None] + b[None, :, None, None]


def basic_block_reference(x, p):
    out = jax.nn.relu(_bn_ref(_conv_ref(x, p["conv1_w"], p["conv1_b"],
                                        p["groups1"], p["stride"], 1),
                              p["bn1_w"], p["bn1_b"], p["bn1_mean"], p["bn1_var"]))
    out = _bn_ref(_conv_ref(out, p["conv2_w"], p["conv2_b"], p["groups2"], 1, 1),
                  p["bn2_w"], p["bn2_b"], p["bn2_mean"], p["bn2_var"])
    if p["has_shortcut"]:
        sc = _bn_ref(_conv_ref(x, p["sc_w"], p["sc_b"], p["groups_sc"], p["stride"], 0),
                     p["scbn_w"], p["scbn_b"], p["scbn_mean"], p["scbn_var"])
    else:
        sc = x
    return jax.nn.relu(out + sc)


# ----------------------------------------------------------------------------- main
if __name__ == "__main__":
    # _BasicBlock(in_planes=8, planes=16, stride=1, alpha=2, num_estimators=2,
    #             gamma=1, conv_bias=True, dropout_rate=0.0, groups=1,
    #             normalization_layer=BatchNorm2d)   -- evaluated in eval mode.
    # TODO(synk): Dropout2d is identity in eval mode / p=0.0, so it is not lowered.
    N, H, W = 2, 16, 16
    in_planes, planes, stride = 8, 16, 1
    alpha, num_estimators, gamma, groups = 2, 2, 1, 1

    ext_in = in_planes * alpha                    # 16  (input channels to the block)
    ext_out = planes * alpha                      # 32
    g1 = 1 * groups * num_estimators              # conv1: gamma defaults to 1
    g2 = gamma * groups * num_estimators          # conv2 / shortcut

    key = jax.random.PRNGKey(0)
    keys = jax.random.split(key, 20)

    def rnd(k, shape, s=0.1):
        return (jax.random.normal(k, shape, jnp.float32) * s).astype(jnp.float32)

    params = dict(
        stride=stride, groups1=g1, groups2=g2, groups_sc=g2,
        has_shortcut=(stride != 1 or in_planes != planes),
        conv1_w=rnd(keys[0], (ext_out, ext_in // g1, 3, 3)),
        conv1_b=rnd(keys[1], (ext_out,)),
        bn1_w=1.0 + rnd(keys[2], (ext_out,)),
        bn1_b=rnd(keys[3], (ext_out,)),
        bn1_mean=rnd(keys[4], (ext_out,)),
        bn1_var=jax.random.uniform(keys[5], (ext_out,), jnp.float32, 0.5, 1.5),
        conv2_w=rnd(keys[6], (ext_out, ext_out // g2, 3, 3)),
        conv2_b=rnd(keys[7], (ext_out,)),
        bn2_w=1.0 + rnd(keys[8], (ext_out,)),
        bn2_b=rnd(keys[9], (ext_out,)),
        bn2_mean=rnd(keys[10], (ext_out,)),
        bn2_var=jax.random.uniform(keys[11], (ext_out,), jnp.float32, 0.5, 1.5),
        sc_w=rnd(keys[12], (ext_out, ext_in // g2, 1, 1)),
        sc_b=rnd(keys[13], (ext_out,)),
        scbn_w=1.0 + rnd(keys[14], (ext_out,)),
        scbn_b=rnd(keys[15], (ext_out,)),
        scbn_mean=rnd(keys[16], (ext_out,)),
        scbn_var=jax.random.uniform(keys[17], (ext_out,), jnp.float32, 0.5, 1.5),
    )

    x = jax.random.normal(keys[18], (N, ext_in, H, W), jnp.float32)   # NCHW, like PyTorch

    ref = basic_block_reference(x, params)

    # 1) f32 MXU operands: tight structural / numerical check on every chip gen.
    out_f32 = jax.block_until_ready(
        basic_block_forward(x, params, matmul_dtype=jnp.float32))
    assert out_f32.shape == ref.shape == (N, ext_out, H // stride, W // stride)
    np.testing.assert_allclose(np.asarray(out_f32), np.asarray(ref),
                               rtol=2e-4, atol=2e-4)

    # 2) Default path: bf16 MXU operands (f32 accumulation / epilogue) -- the
    #    recommended configuration on v5e / v6e / v7x; loosened tolerance.
    out_bf16 = jax.block_until_ready(basic_block_forward(x, params))
    np.testing.assert_allclose(np.asarray(out_bf16), np.asarray(ref),
                               rtol=5e-2, atol=5e-2)

    print("KERNEL_OK")
</pallas_src>

<mosaic_0001>
module attributes {stable_mosaic.version = 11 : i64} {
  func.func @_conv_bn_act_kernel(%arg0: i32, %arg1: memref<1x16x16x16xf32, #tpu.memory_space<vmem>>, %arg2: memref<144x32xf32, #tpu.memory_space<vmem>>, %arg3: memref<1x32xf32, #tpu.memory_space<vmem>>, %arg4: memref<1x32xf32, #tpu.memory_space<vmem>>, %arg5: memref<1x16x16x32xf32, #tpu.memory_space<vmem>>, %arg6: memref<18x18x16xf32, #tpu.memory_space<vmem>>, %arg7: memref<256x144xf32, #tpu.memory_space<vmem>>) attributes {dimension_semantics = [#tpu.dimension_semantics<parallel>], iteration_bounds = array<i64: 2>, scalar_prefetch = 0 : i64, scratch_operands = 2 : i64, tpu.core_type = #tpu.core_type<tc>, window_params = [{transform_indices = @transform_0, window_bounds = array<i64: 1, 16, 16, 16>}, {pipeline_mode = #tpu.pipeline_mode<synchronous>, transform_indices = @transform_1, window_bounds = array<i64: 144, 32>}, {pipeline_mode = #tpu.pipeline_mode<synchronous>, transform_indices = @transform_2, window_bounds = array<i64: 1, 32>}, {pipeline_mode = #tpu.pipeline_mode<synchronous>, transform_indices = @transform_3, window_bounds = array<i64: 1, 32>}, {transform_indices = @transform_4, window_bounds = array<i64: 1, 16, 16, 32>}]} {
    %cst = arith.constant 0.000000e+00 : f32
    %0 = vector.broadcast %cst : f32 to vector<1x18x16xf32>
    %cst_0 = arith.constant 0.000000e+00 : f32
    %1 = vector.broadcast %cst_0 : f32 to vector<18x1x16xf32>
    %c0 = arith.constant 0 : index
    %c0_1 = arith.constant 0 : index
    %c0_2 = arith.constant 0 : index
    %2 = vector.load %arg6[%c0, %c0_1, %c0_2] : memref<18x18x16xf32, #tpu.memory_space<vmem>>, vector<1x18x16xf32>
    tpu.vector_store %arg6[%c0, %c0_1, %c0_2], %0 {strides = array<i32>} : memref<18x18x16xf32, #tpu.memory_space<vmem>>, vector<1x18x16xf32>,
    %c17 = arith.constant 17 : index
    %c0_3 = arith.constant 0 : index
    %c0_4 = arith.constant 0 : index
    %3 = vector.load %arg6[%c17, %c0_3, %c0_4] : memref<18x18x16xf32, #tpu.memory_space<vmem>>, vector<1x18x16xf32>
    tpu.vector_store %arg6[%c17, %c0_3, %c0_4], %0 {strides = array<i32>} : memref<18x18x16xf32, #tpu.memory_space<vmem>>, vector<1x18x16xf32>,
    %c0_5 = arith.constant 0 : index
    %c0_6 = arith.constant 0 : index
    %c0_7 = arith.constant 0 : index
    %4 = vector.load %arg6[%c0_5, %c0_6, %c0_7] : memref<18x18x16xf32, #tpu.memory_space<vmem>>, vector<18x1x16xf32>
    tpu.vector_store %arg6[%c0_5, %c0_6, %c0_7], %1 {strides = array<i32>} : memref<18x18x16xf32, #tpu.memory_space<vmem>>, vector<18x1x16xf32>,
    %c0_8 = arith.constant 0 : index
    %c17_9 = arith.constant 17 : index
    %c0_10 = arith.constant 0 : index
    %5 = vector.load %arg6[%c0_8, %c17_9, %c0_10] : memref<18x18x16xf32, #tpu.memory_space<vmem>>, vector<18x1x16xf32>
    tpu.vector_store %arg6[%c0_8, %c17_9, %c0_10], %1 {strides = array<i32>} : memref<18x18x16xf32, #tpu.memory_space<vmem>>, vector<18x1x16xf32>,
    %c0_11 = arith.constant 0 : index
    %c0_12 = arith.constant 0 : index
    %c0_13 = arith.constant 0 : index
    %c0_14 = arith.constant 0 : index
    %6 = vector.load %arg1[%c0_11, %c0_12, %c0_13, %c0_14] : memref<1x16x16x16xf32, #tpu.memory_space<vmem>>, vector<1x16x16x16xf32>
    %7 = vector.shape_cast %6 : vector<1x16x16x16xf32> to vector<16x16x16xf32>
    %c1 = arith.constant 1 : index
    %c1_15 = arith.constant 1 : index
    %c0_16 = arith.constant 0 : index
    %8 = vector.load %arg6[%c1, %c1_15, %c0_16] : memref<18x18x16xf32, #tpu.memory_space<vmem>>, vector<16x16x16xf32>
    tpu.vector_store %arg6[%c1, %c1_15, %c0_16], %7 {strides = array<i32>} : memref<18x18x16xf32, #tpu.memory_space<vmem>>, vector<16x16x16xf32>,
    %c0_17 = arith.constant 0 : index
    %c0_18 = arith.constant 0 : index
    %c0_19 = arith.constant 0 : index
    %9 = vector.load %arg6[%c0_17, %c0_18, %c0_19] : memref<18x18x16xf32, #tpu.memory_space<vmem>>, vector<16x16x16xf32>
    %10 = vector.shape_cast %9 : vector<16x16x16xf32> to vector<256x16xf32>
    %c0_20 = arith.constant 0 : index
    %c0_21 = arith.constant 0 : index
    %11 = vector.load %arg7[%c0_20, %c0_21] : memref<256x144xf32, #tpu.memory_space<vmem>>, vector<256x16xf32>
    tpu.vector_store %arg7[%c0_20, %c0_21], %10 {strides = array<i32>} : memref<256x144xf32, #tpu.memory_space<vmem>>, vector<256x16xf32>,
    %c0_22 = arith.constant 0 : index
    %c1_23 = arith.constant 1 : index
    %c0_24 = arith.constant 0 : index
    %12 = vector.load %arg6[%c0_22, %c1_23, %c0_24] : memref<18x18x16xf32, #tpu.memory_space<vmem>>, vector<16x16x16xf32>
    %13 = vector.shape_cast %12 : vector<16x16x16xf32> to vector<256x16xf32>
    %c0_25 = arith.constant 0 : index
    %c16 = arith.constant 16 : index
    %14 = vector.load %arg7[%c0_25, %c16] : memref<256x144xf32, #tpu.memory_space<vmem>>, vector<256x16xf32>
    tpu.vector_store %arg7[%c0_25, %c16], %13 {strides = array<i32>} : memref<256x144xf32, #tpu.memory_space<vmem>>, vector<256x16xf32>,
    %c0_26 = arith.constant 0 : index
    %c2 = arith.constant 2 : index
    %c0_27 = arith.constant 0 : index
    %15 = vector.load %arg6[%c0_26, %c2, %c0_27] : memref<18x18x16xf32, #tpu.memory_space<vmem>>, vector<16x16x16xf32>
    %16 = vector.shape_cast %15 : vector<16x16x16xf32> to vector<256x16xf32>
    %c0_28 = arith.constant 0 : index
    %c32 = arith.constant 32 : index
    %17 = vector.load %arg7[%c0_28, %c32] : memref<256x144xf32, #tpu.memory_space<vmem>>, vector<256x16xf32>
    tpu.vector_store %arg7[%c0_28, %c32], %16 {strides = array<i32>} : memref<256x144xf32, #tpu.memory_space<vmem>>, vector<256x16xf32>,
    %c1_29 = arith.constant 1 : index
    %c0_30 = arith.constant 0 : index
    %c0_31 = arith.constant 0 : index
    %18 = vector.load %arg6[%c1_29, %c0_30, %c0_31] : memref<18x18x16xf32, #tpu.memory_space<vmem>>, vector<16x16x16xf32>
    %19 = vector.shape_cast %18 : vector<16x16x16xf32> to vector<256x16xf32>
    %c0_32 = arith.constant 0 : index
    %c48 = arith.constant 48 : index
    %20 = vector.load %arg7[%c0_32, %c48] : memref<256x144xf32, #tpu.memory_space<vmem>>, vector<256x16xf32>
    tpu.vector_store %arg7[%c0_32, %c48], %19 {strides = array<i32>} : memref<256x144xf32, #tpu.memory_space<vmem>>, vector<256x16xf32>,
    %c1_33 = arith.constant 1 : index
    %c1_34 = arith.constant 1 : index
    %c0_35 = arith.constant 0 : index
    %21 = vector.load %arg6[%c1_33, %c1_34, %c0_35] : memref<18x18x16xf32, #tpu.memory_space<vmem>>, vector<16x16x16xf32>
    %22 = vector.shape_cast %21 : vector<16x16x16xf32> to vector<256x16xf32>
    %c0_36 = arith.constant 0 : index
    %c64 = arith.constant 64 : index
    %23 = vector.load %arg7[%c0_36, %c64] : memref<256x144xf32, #tpu.memory_space<vmem>>, vector<256x16xf32>
    tpu.vector_store %arg7[%c0_36, %c64], %22 {strides = array<i32>} : memref<256x144xf32, #tpu.memory_space<vmem>>, vector<256x16xf32>,
    %c1_37 = arith.constant 1 : index
    %c2_38 = arith.constant 2 : index
    %c0_39 = arith.constant 0 : index
    %24 = vector.load %arg6[%c1_37, %c2_38, %c0_39] : memref<18x18x16xf32, #tpu.memory_space<vmem>>, vector<16x16x16xf32>
    %25 = vector.shape_cast %24 : vector<16x16x16xf32> to vector<256x16xf32>
    %c0_40 = arith.constant 0 : index
    %c80 = arith.constant 80 : index
    %26 = vector.load %arg7[%c0_40, %c80] : memref<256x144xf32, #tpu.memory_space<vmem>>, vector<256x16xf32>
    tpu.vector_store %arg7[%c0_40, %c80], %25 {strides = array<i32>} : memref<256x144xf32, #tpu.memory_space<vmem>>, vector<256x16xf32>,
    %c2_41 = arith.constant 2 : index
    %c0_42 = arith.constant 0 : index
    %c0_43 = arith.constant 0 : index
    %27 = vector.load %arg6[%c2_41, %c0_42, %c0_43] : memref<18x18x16xf32, #tpu.memory_space<vmem>>, vector<16x16x16xf32>
    %28 = vector.shape_cast %27 : vector<16x16x16xf32> to vector<256x16xf32>
    %c0_44 = arith.constant 0 : index
    %c96 = arith.constant 96 : index
    %29 = vector.load %arg7[%c0_44, %c96] : memref<256x144xf32, #tpu.memory_space<vmem>>, vector<256x16xf32>
    tpu.vector_store %arg7[%c0_44, %c96], %28 {strides = array<i32>} : memref<256x144xf32, #tpu.memory_space<vmem>>, vector<256x16xf32>,
    %c2_45 = arith.constant 2 : index
    %c1_46 = arith.constant 1 : index
    %c0_47 = arith.constant 0 : index
    %30 = vector.load %arg6[%c2_45, %c1_46, %c0_47] : memref<18x18x16xf32, #tpu.memory_space<vmem>>, vector<16x16x16xf32>
    %31 = vector.shape_cast %30 : vector<16x16x16xf32> to vector<256x16xf32>
    %c0_48 = arith.constant 0 : index
    %c112 = arith.constant 112 : index
    %32 = vector.load %arg7[%c0_48, %c112] : memref<256x144xf32, #tpu.memory_space<vmem>>, vector<256x16xf32>
    tpu.vector_store %arg7[%c0_48, %c112], %31 {strides = array<i32>} : memref<256x144xf32, #tpu.memory_space<vmem>>, vector<256x16xf32>,
    %c2_49 = arith.constant 2 : index
    %c2_50 = arith.constant 2 : index
    %c0_51 = arith.constant 0 : index
    %33 = vector.load %arg6[%c2_49, %c2_50, %c0_51] : memref<18x18x16xf32, #tpu.memory_space<vmem>>, vector<16x16x16xf32>
    %34 = vector.shape_cast %33 : vector<16x16x16xf32> to vector<256x16xf32>
    %c0_52 = arith.constant 0 : index
    %c128 = arith.constant 128 : index
    %35 = vector.load %arg7[%c0_52, %c128] : memref<256x144xf32, #tpu.memory_space<vmem>>, vector<256x16xf32>
    tpu.vector_store %arg7[%c0_52, %c128], %34 {strides = array<i32>} : memref<256x144xf32, #tpu.memory_space<vmem>>, vector<256x16xf32>,
    %c0_53 = arith.constant 0 : index
    %c0_54 = arith.constant 0 : index
    %36 = vector.load %arg7[%c0_53, %c0_54] : memref<256x144xf32, #tpu.memory_space<vmem>>, vector<256x144xf32>
    %c0_55 = arith.constant 0 : index
    %c0_56 = arith.constant 0 : index
    %37 = vector.load %arg2[%c0_55, %c0_56] : memref<144x32xf32, #tpu.memory_space<vmem>>, vector<144x32xf32>
    %cst_57 = arith.constant dense<0.000000e+00> : vector<256x32xf32>
    %38 = tpu.matmul %36, %37, %cst_57 {dimension_numbers = #tpu.dot_dimension_numbers<[1], [0], [0], [1], [0, 0, 1, 1], [], []>} : vector<256x144xf32>, vector<144x32xf32>, vector<256x32xf32> -> vector<256x32xf32>
    %c0_58 = arith.constant 0 : index
    %c0_59 = arith.constant 0 : index
    %39 = vector.load %arg3[%c0_58, %c0_59] : memref<1x32xf32, #tpu.memory_space<vmem>>, vector<1x32xf32>
    %40 = vector.broadcast %39 : vector<1x32xf32> to vector<256x32xf32>
    %41 = arith.mulf %38, %40 : vector<256x32xf32>
    %c0_60 = arith.constant 0 : index
    %c0_61 = arith.constant 0 : index
    %42 = vector.load %arg4[%c0_60, %c0_61] : memref<1x32xf32, #tpu.memory_space<vmem>>, vector<1x32xf32>
    %43 = vector.broadcast %42 : vector<1x32xf32> to vector<256x32xf32>
    %44 = arith.addf %41, %43 : vector<256x32xf32>
    %cst_62 = arith.constant 0.000000e+00 : f32
    %45 = vector.broadcast %cst_62 : f32 to vector<256x32xf32>
    %46 = arith.maximumf %44, %45 : vector<256x32xf32>
    %47 = vector.shape_cast %46 : vector<256x32xf32> to vector<16x16x32xf32>
    %c0_63 = arith.constant 0 : index
    %c0_64 = arith.constant 0 : index
    %c0_65 = arith.constant 0 : index
    %c0_66 = arith.constant 0 : index
    %48 = vector.load %arg5[%c0_63, %c0_64, %c0_65, %c0_66] : memref<1x16x16x32xf32, #tpu.memory_space<vmem>>, vector<1x16x16x32xf32>
    %49 = vector.shape_cast %48 : vector<1x16x16x32xf32> to vector<16x16x32xf32>
    %50 = vector.shape_cast %47 : vector<16x16x32xf32> to vector<1x16x16x32xf32>
    tpu.vector_store %arg5[%c0_63, %c0_64, %c0_65, %c0_66], %50 {strides = array<i32>} : memref<1x16x16x32xf32, #tpu.memory_space<vmem>>, vector<1x16x16x32xf32>,
    return
  }
  func.func @transform_0(%arg0: i32) -> (i32, i32, i32, i32) {
    %c0_i32 = arith.constant 0 : i32
    %c0_i32_0 = arith.constant 0 : i32
    %c0_i32_1 = arith.constant 0 : i32
    %c0_i32_2 = arith.constant 0 : i32
    return %arg0, %c0_i32, %c0_i32_0, %c0_i32_1 : i32, i32, i32, i32
  }
  func.func @transform_1(%arg0: i32) -> (i32, i32) {
    %c0_i32 = arith.constant 0 : i32
    %c0_i32_0 = arith.constant 0 : i32
    %c0_i32_1 = arith.constant 0 : i32
    return %c0_i32, %c0_i32_0 : i32, i32
  }
  func.func @transform_2(%arg0: i32) -> (i32, i32) {
    %c0_i32 = arith.constant 0 : i32
    %c0_i32_0 = arith.constant 0 : i32
    %c0_i32_1 = arith.constant 0 : i32
    return %c0_i32, %c0_i32_0 : i32, i32
  }
  func.func @transform_3(%arg0: i32) -> (i32, i32) {
    %c0_i32 = arith.constant 0 : i32
    %c0_i32_0 = arith.constant 0 : i32
    %c0_i32_1 = arith.constant 0 : i32
    return %c0_i32, %c0_i32_0 : i32, i32
  }
  func.func @transform_4(%arg0: i32) -> (i32, i32, i32, i32) {
    %c0_i32 = arith.constant 0 : i32
    %c0_i32_0 = arith.constant 0 : i32
    %c0_i32_1 = arith.constant 0 : i32
    %c0_i32_2 = arith.constant 0 : i32
    return %arg0, %c0_i32, %c0_i32_0, %c0_i32_1 : i32, i32, i32, i32
  }
}

</mosaic_0001>

<bundles_post_ra>
// kernel: tpu_custom_call.1
= control target key start
LH: loop header
LB: loop body
LE: loop exit
PB: predicated region body
PF: predicated region fallthrough
CT: control target
= control target key end

     0   :  { %9 = vsyncpa [#allocation5], 0  ;;  %s4103_s0 = inlined_call_operand.hbm [shape: f32[2,16,16,16], index: 0, kind: input, shape index: {}]   ;;  %s4104_s1 = inlined_call_operand.vmem [shape: f32[144,32], index: 1, kind: input, shape index: {}]   ;;  %s4105_s2 = inlined_call_operand.vmem [shape: f32[1,32], index: 2, kind: input, shape index: {}]   ;;  %s4106_s3 = inlined_call_operand.vmem [shape: f32[1,32], index: 3, kind: input, shape index: {}]   ;;  %s4107_s4 = inlined_call_operand.hbm [shape: f32[2,16,16,32], index: 4, kind: output, shape index: {}]  }
   0x1   :  { %11 = vsyncpa [#allocation5 + $0x1], 0 }
   0x2   :  { %12 = vsyncpa [#allocation6], 0 }
   0x3   :  { %14 = vsyncpa [#allocation6 + $0x1], 0  ;;  %s2716_s15 = smov 0   ;;  %s2718_s16 = smov 0  }
   0x4   :  { %s2720_s17 = smov 0   ;;  %s2722_s18 = smov 0  }
   0x5 LB: > { %s2737_s19 = sadd.s32 4294967295, %s2677_s18   ;;  %s2439_s20 = sadd.s32 4294967294, %s2677_s18   ;;  %s2677_s18 = sphi %s2722_s18, %s4138_s18   ;;  %s2673_s17 = sphi %s2720_s17, %s4137_s17   ;;  %s2669_s16 = sphi %s2718_s16, %s4136_s16   ;;  %s2665_s15 = sphi %s2716_s15, %s4135_s15  }
   0x6   : > { %s2741_s21 = sadd.s32 1, %s2677_s18   ;;  %s27_s22 = sadd.s32 1, %s2673_s17 }
   0x7   : > { %s24_s23 = ssub.s32 %s2677_s18, %s2741_s21  ;;  %p34_p0 = scmp.ne.s32.totalorder %s2673_s17, %s2669_s16 }
   0x8   : > { %p25_p1 = scmp.eq.s32.totalorder %s24_s23, 0  ;;  %p35_p2 = scmp.eq.s32.totalorder %s2677_s18, 0 }
   0x9   : > { %p40_p3 = scmp.ne.s32.totalorder %s2669_s16, %s2665_s15  ;;  %p41_p4 = scmp.eq.s32.totalorder %s2737_s19, 0 }
   0xa   : > { %s2753_s24 = scalar_select %p25_p1, %s2673_s17, %s27_s22  }
   0xb   : > { %p2755_p5 = por %p35_p2, %p34_p0  ;;  %p2759_p6 = por %p41_p4, %p40_p3 }
   0xc   : > { %p127_p7 = scmp.eq.s32.totalorder %s2737_s19, 1  ;;  %p133_p8 = scmp.eq.s32.totalorder %s2439_s20, 1 }
   0xd   : > { %p2533_p10 = scmp.lt.s32.totalorder %s2677_s18, 2  ;;  %s162_s29 = sand.u32 1, %s2673_s17  }
   0xe   : > { %p2766_p11 = por %p127_p7, %p34_p0  ;;  %p2770_p12 = por %p133_p8, %p40_p3 }
   0xf   : > { %s2485_s30 = sshll.u32 %s2677_s18, 8  ;;  %s2442_s5 = sshll.u32 %s162_s29, 8 }
  0x10   : > { %s171_s8 = scalar_lea.hbm %s4103_s0, %s2485_s30  ;;  %s166_s10 = scalar_lea.vmem [#allocation4], %s2442_s5 }
  0x11   : > { %s172_s9 = sshll.u32 %s171_s8, 4  ;;  %s174_s11 = sshll.u32 %s166_s10, 4  ;;  %s173_s9 = int_to_ptr.hbm [resolvable:$true] %s172_s9  ;;  %s175_s11 = int_to_ptr.vmem [resolvable:$true] %s174_s11 }
  0x12   : > { %p2781_p13 = pnand %p2533_p10, %p2755_p5  ;;  %p2445_p0 = scmp.ge.s32.totalorder %s2677_s18, 1 }
  0x13   : > { %p182_p1 = scmp.lt.s32.totalorder %s2677_s18, 3  ;;  %s163_s13 = scalar_lea.sflag [#allocation5], %s162_s29 }
  0x14   : > { %s2581_s14 = sshra.s32 %s173_s9, 4  ;;  %p2585_p3 = pneg %p2781_p13  ;;  %s2582_s14 = int_to_ptr.hbm [resolvable:$true] %s2581_s14 }
  0x15   : > { %s2583_s20 = scalar_lea.hbm %s2582_s14, 256  ;;  %s2588_s25 = scalar_lea.hbm %s4103_s0, 512 }
  0x16   : > { %p2584_p2 = scmp.ne.s32.totalorder %s2582_s14, %s2583_s20  ;;  %p2589_p5 = scmp.lt.s32.totalorder %s2582_s14, %s4103_s0 }
  0x17   : > { %p2590_p8 = scmp.lt.s32.totalorder %s2588_s25, %s2583_s20 }
  0x18   : > { %p2586_p4 = pnand %p2585_p3, %p2584_p2 }
  0x19   : > { %p2591_p10 = por %p2590_p8, %p2589_p5 }
  0x1a   : > { %p2587_p7 = pneg %p2586_p4 }
  0x1c   : > { %p2592_p9 = pnand %p2591_p10, %p2587_p7 }
  0x1e   : > { %2595 = shalt.err (!%p2592_p9)
}
  0x1f   : > { %s2679_s29 = smov 128   ;;  %s2680_s6 = smov 8  }
  0x20   : > { %2528 = dma.hbm_to_vmem [thread:$0]  (!%p2781_p13), %s173_s9, 4096, %s175_s11, %s163_s13, %s2679_s29, %s2679_s29, %s2680_s6  }
  0x21   : > { %p183_p2 = pnand %p2445_p0, %p182_p1 }
  0x23   : > { %186 = sbr.rel (%p183_p2) target bundleno = 943 (0x3af), region = 36 }
  0x28   : > { %s2802_s7 = sand.u32 1, %s2669_s16  }
  0x29   : > { %s2446_s8 = sshll.u32 %s2802_s7, 8  ;;  %s189_s10 = scalar_lea.sflag [#allocation5], %s2802_s7 }
  0x2a   : > { %s2808_s14 = scalar_lea.vmem [#allocation4], %s2446_s8 }
  0x2b   : > { %2656 = dma.done.wait (%p2759_p6), %s189_s10, 4096  }
  0x2c   : > { %2658 = vsyncadd (%p2759_p6), %s189_s10, 4294963200  ;;  %vm218_vm0 = vcmask 130048   ;;  %v2681_v0 = vmov 0.0   ;;  %vm227_vm1 = vcmask 122880   ;;  %s2682_s26 = smov 16   ;;  %v264_v2 = vld [vmem:[%s2808_s14] sm:$0xff] }
  0x2d   : > { %219 = vst.msk [vmem:[#allocation2] sm:$0xff] %vm218_vm0, %v2681_v0  ;;  %vm221_vm2 = vcmask 123904   ;;  %v265_v3 = vld [vmem:[%s2808_s14 + $0x8] sm:$0xff]  ;;  %v268_v4 = vld [vmem:[%s2808_s14 + $0x20] sm:$0xff]  ;;  %v271_v6 = vld [vmem:[%s2808_s14 + $0x38] sm:$0xff]  ;;  %vm553_vm3 = vcmask 261248  }
  0x2e   : > { %220 = vst.msk [vmem:[#allocation2 + $0x8] sm:$0xff] %vm218_vm0, %v2681_v0  ;;  %v269_v5 = vld [vmem:[%s2808_s14 + $0x28] sm:$0xff]  ;;  %v266_v8 = vld [vmem:[%s2808_s14 + $0x10] sm:$0xff]  ;;  %v272_v9 = vld [vmem:[%s2808_s14 + $0x40] sm:$0xff]  ;;  %s2683_s9 = smov 32   ;;  %s2684_s11 = smov 48  }
  0x2f   : > { %228 = vst.msk [vmem:[#allocation2] sm:$0x1] %vm227_vm1, %v2681_v0  ;;  %v274_v11 = vld [vmem:[%s2808_s14 + $0x50] sm:$0xff]  ;;  %v267_v12 = vld [vmem:[%s2808_s14 + $0x18] sm:$0xff]  ;;  %v277_v14 = vld [vmem:[%s2808_s14 + $0x68] sm:$0xff]  ;;  %vm746_vm4 = vcmask 392448  }
  0x30   : > { %224 = vst.msk [vmem:[#allocation2 + $0x198] sm:$0xff] %vm218_vm0, %v2681_v0  ;;  %v275_v13 = vld [vmem:[%s2808_s14 + $0x58] sm:$0xff]  ;;  %v270_v16 = vld [vmem:[%s2808_s14 + $0x30] sm:$0xff]  ;;  %v280_v19 = vld [vmem:[%s2808_s14 + $0x80] sm:$0xff]  ;;  %s2685_s12 = smov 64   ;;  %vm939_vm5 = vcmask 523648  }
  0x31   : > { %225 = vst.msk [vmem:[#allocation2 + $0x1a0] sm:$0xff] %vm218_vm0, %v2681_v0  ;;  %v278_v17 = vld [vmem:[%s2808_s14 + $0x70] sm:$0xff]  ;;  %v273_v20 = vld [vmem:[%s2808_s14 + $0x48] sm:$0xff]  ;;  %v283_v23 = vld [vmem:[%s2808_s14 + $0x98] sm:$0xff]  ;;  %s2686_s25 = smov 80   ;;  %s2687_s30 = smov 112  }
  0x32   : > { %229 = vst.msk [vmem:[#allocation2 + $0x18] sm:$0x1] %vm227_vm1, %v2681_v0  ;;  %v281_v22 = vld [vmem:[%s2808_s14 + $0x88] sm:$0xff]  ;;  %v276_v24 = vld [vmem:[%s2808_s14 + $0x60] sm:$0xff]  ;;  %v286_v29 = vld [vmem:[%s2808_s14 + $0xb0] sm:$0xff]  ;;  %s2688_s5 = smov 96  }
  0x33   : > { %230 = vst.msk [vmem:[#allocation2 + $0x30] sm:$0x1] %vm227_vm1, %v2681_v0  ;;  %v284_v28 = vld [vmem:[%s2808_s14 + $0xa0] sm:$0xff]  ;;  %v279_v30 = vld [vmem:[%s2808_s14 + $0x78] sm:$0xff]  ;;  %v289_v35 = vld [vmem:[%s2808_s14 + $0xc8] sm:$0xff]  ;;  %vm1132_vm6 = vcmask 654848  }
  0x34   : > { %231 = vst.msk [vmem:[#allocation2 + $0x48] sm:$0x1] %vm227_vm1, %v2681_v0  ;;  %v287_v34 = vld [vmem:[%s2808_s14 + $0xb8] sm:$0xff]  ;;  %v282_v36 = vld [vmem:[%s2808_s14 + $0x90] sm:$0xff]  ;;  %v292_v41 = vld [vmem:[%s2808_s14 + $0xe0] sm:$0xff]  ;;  %vm1325_vm7 = vcmask 786048  }
  0x35   : > { %v393_v1 = vld [vmem:[#allocation2 + $0x1] sm:$0xff]  ;;  %232 = vst.msk [vmem:[#allocation2 + $0x60] sm:$0x1] %vm227_vm1, %v2681_v0  ;;  %v285_v42 = vld [vmem:[%s2808_s14 + $0xa8] sm:$0xff]  ;;  %v288_v47 = vld [vmem:[%s2808_s14 + $0xc0] sm:$0xff]  ;;  %vm1519_vm8 = vcmask 917248  }
  0x36   : > { %457 = vrot.lane.b32.xlu0 %v393_v1, %s2682_s26  ;;  %233 = vst.msk [vmem:[#allocation2 + $0x78] sm:$0x1] %vm227_vm1, %v2681_v0  ;;  %v290_v40 = vld [vmem:[%s2808_s14 + $0xd0] sm:$0xff]  ;;  %v293_v46 = vld [vmem:[%s2808_s14 + $0xe8] sm:$0xff]  ;;  %v291_v51 = vld [vmem:[%s2808_s14 + $0xd8] sm:$0xff]  ;;  %vm1712_vm9 = vcmask 1048448  }
  0x37   : > { %234 = vst.msk [vmem:[#allocation2 + $0x90] sm:$0x1] %vm227_vm1, %v2681_v0  ;;  %v329_v1 = vld [vmem:[#allocation2] sm:$0xff]  ;;  %vm2317_vm10 = vcmask 261120   ;;  %s2631_s22 = scalar_lea.hbm %s4107_s4, 512 }
  0x38   : > { %235 = vst.msk [vmem:[#allocation2 + $0xa8] sm:$0x1] %vm227_vm1, %v2681_v0 }
  0x39   : > { %236 = vst.msk [vmem:[#allocation2 + $0xc0] sm:$0x1] %vm227_vm1, %v2681_v0 }
  0x3a   : > { %237 = vst.msk [vmem:[#allocation2 + $0xd8] sm:$0x1] %vm227_vm1, %v2681_v0 }
  0x3b   : > { %238 = vst.msk [vmem:[#allocation2 + $0xf0] sm:$0x1] %vm227_vm1, %v2681_v0 }
  0x3c   : > { %239 = vst.msk [vmem:[#allocation2 + $0x108] sm:$0x1] %vm227_vm1, %v2681_v0 }
  0x3d   : > { %240 = vst.msk [vmem:[#allocation2 + $0x120] sm:$0x1] %vm227_vm1, %v2681_v0 }
  0x3e   : > { %241 = vst.msk [vmem:[#allocation2 + $0x138] sm:$0x1] %vm227_vm1, %v2681_v0 }
  0x3f   : > { %242 = vst.msk [vmem:[#allocation2 + $0x150] sm:$0x1] %vm227_vm1, %v2681_v0 }
  0x40   : > { %243 = vst.msk [vmem:[#allocation2 + $0x168] sm:$0x1] %vm227_vm1, %v2681_v0 }
  0x41   : > { %244 = vst.msk [vmem:[#allocation2 + $0x180] sm:$0x1] %vm227_vm1, %v2681_v0 }
  0x42   : > { %247 = vst.msk [vmem:[#allocation2 + $0x29] sm:$0x1] %vm227_vm1, %v2681_v0 }
  0x43   : > { %248 = vst.msk [vmem:[#allocation2 + $0x41] sm:$0x1] %vm227_vm1, %v2681_v0 }
  0x44   : > { %249 = vst.msk [vmem:[#allocation2 + $0x59] sm:$0x1] %vm227_vm1, %v2681_v0 }
  0x45   : > { %250 = vst.msk [vmem:[#allocation2 + $0x71] sm:$0x1] %vm227_vm1, %v2681_v0 }
  0x46   : > { %251 = vst.msk [vmem:[#allocation2 + $0x89] sm:$0x1] %vm227_vm1, %v2681_v0 }
  0x47   : > { %252 = vst.msk [vmem:[#allocation2 + $0xa1] sm:$0x1] %vm227_vm1, %v2681_v0 }
  0x48   : > { %253 = vst.msk [vmem:[#allocation2 + $0xb9] sm:$0x1] %vm227_vm1, %v2681_v0 }
  0x49   : > { %254 = vst.msk [vmem:[#allocation2 + $0xd1] sm:$0x1] %vm227_vm1, %v2681_v0 }
  0x4a   : > { %255 = vst.msk [vmem:[#allocation2 + $0xe9] sm:$0x1] %vm227_vm1, %v2681_v0 }
  0x4b   : > { %256 = vst.msk [vmem:[#allocation2 + $0x101] sm:$0x1] %vm227_vm1, %v2681_v0 }
  0x4c   : > { %257 = vst.msk [vmem:[#allocation2 + $0x119] sm:$0x1] %vm227_vm1, %v2681_v0 }
  0x4d   : > { %258 = vst.msk [vmem:[#allocation2 + $0x131] sm:$0x1] %vm227_vm1, %v2681_v0 }
  0x4e   : > { %259 = vst.msk [vmem:[#allocation2 + $0x149] sm:$0x1] %vm227_vm1, %v2681_v0 }
  0x4f   : > { %260 = vst.msk [vmem:[#allocation2 + $0x161] sm:$0x1] %vm227_vm1, %v2681_v0 }
  0x50   : > { %261 = vst.msk [vmem:[#allocation2 + $0x179] sm:$0x1] %vm227_vm1, %v2681_v0 }
  0x51   : > { %262 = vst.msk [vmem:[#allocation2 + $0x191] sm:$0x1] %vm227_vm1, %v2681_v0 }
  0x52   : > { %297 = vst.msk [vmem:[#allocation2 + $0x19] sm:$0xff] %vm218_vm0, %v264_v2 }
  0x53   : > { %245 = vst.msk [vmem:[#allocation2 + $0x198] sm:$0x1] %vm227_vm1, %v2681_v0 }
  0x54   : > { %222 = vst.msk [vmem:[#allocation2 + $0x10] sm:$0x3] %vm221_vm2, %v2681_v0 }
  0x55   : > { %226 = vst.msk [vmem:[#allocation2 + $0x1a8] sm:$0x3] %vm221_vm2, %v2681_v0 }
  0x56   : > { %246 = vst.msk [vmem:[#allocation2 + $0x11] sm:$0x1] %vm227_vm1, %v2681_v0 }
  0x57   : > { %298 = vst.msk [vmem:[#allocation2 + $0x21] sm:$0xff] %vm218_vm0, %v265_v3 }
  0x58   : > { %263 = vst.msk [vmem:[#allocation2 + $0x1a9] sm:$0x1] %vm227_vm1, %v2681_v0 }
  0x59   : > { %v2862_v7 = vld [vmem:[#allocation2 + $0x19] sm:$0xff]  ;;  %301 = vst.msk [vmem:[#allocation2 + $0x49] sm:$0xff] %vm218_vm0, %v268_v4 }
  0x5a   : > { %461 = vrot.lane.b32.xlu1 %v2862_v7, %s2682_s26  ;;  %302 = vst.msk [vmem:[#allocation2 + $0x51] sm:$0xff] %vm218_vm0, %v269_v5 }
  0x5b   : > { %v394_v10 = vld [vmem:[#allocation2 + $0x9] sm:$0xff]  ;;  %304 = vst.msk [vmem:[#allocation2 + $0x69] sm:$0xff] %vm218_vm0, %v271_v6 }
  0x5c   : > { %459 = vrot.lane.b32.xlu0 %v394_v10, %s2682_s26  ;;  %299 = vst.msk [vmem:[#allocation2 + $0x31] sm:$0xff] %vm218_vm0, %v266_v8  ;;  %v3032_v8 = vld [vmem:[#allocation2 + $0x18] sm:$0xff] }
  0x5d   : > { %305 = vst.msk [vmem:[#allocation2 + $0x79] sm:$0xff] %vm218_vm0, %v272_v9  ;;  %v587_v5 = vld [vmem:[#allocation2 + $0xa] sm:$0xff] }
  0x5e   : > { %307 = vst.msk [vmem:[#allocation2 + $0x91] sm:$0xff] %vm218_vm0, %v274_v11  ;;  %v2879_v15 = vld [vmem:[#allocation2 + $0x21] sm:$0xff] }
  0x5f   : > { %300 = vst.msk [vmem:[#allocation2 + $0x39] sm:$0xff] %vm218_vm0, %v267_v12  ;;  %v330_v9 = vld [vmem:[#allocation2 + $0x8] sm:$0xff]  ;;  %v3037_v11 = vld [vmem:[#allocation2 + $0x1a] sm:$0xff] }
  0x60   : > { %308 = vst.msk [vmem:[#allocation2 + $0x99] sm:$0xff] %vm218_vm0, %v275_v13  ;;  %v2885_v18 = vld [vmem:[#allocation2 + $0x49] sm:$0xff] }
  0x61   : > { %310 = vst.msk [vmem:[#allocation2 + $0xb1] sm:$0xff] %vm218_vm0, %v277_v14  ;;  %v2906_v25 = vld [vmem:[#allocation2 + $0x51] sm:$0xff]  ;;  %v586_v13 = vld [vmem:[#allocation2 + $0x2] sm:$0xff] }
  0x62   : > { %463 = vrot.lane.b32.xlu1 %v2879_v15, %s2682_s26  ;;  %303 = vst.msk [vmem:[#allocation2 + $0x61] sm:$0xff] %vm218_vm0, %v270_v16  ;;  %v2910_v26 = vld [vmem:[#allocation2 + $0x69] sm:$0xff]  ;;  %v593_v60 = vld [vmem:[#allocation2 + $0x52] sm:$0xff]  ;;  %v3048_v14 = vld [vmem:[#allocation2 + $0x20] sm:$0xff] }
  0x63   : > { %v2893_v21 = vld [vmem:[#allocation2 + $0x31] sm:$0xff]  ;;  %311 = vst.msk [vmem:[#allocation2 + $0xc1] sm:$0xff] %vm218_vm0, %v278_v17  ;;  %v3052_v16 = vld [vmem:[#allocation2 + $0x48] sm:$0xff] }
  0x64   : > { %469 = vrot.lane.b32.xlu0 %v2885_v18, %s2682_s26  ;;  %465 = vrot.lane.b32.xlu2 %v2893_v21, %s2682_s26  ;;  %313 = vst.msk [vmem:[#allocation2 + $0xd9] sm:$0xff] %vm218_vm0, %v280_v19  ;;  %v2926_v31 = vld [vmem:[#allocation2 + $0x79] sm:$0xff]  ;;  %v3023_v2 = vld [vmem:[#allocation2 + $0x30] sm:$0xff] }
  0x65   : > { %306 = vst.msk [vmem:[#allocation2 + $0x81] sm:$0xff] %vm218_vm0, %v273_v20  ;;  %v2928_v32 = vld [vmem:[#allocation2 + $0x91] sm:$0xff]  ;;  %v589_v20 = vld [vmem:[#allocation2 + $0x22] sm:$0xff] }
  0x66   : > { %314 = vst.msk [vmem:[#allocation2 + $0xe1] sm:$0xff] %vm218_vm0, %v281_v22  ;;  %v2912_v27 = vld [vmem:[#allocation2 + $0x39] sm:$0xff]  ;;  %v592_v10 = vld [vmem:[#allocation2 + $0x4a] sm:$0xff] }
  0x67   : > { %316 = vst.msk [vmem:[#allocation2 + $0xf9] sm:$0xff] %vm218_vm0, %v283_v23  ;;  %v2944_v37 = vld [vmem:[#allocation2 + $0x99] sm:$0xff]  ;;  %v595_v17 = vld [vmem:[#allocation2 + $0x6a] sm:$0xff] }
  0x68   : > { %309 = vst.msk [vmem:[#allocation2 + $0xa9] sm:$0xff] %vm218_vm0, %v276_v24  ;;  %v2946_v38 = vld [vmem:[#allocation2 + $0xb1] sm:$0xff]  ;;  %v591_v56 = vld [vmem:[#allocation2 + $0x3a] sm:$0xff] }
  0x69   : > { %317 = vst.msk [vmem:[#allocation2 + $0x109] sm:$0xff] %vm218_vm0, %v284_v28  ;;  %v2930_v33 = vld [vmem:[#allocation2 + $0x61] sm:$0xff]  ;;  %v590_v55 = vld [vmem:[#allocation2 + $0x32] sm:$0xff] }
  0x6a   : > { %471 = vrot.lane.b32.xlu1 %v2906_v25, %s2682_s26  ;;  %319 = vst.msk [vmem:[#allocation2 + $0x121] sm:$0xff] %vm218_vm0, %v286_v29  ;;  %v2962_v43 = vld [vmem:[#allocation2 + $0xc1] sm:$0xff]  ;;  %v3039_v12 = vld [vmem:[#allocation2 + $0x38] sm:$0xff]  ;;  %v3064_v22 = vld [vmem:[#allocation2 + $0x50] sm:$0xff] }
  0x6b   : > { %312 = vst.msk [vmem:[#allocation2 + $0xc9] sm:$0xff] %vm218_vm0, %v279_v30  ;;  %v2964_v44 = vld [vmem:[#allocation2 + $0xd9] sm:$0xff]  ;;  %v594_v61 = vld [vmem:[#allocation2 + $0x62] sm:$0xff] }
  0x6c   : > { %475 = vrot.lane.b32.xlu0 %v2910_v26, %s2682_s26  ;;  %467 = vrot.lane.b32.xlu2 %v2912_v27, %s2682_s26  ;;  %320 = vst.msk [vmem:[#allocation2 + $0x129] sm:$0xff] %vm218_vm0, %v287_v34  ;;  %v2948_v39 = vld [vmem:[#allocation2 + $0x81] sm:$0xff]  ;;  %v598_v29 = vld [vmem:[#allocation2 + $0x92] sm:$0xff] }
  0x6d   : > { %322 = vst.msk [vmem:[#allocation2 + $0x141] sm:$0xff] %vm218_vm0, %v289_v35  ;;  %v2978_v48 = vld [vmem:[#allocation2 + $0xe1] sm:$0xff]  ;;  %v3081_v34 = vld [vmem:[#allocation2 + $0x78] sm:$0xff]  ;;  %v3085_v35 = vld [vmem:[#allocation2 + $0x90] sm:$0xff] }
  0x6e   : > { %315 = vst.msk [vmem:[#allocation2 + $0xf1] sm:$0xff] %vm218_vm0, %v282_v36  ;;  %v2980_v49 = vld [vmem:[#allocation2 + $0xf9] sm:$0xff]  ;;  %v3068_v23 = vld [vmem:[#allocation2 + $0x68] sm:$0xff] }
  0x6f   : > { %323 = vst.msk [vmem:[#allocation2 + $0x151] sm:$0xff] %vm218_vm0, %v290_v40  ;;  %v2966_v45 = vld [vmem:[#allocation2 + $0xa9] sm:$0xff]  ;;  %v3056_v19 = vld [vmem:[#allocation2 + $0x60] sm:$0xff] }
  0x70   : > { %325 = vst.msk [vmem:[#allocation2 + $0x169] sm:$0xff] %vm218_vm0, %v292_v41  ;;  %v2992_v52 = vld [vmem:[#allocation2 + $0x109] sm:$0xff]  ;;  %v3073_v28 = vld [vmem:[#allocation2 + $0x80] sm:$0xff] }
  0x71   : > { %318 = vst.msk [vmem:[#allocation2 + $0x111] sm:$0xff] %vm218_vm0, %v285_v42  ;;  %v2994_v53 = vld [vmem:[#allocation2 + $0x121] sm:$0xff] }
  0x72   : > { %477 = vrot.lane.b32.xlu1 %v2926_v31, %s2682_s26  ;;  %326 = vst.msk [vmem:[#allocation2 + $0x171] sm:$0xff] %vm218_vm0, %v293_v46  ;;  %v2982_v50 = vld [vmem:[#allocation2 + $0xc9] sm:$0xff]  ;;  %v596_v30 = vld [vmem:[#allocation2 + $0x7a] sm:$0xff] }
  0x73   : > { %321 = vst.msk [vmem:[#allocation2 + $0x139] sm:$0xff] %vm218_vm0, %v288_v47  ;;  %v3006_v57 = vld [vmem:[#allocation2 + $0x129] sm:$0xff]  ;;  %v599_v42 = vld [vmem:[#allocation2 + $0x9a] sm:$0xff] }
  0x74   : > { %481 = vrot.lane.b32.xlu0 %v2928_v32, %s2682_s26  ;;  %473 = vrot.lane.b32.xlu2 %v2930_v33, %s2682_s26  ;;  %324 = vst.msk [vmem:[#allocation2 + $0x159] sm:$0xff] %vm218_vm0, %v291_v51  ;;  %v420_v58 = vld [vmem:[#allocation2 + $0x141] sm:$0xff]  ;;  %v3097_v47 = vld [vmem:[#allocation2 + $0x98] sm:$0xff] }
  0x75   : > { %v2996_v54 = vld [vmem:[#allocation2 + $0xf1] sm:$0xff]  ;;  %1777 = vst.msk [vmem:[#allocation3 + $0x8] sm:$0xff] %vm218_vm0, %v590_v55  ;;  %v597_v40 = vld [vmem:[#allocation2 + $0x82] sm:$0xff] }
  0x76   : > { %1778 = vst.msk [vmem:[#allocation3 + $0x18] sm:$0xff] %vm218_vm0, %v591_v56  ;;  %v421_v62 = vld [vmem:[#allocation2 + $0x151] sm:$0xff]  ;;  %v3090_v41 = vld [vmem:[#allocation2 + $0xa8] sm:$0xff] }
  0x77   : > { %1780 = vst.msk [vmem:[#allocation3 + $0x38] sm:$0xff] %vm218_vm0, %v593_v60  ;;  %v423_v63 = vld [vmem:[#allocation2 + $0x169] sm:$0xff] }
  0x78   : > { %v3008_v59 = vld [vmem:[#allocation2 + $0x111] sm:$0xff]  ;;  %1781 = vst.msk [vmem:[#allocation3 + $0x48] sm:$0xff] %vm218_vm0, %v594_v61 }
  0x79   : > { %361 = vst.msk [vmem:[#allocation3] sm:$0xff] %vm218_vm0, %v329_v1  ;;  %v424_v3 = vld [vmem:[#allocation2 + $0x171] sm:$0xff] }
  0x7a   : > { %483 = vrot.lane.b32.xlu1 %v2944_v37, %s2682_s26  ;;  %v3017_v0 = vld [vmem:[#allocation2 + $0x139] sm:$0xff]  ;;  %365 = vst.msk [vmem:[#allocation3 + $0x40] sm:$0xff] %vm218_vm0, %v3023_v2 }
  0x7b   : > { %v422_v6 = vld [vmem:[#allocation2 + $0x159] sm:$0xff]  ;;  %363 = vst.msk [vmem:[#allocation3 + $0x20] sm:$0xff] %vm218_vm0, %v3032_v8 }
  0x7c   : > { %487 = vrot.lane.b32.xlu0 %v2946_v38, %s2682_s26  ;;  %479 = vrot.lane.b32.xlu2 %v2948_v39, %s2682_s26  ;;  %362 = vst.msk [vmem:[#allocation3 + $0x10] sm:$0xff] %vm218_vm0, %v330_v9  ;;  %v3128_v9 = vld [vmem:[#allocation2 + $0xe2] sm:$0xff] }
  0x7d   : > { %4120 = vst [vmem:[#allocation10_spill] sm:$0xff] %v3037_v11 }
  0x7e   : > { %1779 = vst.msk [vmem:[#allocation3 + $0x28] sm:$0xff] %vm218_vm0, %v592_v10 }
  0x7f   : > { %366 = vst.msk [vmem:[#allocation3 + $0x50] sm:$0xff] %vm218_vm0, %v3039_v12 }
  0x80   : > { %364 = vst.msk [vmem:[#allocation3 + $0x30] sm:$0xff] %vm218_vm0, %v3048_v14 }
  0x81   : > { %367 = vst.msk [vmem:[#allocation3 + $0x60] sm:$0xff] %vm218_vm0, %v3052_v16 }
  0x82   : > { %489 = vrot.lane.b32.xlu1 %v2962_v43, %s2682_s26  ;;  %1782 = vst.msk [vmem:[#allocation3 + $0x58] sm:$0xff] %vm218_vm0, %v595_v17 }
  0x83   : > { %369 = vst.msk [vmem:[#allocation3 + $0x80] sm:$0xff] %vm218_vm0, %v3056_v19 }
  0x84   : > { %493 = vrot.lane.b32.xlu0 %v2964_v44, %s2682_s26  ;;  %485 = vrot.lane.b32.xlu2 %v2966_v45, %s2682_s26  ;;  %368 = vst.msk [vmem:[#allocation3 + $0x70] sm:$0xff] %vm218_vm0, %v3064_v22 }
  0x85   : > { %370 = vst.msk [vmem:[#allocation3 + $0x90] sm:$0xff] %vm218_vm0, %v3068_v23 }
  0x86   : > { %372 = vst.msk [vmem:[#allocation3 + $0xb0] sm:$0xff] %vm218_vm0, %v3073_v28 }
  0x87   : > { %1785 = vst.msk [vmem:[#allocation3 + $0x88] sm:$0xff] %vm218_vm0, %v598_v29 }
  0x88   : > { %371 = vst.msk [vmem:[#allocation3 + $0xa0] sm:$0xff] %vm218_vm0, %v3081_v34 }
  0x89   : > { %373 = vst.msk [vmem:[#allocation3 + $0xc0] sm:$0xff] %vm218_vm0, %v3085_v35 }
  0x8a   : > { %495 = vrot.lane.b32.xlu1 %v2978_v48, %s2682_s26  ;;  %375 = vst.msk [vmem:[#allocation3 + $0xe0] sm:$0xff] %vm218_vm0, %v3090_v41 }
  0x8b   : > { %374 = vst.msk [vmem:[#allocation3 + $0xd0] sm:$0xff] %vm218_vm0, %v3097_v47 }
  0x8c   : > { %499 = vrot.lane.b32.xlu0 %v2980_v49, %s2682_s26  ;;  %491 = vrot.lane.b32.xlu2 %v2982_v50, %s2682_s26  ;;  %4121 = vst [vmem:[#allocation11_spill] sm:$0xff] %v3128_v9 }
  0x92   : > { %501 = vrot.lane.b32.xlu1 %v2992_v52, %s2682_s26 }
  0x94   : > { %505 = vrot.lane.b32.xlu0 %v2994_v53, %s2682_s26  ;;  %497 = vrot.lane.b32.xlu2 %v2996_v54, %s2682_s26 }
  0x9a   : > { %507 = vrot.lane.b32.xlu1 %v3006_v57, %s2682_s26 }
  0x9c   : > { %511 = vrot.lane.b32.xlu0 %v420_v58, %s2682_s26  ;;  %503 = vrot.lane.b32.xlu2 %v3008_v59, %s2682_s26  ;;  %v600_v58 = vld [vmem:[#allocation2 + $0xaa] sm:$0xff] }
  0xa2   : > { %513 = vrot.lane.b32.xlu1 %v421_v62, %s2682_s26 }
  0xa4   : > { %517 = vrot.lane.b32.xlu0 %v423_v63, %s2682_s26  ;;  %509 = vrot.lane.b32.xlu2 %v3017_v0, %s2682_s26  ;;  %v3115_v63 = vld [vmem:[#allocation2 + $0xc0] sm:$0xff] }
  0xa5   : > { %377 = vst.msk [vmem:[#allocation3 + $0x100] sm:$0xff] %vm218_vm0, %v3115_v63 }
  0xa8   : > { %v458_v4 = vpop.permute.xlu0 %457 }
  0xa9   : > { %554 = vst.msk [vmem:[#allocation3] sm:$0xff] %vm553_vm3, %v458_v4  ;;  %v3120_v4 = vld [vmem:[#allocation2 + $0xd8] sm:$0xff] }
  0xaa   : > { %519 = vrot.lane.b32.xlu1 %v424_v3, %s2682_s26  ;;  %379 = vst.msk [vmem:[#allocation3 + $0x120] sm:$0xff] %vm218_vm0, %v3120_v4 }
  0xac   : > { %652 = vrot.lane.b32.xlu0 %v587_v5, %s2683_s9  ;;  %515 = vrot.lane.b32.xlu2 %v422_v6, %s2682_s26  ;;  %v3123_v5 = vld [vmem:[#allocation2 + $0xca] sm:$0xff]  ;;  %s2351_s26 = scalar_lea.sflag [#allocation6], %s2802_s7 }
  0xad   : > { %v3125_v6 = vld [vmem:[#allocation2 + $0xf0] sm:$0xff] }
  0xae   : > { %381 = vst.msk [vmem:[#allocation3 + $0x140] sm:$0xff] %vm218_vm0, %v3125_v6 }
  0xb2   : > { %654 = vrot.lane.b32.xlu1 %v3037_v11, %s2683_s9  ;;  %v613_v11 = vld [vmem:[#allocation2 + $0x142] sm:$0xff] }
  0xb4   : > { %658 = vrot.lane.b32.xlu0 %v590_v55, %s2683_s9  ;;  %650 = vrot.lane.b32.xlu2 %v586_v13, %s2683_s9 }
  0xba   : > { %660 = vrot.lane.b32.xlu1 %v591_v56, %s2683_s9  ;;  %v3102_v56 = vld [vmem:[#allocation2 + $0xb0] sm:$0xff] }
  0xbb   : > { %376 = vst.msk [vmem:[#allocation3 + $0xf0] sm:$0xff] %vm218_vm0, %v3102_v56 }
  0xbc   : > { %664 = vrot.lane.b32.xlu0 %v593_v60, %s2683_s9  ;;  %656 = vrot.lane.b32.xlu2 %v589_v20, %s2683_s9  ;;  %v3105_v60 = vld [vmem:[#allocation2 + $0xc8] sm:$0xff] }
  0xbd   : > { %378 = vst.msk [vmem:[#allocation3 + $0x110] sm:$0xff] %vm218_vm0, %v3105_v60 }
  0xbe   : > { %v466_v24 = vpop.permute.xlu2 %465 }
  0xbf   : > { %558 = vst.msk [vmem:[#allocation3 + $0x40] sm:$0xff] %vm553_vm3, %v466_v24 }
  0xc2   : > { %666 = vrot.lane.b32.xlu1 %v594_v61, %s2683_s9  ;;  %v602_v61 = vld [vmem:[#allocation2 + $0xc2] sm:$0xff] }
  0xc4   : > { %670 = vrot.lane.b32.xlu0 %v596_v30, %s2683_s9  ;;  %662 = vrot.lane.b32.xlu2 %v592_v10, %s2683_s9  ;;  %v601_v10 = vld [vmem:[#allocation2 + $0xb2] sm:$0xff] }
  0xc5   : > { %v3147_v30 = vld [vmem:[#allocation2 + $0xf2] sm:$0xff] }
  0xc6   : > { %v468_v36 = vpop.permute.xlu2 %467  ;;  %4122 = vst [vmem:[#allocation12_spill] sm:$0xff] %v3147_v30 }
  0xc7   : > { %559 = vst.msk [vmem:[#allocation3 + $0x50] sm:$0xff] %vm553_vm3, %v468_v36  ;;  %v3149_v36 = vld [vmem:[#allocation2 + $0x110] sm:$0xff] }
  0xc8   : > { %384 = vst.msk [vmem:[#allocation3 + $0x170] sm:$0xff] %vm218_vm0, %v3149_v36 }
  0xca   : > { %672 = vrot.lane.b32.xlu1 %v597_v40, %s2683_s9  ;;  %v3152_v40 = vld [vmem:[#allocation2 + $0x10a] sm:$0xff] }
  0xcb   : > { %4123 = vst [vmem:[#allocation13_spill] sm:$0xff] %v3152_v40 }
  0xcc   : > { %676 = vrot.lane.b32.xlu0 %v599_v42, %s2683_s9  ;;  %v462_v46 = vpop.permute.xlu1 %461  ;;  %668 = vrot.lane.b32.xlu2 %v595_v17, %s2683_s9  ;;  %v3139_v17 = vld [vmem:[#allocation2 + $0xe0] sm:$0xff] }
  0xcd   : > { %556 = vst.msk [vmem:[#allocation3 + $0x20] sm:$0xff] %vm553_vm3, %v462_v46  ;;  %v3154_v42 = vld [vmem:[#allocation2 + $0xda] sm:$0xff] }
  0xce   : > { %v460_v51 = vpop.permute.xlu0 %459  ;;  %v474_v55 = vpop.permute.xlu2 %473  ;;  %380 = vst.msk [vmem:[#allocation3 + $0x130] sm:$0xff] %vm218_vm0, %v3139_v17 }
  0xcf   : > { %555 = vst.msk [vmem:[#allocation3 + $0x10] sm:$0xff] %vm553_vm3, %v460_v51  ;;  %v3166_v51 = vld [vmem:[#allocation2 + $0x108] sm:$0xff] }
  0xd0   : > { %562 = vst.msk [vmem:[#allocation3 + $0x80] sm:$0xff] %vm553_vm3, %v474_v55 }
  0xd1   : > { %383 = vst.msk [vmem:[#allocation3 + $0x160] sm:$0xff] %vm218_vm0, %v3166_v51 }
  0xd2   : > { %678 = vrot.lane.b32.xlu1 %v600_v58, %s2683_s9 }
  0xd4   : > { %682 = vrot.lane.b32.xlu0 %v602_v61, %s2683_s9  ;;  %v464_v62 = vpop.permute.xlu1 %463  ;;  %674 = vrot.lane.b32.xlu2 %v598_v29, %s2683_s9  ;;  %v3144_v29 = vld [vmem:[#allocation2 + $0xf8] sm:$0xff]  ;;  %v3171_v61 = vld [vmem:[#allocation2 + $0x120] sm:$0xff] }
  0xd5   : > { %557 = vst.msk [vmem:[#allocation3 + $0x30] sm:$0xff] %vm553_vm3, %v464_v62  ;;  %v3174_v62 = vld [vmem:[#allocation2 + $0x112] sm:$0xff] }
  0xd6   : > { %v470_v1 = vpop.permute.xlu0 %469  ;;  %v480_v3 = vpop.permute.xlu2 %479  ;;  %382 = vst.msk [vmem:[#allocation3 + $0x150] sm:$0xff] %vm218_vm0, %v3144_v29 }
  0xd7   : > { %560 = vst.msk [vmem:[#allocation3 + $0x60] sm:$0xff] %vm553_vm3, %v470_v1  ;;  %v3176_v1 = vld [vmem:[#allocation2 + $0x138] sm:$0xff] }
  0xd8   : > { %565 = vst.msk [vmem:[#allocation3 + $0xb0] sm:$0xff] %vm553_vm3, %v480_v3  ;;  %v611_v3 = vld [vmem:[#allocation2 + $0x12a] sm:$0xff] }
  0xd9   : > { %4124 = vst [vmem:[#allocation14_spill] sm:$0xff] %v3174_v62 }
  0xda   : > { %684 = vrot.lane.b32.xlu1 %v3123_v5, %s2683_s9  ;;  %385 = vst.msk [vmem:[#allocation3 + $0x180] sm:$0xff] %vm218_vm0, %v3171_v61 }
  0xdb   : > { %387 = vst.msk [vmem:[#allocation3 + $0x1a0] sm:$0xff] %vm218_vm0, %v3176_v1 }
  0xdc   : > { %688 = vrot.lane.b32.xlu0 %v3128_v9, %s2683_s9  ;;  %v472_v13 = vpop.permute.xlu1 %471  ;;  %680 = vrot.lane.b32.xlu2 %v601_v10, %s2683_s9  ;;  %v3179_v10 = vld [vmem:[#allocation2 + $0xfa] sm:$0xff] }
  0xdd   : > { %561 = vst.msk [vmem:[#allocation3 + $0x70] sm:$0xff] %vm553_vm3, %v472_v13 }
  0xde   : > { %v476_v20 = vpop.permute.xlu0 %475  ;;  %v486_v24 = vpop.permute.xlu2 %485  ;;  %4125 = vst [vmem:[#allocation15_spill] sm:$0xff] %v3179_v10 }
  0xdf   : > { %563 = vst.msk [vmem:[#allocation3 + $0x90] sm:$0xff] %vm553_vm3, %v476_v20  ;;  %v3190_v20 = vld [vmem:[#allocation2 + $0x128] sm:$0xff] }
  0xe0   : > { %568 = vst.msk [vmem:[#allocation3 + $0xe0] sm:$0xff] %vm553_vm3, %v486_v24 }
  0xe1   : > { %386 = vst.msk [vmem:[#allocation3 + $0x190] sm:$0xff] %vm218_vm0, %v3190_v20 }
  0xe2   : > { %690 = vrot.lane.b32.xlu1 %v3147_v30, %s2683_s9  ;;  %v3216_v30 = vld [vmem:[#allocation2 + $0x168] sm:$0xff] }
  0xe3   : > { %391 = vst.msk [vmem:[#allocation3 + $0x1e0] sm:$0xff] %vm218_vm0, %v3216_v30 }
  0xe4   : > { %694 = vrot.lane.b32.xlu0 %v3152_v40, %s2683_s9  ;;  %v478_v46 = vpop.permute.xlu1 %477  ;;  %686 = vrot.lane.b32.xlu2 %v3154_v42, %s2683_s9  ;;  %v3201_v40 = vld [vmem:[#allocation2 + $0x122] sm:$0xff] }
  0xe5   : > { %564 = vst.msk [vmem:[#allocation3 + $0xa0] sm:$0xff] %vm553_vm3, %v478_v46 }
  0xe6   : > { %v482_v55 = vpop.permute.xlu0 %481  ;;  %v492_v58 = vpop.permute.xlu2 %491  ;;  %4126 = vst [vmem:[#allocation16_spill] sm:$0xff] %v3201_v40 }
  0xe7   : > { %566 = vst.msk [vmem:[#allocation3 + $0xc0] sm:$0xff] %vm553_vm3, %v482_v55  ;;  %v3195_v55 = vld [vmem:[#allocation2 + $0x140] sm:$0xff] }
  0xe8   : > { %571 = vst.msk [vmem:[#allocation3 + $0x110] sm:$0xff] %vm553_vm3, %v492_v58  ;;  %v612_v58 = vld [vmem:[#allocation2 + $0x13a] sm:$0xff] }
  0xe9   : > { %388 = vst.msk [vmem:[#allocation3 + $0x1b0] sm:$0xff] %vm218_vm0, %v3195_v55 }
  0xea   : > { %696 = vrot.lane.b32.xlu1 %v3174_v62, %s2683_s9  ;;  %v3198_v62 = vld [vmem:[#allocation2 + $0x158] sm:$0xff] }
  0xeb   : > { %390 = vst.msk [vmem:[#allocation3 + $0x1d0] sm:$0xff] %vm218_vm0, %v3198_v62 }
  0xec   : > { %700 = vrot.lane.b32.xlu0 %v611_v3, %s2683_s9  ;;  %v484_v13 = vpop.permute.xlu1 %483  ;;  %692 = vrot.lane.b32.xlu2 %v3179_v10, %s2683_s9  ;;  %v614_v3 = vld [vmem:[#allocation2 + $0x152] sm:$0xff] }
  0xed   : > { %567 = vst.msk [vmem:[#allocation3 + $0xd0] sm:$0xff] %vm553_vm3, %v484_v13 }
  0xee   : > { %v488_v24 = vpop.permute.xlu0 %487  ;;  %v498_v46 = vpop.permute.xlu2 %497 }
  0xef   : > { %569 = vst.msk [vmem:[#allocation3 + $0xf0] sm:$0xff] %vm553_vm3, %v488_v24  ;;  %v3211_v24 = vld [vmem:[#allocation2 + $0x150] sm:$0xff] }
  0xf0   : > { %574 = vst.msk [vmem:[#allocation3 + $0x140] sm:$0xff] %vm553_vm3, %v498_v46 }
  0xf1   : > { %389 = vst.msk [vmem:[#allocation3 + $0x1c0] sm:$0xff] %vm218_vm0, %v3211_v24 }
  0xf2   : > { %702 = vrot.lane.b32.xlu1 %v612_v58, %s2683_s9  ;;  %v615_v58 = vld [vmem:[#allocation2 + $0x15a] sm:$0xff] }
  0xf4   : > { %706 = vrot.lane.b32.xlu0 %v614_v3, %s2683_s9  ;;  %v490_v13 = vpop.permute.xlu1 %489  ;;  %698 = vrot.lane.b32.xlu2 %v3201_v40, %s2683_s9  ;;  %v617_v3 = vld [vmem:[#allocation2 + $0x172] sm:$0xff] }
  0xf5   : > { %570 = vst.msk [vmem:[#allocation3 + $0x100] sm:$0xff] %vm553_vm3, %v490_v13  ;;  %v3225_v40 = vld [vmem:[#allocation2 + $0x170] sm:$0xff] }
  0xf6   : > { %v494_v46 = vpop.permute.xlu0 %493  ;;  %v504_v10 = vpop.permute.xlu2 %503  ;;  %392 = vst.msk [vmem:[#allocation3 + $0x1f0] sm:$0xff] %vm218_vm0, %v3225_v40 }
  0xf7   : > { %572 = vst.msk [vmem:[#allocation3 + $0x120] sm:$0xff] %vm553_vm3, %v494_v46 }
  0xf8   : > { %577 = vst.msk [vmem:[#allocation3 + $0x170] sm:$0xff] %vm553_vm3, %v504_v10  ;;  %v616_v10 = vld [vmem:[#allocation2 + $0x16a] sm:$0xff] }
  0xfa   : > { %708 = vrot.lane.b32.xlu1 %v615_v58, %s2683_s9 }
  0xfc   : > { %712 = vrot.lane.b32.xlu0 %v617_v3, %s2683_s9  ;;  %v496_v13 = vpop.permute.xlu1 %495  ;;  %704 = vrot.lane.b32.xlu2 %v613_v11, %s2683_s9 }
  0xfd   : > { %573 = vst.msk [vmem:[#allocation3 + $0x130] sm:$0xff] %vm553_vm3, %v496_v13 }
  0xfe   : > { %v500_v46 = vpop.permute.xlu0 %499  ;;  %v510_v9 = vpop.permute.xlu2 %509 }
  0xff   : > { %575 = vst.msk [vmem:[#allocation3 + $0x150] sm:$0xff] %vm553_vm3, %v500_v46 }
 0x100   : > { %580 = vst.msk [vmem:[#allocation3 + $0x1a0] sm:$0xff] %vm553_vm3, %v510_v9 }
 0x102   : > { %843 = vrot.lane.b32.xlu1 %v3032_v8, %s2684_s11 }
 0x104   : > { %847 = vrot.lane.b32.xlu0 %v3023_v2, %s2684_s11  ;;  %v502_v11 = vpop.permute.xlu1 %501  ;;  %710 = vrot.lane.b32.xlu2 %v616_v10, %s2683_s9 }
 0x105   : > { %576 = vst.msk [vmem:[#allocation3 + $0x160] sm:$0xff] %vm553_vm3, %v502_v11 }
 0x106   : > { %v506_v58 = vpop.permute.xlu0 %505  ;;  %v516_v3 = vpop.permute.xlu2 %515 }
 0x107   : > { %578 = vst.msk [vmem:[#allocation3 + $0x180] sm:$0xff] %vm553_vm3, %v506_v58  ;;  %v294_v58 = vld [vmem:[%s2808_s14 + $0xf0] sm:$0xff] }
 0x108   : > { %583 = vst.msk [vmem:[#allocation3 + $0x1d0] sm:$0xff] %vm553_vm3, %v516_v3 }
 0x109   : > { %327 = vst.msk [vmem:[#allocation2 + $0x181] sm:$0xff] %vm218_vm0, %v294_v58  ;;  %v3388_v58 = vld [vmem:[%s4104_s1 + $0x88] sm:$0xff] }
 0x10a   : > { %849 = vrot.lane.b32.xlu1 %v3039_v12, %s2684_s11  ;;  %2114 = vmatpush.msra.mxu1 %v3388_v58 }
 0x10c   : > { %853 = vrot.lane.b32.xlu0 %v3064_v22, %s2684_s11  ;;  %v508_v8 = vpop.permute.xlu1 %507  ;;  %845 = vrot.lane.b32.xlu2 %v3048_v14, %s2684_s11 }
 0x10d   : > { %579 = vst.msk [vmem:[#allocation3 + $0x190] sm:$0xff] %vm553_vm3, %v508_v8 }
 0x10e   : > { %v512_v9 = vpop.permute.xlu0 %511  ;;  %v651_v13 = vpop.permute.xlu2 %650 }
 0x10f   : > { %581 = vst.msk [vmem:[#allocation3 + $0x1b0] sm:$0xff] %vm553_vm3, %v512_v9  ;;  %v295_v9 = vld [vmem:[%s2808_s14 + $0xf8] sm:$0xff] }
 0x110   : > { %747 = vst.msk [vmem:[#allocation3] sm:$0xff] %vm746_vm4, %v651_v13 }
 0x111   : > { %328 = vst.msk [vmem:[#allocation2 + $0x189] sm:$0xff] %vm218_vm0, %v295_v9 }
 0x112   : > { %855 = vrot.lane.b32.xlu1 %v3056_v19, %s2684_s11 }
 0x114   : > { %859 = vrot.lane.b32.xlu0 %v3081_v34, %s2684_s11  ;;  %v514_v46 = vpop.permute.xlu1 %513  ;;  %851 = vrot.lane.b32.xlu2 %v3052_v16, %s2684_s11 }
 0x115   : > { %582 = vst.msk [vmem:[#allocation3 + $0x1c0] sm:$0xff] %vm553_vm3, %v514_v46 }
 0x116   : > { %v518_v14 = vpop.permute.xlu0 %517  ;;  %v657_v10 = vpop.permute.xlu2 %656 }
 0x117   : > { %584 = vst.msk [vmem:[#allocation3 + $0x1e0] sm:$0xff] %vm553_vm3, %v518_v14 }
 0x118   : > { %750 = vst.msk [vmem:[#allocation3 + $0x30] sm:$0xff] %vm746_vm4, %v657_v10  ;;  %v1196_v9 = vld [vmem:[#allocation2 + $0x18a] sm:$0xff] }
 0x11a   : > { %861 = vrot.lane.b32.xlu1 %v3073_v28, %s2684_s11 }
 0x11c   : > { %865 = vrot.lane.b32.xlu0 %v3097_v47, %s2684_s11  ;;  %v520_v19 = vpop.permute.xlu1 %519  ;;  %857 = vrot.lane.b32.xlu2 %v3068_v23, %s2684_s11 }
 0x11d   : > { %585 = vst.msk [vmem:[#allocation3 + $0x1f0] sm:$0xff] %vm553_vm3, %v520_v19 }
 0x11e   : > { %v653_v34 = vpop.permute.xlu0 %652  ;;  %v663_v11 = vpop.permute.xlu2 %662 }
 0x11f   : > { %748 = vst.msk [vmem:[#allocation3 + $0x10] sm:$0xff] %vm746_vm4, %v653_v34 }
 0x120   : > { %753 = vst.msk [vmem:[#allocation3 + $0x60] sm:$0xff] %vm746_vm4, %v663_v11  ;;  %v809_v11 = vld [vmem:[#allocation2 + $0x180] sm:$0xff] }
 0x122   : > { %867 = vrot.lane.b32.xlu1 %v3090_v41, %s2684_s11 }
 0x124   : > { %871 = vrot.lane.b32.xlu0 %v3115_v63, %s2684_s11  ;;  %v655_v28 = vpop.permute.xlu1 %654  ;;  %863 = vrot.lane.b32.xlu2 %v3085_v35, %s2684_s11 }
 0x125   : > { %749 = vst.msk [vmem:[#allocation3 + $0x20] sm:$0xff] %vm746_vm4, %v655_v28  ;;  %v810_v28 = vld [vmem:[#allocation2 + $0x188] sm:$0xff] }
 0x126   : > { %v659_v23 = vpop.permute.xlu0 %658  ;;  %v669_v47 = vpop.permute.xlu2 %668 }
 0x127   : > { %751 = vst.msk [vmem:[#allocation3 + $0x40] sm:$0xff] %vm746_vm4, %v659_v23 }
 0x128   : > { %756 = vst.msk [vmem:[#allocation3 + $0x90] sm:$0xff] %vm746_vm4, %v669_v47 }
 0x12a   : > { %873 = vrot.lane.b32.xlu1 %v3105_v60, %s2684_s11 }
 0x12c   : > { %877 = vrot.lane.b32.xlu0 %v3139_v17, %s2684_s11  ;;  %v661_v41 = vpop.permute.xlu1 %660  ;;  %869 = vrot.lane.b32.xlu2 %v3102_v56, %s2684_s11 }
 0x12d   : > { %752 = vst.msk [vmem:[#allocation3 + $0x50] sm:$0xff] %vm746_vm4, %v661_v41 }
 0x12e   : > { %v665_v35 = vpop.permute.xlu0 %664  ;;  %v675_v63 = vpop.permute.xlu2 %674 }
 0x12f   : > { %754 = vst.msk [vmem:[#allocation3 + $0x70] sm:$0xff] %vm746_vm4, %v665_v35 }
 0x130   : > { %759 = vst.msk [vmem:[#allocation3 + $0xc0] sm:$0xff] %vm746_vm4, %v675_v63 }
 0x132   : > { %879 = vrot.lane.b32.xlu1 %v3125_v6, %s2684_s11 }
 0x134   : > { %883 = vrot.lane.b32.xlu0 %v3166_v51, %s2684_s11  ;;  %v667_v60 = vpop.permute.xlu1 %666  ;;  %875 = vrot.lane.b32.xlu2 %v3120_v4, %s2684_s11 }
 0x135   : > { %755 = vst.msk [vmem:[#allocation3 + $0x80] sm:$0xff] %vm746_vm4, %v667_v60 }
 0x136   : > { %v671_v56 = vpop.permute.xlu0 %670  ;;  %v681_v3 = vpop.permute.xlu2 %680 }
 0x137   : > { %757 = vst.msk [vmem:[#allocation3 + $0xa0] sm:$0xff] %vm746_vm4, %v671_v56 }
 0x138   : > { %762 = vst.msk [vmem:[#allocation3 + $0xf0] sm:$0xff] %vm746_vm4, %v681_v3  ;;  %v1814_v3 = vld [vmem:[#allocation3 + $0x28] sm:$0xff] }
 0x13a   : > { %885 = vrot.lane.b32.xlu1 %v3149_v36, %s2684_s11 }
 0x13c   : > { %889 = vrot.lane.b32.xlu0 %v3190_v20, %s2684_s11  ;;  %v673_v8 = vpop.permute.xlu1 %672  ;;  %881 = vrot.lane.b32.xlu2 %v3144_v29, %s2684_s11 }
 0x13d   : > { %758 = vst.msk [vmem:[#allocation3 + $0xb0] sm:$0xff] %vm746_vm4, %v673_v8  ;;  %v1003_v8 = vld [vmem:[#allocation2 + $0x189] sm:$0xff] }
 0x13e   : > { %v677_v4 = vpop.permute.xlu0 %676  ;;  %v687_v13 = vpop.permute.xlu2 %686 }
 0x13f   : > { %760 = vst.msk [vmem:[#allocation3 + $0xd0] sm:$0xff] %vm746_vm4, %v677_v4 }
 0x140   : > { %765 = vst.msk [vmem:[#allocation3 + $0x120] sm:$0xff] %vm746_vm4, %v687_v13  ;;  %v1818_v13 = vld [vmem:[#allocation3 + $0x48] sm:$0xff] }
 0x142   : > { %891 = vrot.lane.b32.xlu1 %v3176_v1, %s2684_s11 }
 0x144   : > { %895 = vrot.lane.b32.xlu0 %v3211_v24, %s2684_s11  ;;  %v679_v46 = vpop.permute.xlu1 %678  ;;  %887 = vrot.lane.b32.xlu2 %v3171_v61, %s2684_s11 }
 0x145   : > { %761 = vst.msk [vmem:[#allocation3 + $0xe0] sm:$0xff] %vm746_vm4, %v679_v46 }
 0x146   : > { %v683_v14 = vpop.permute.xlu0 %682  ;;  %v693_v10 = vpop.permute.xlu2 %692 }
 0x147   : > { %763 = vst.msk [vmem:[#allocation3 + $0x100] sm:$0xff] %vm746_vm4, %v683_v14 }
 0x148   : > { %768 = vst.msk [vmem:[#allocation3 + $0x150] sm:$0xff] %vm746_vm4, %v693_v10  ;;  %v1583_v10 = vld [vmem:[#allocation2 + $0x1a1] sm:$0xff] }
 0x14a   : > { %897 = vrot.lane.b32.xlu1 %v3198_v62, %s2684_s11 }
 0x14c   : > { %901 = vrot.lane.b32.xlu0 %v3225_v40, %s2684_s11  ;;  %v685_v19 = vpop.permute.xlu1 %684  ;;  %893 = vrot.lane.b32.xlu2 %v3195_v55, %s2684_s11 }
 0x14d   : > { %764 = vst.msk [vmem:[#allocation3 + $0x110] sm:$0xff] %vm746_vm4, %v685_v19  ;;  %v1820_v19 = vld [vmem:[#allocation3 + $0x58] sm:$0xff] }
 0x14e   : > { %v689_v24 = vpop.permute.xlu0 %688  ;;  %v699_v34 = vpop.permute.xlu2 %698 }
 0x14f   : > { %766 = vst.msk [vmem:[#allocation3 + $0x130] sm:$0xff] %vm746_vm4, %v689_v24  ;;  %v3447_v24 = vld [vmem:[#allocation2 + $0x7a] sm:$0xff] }
 0x150   : > { %771 = vst.msk [vmem:[#allocation3 + $0x180] sm:$0xff] %vm746_vm4, %v699_v34 }
 0x151   : > { %1783 = vst.msk [vmem:[#allocation3 + $0x68] sm:$0xff] %vm218_vm0, %v3447_v24 }
 0x152   : > { %903 = vrot.lane.b32.xlu1 %v809_v11, %s2684_s11  ;;  %v4127_v11 = vld [vmem:[#allocation11_spill] sm:$0xff] }
 0x154   : > { %1036 = vrot.lane.b32.xlu0 %v2862_v7, %s2685_s12  ;;  %v691_v40 = vpop.permute.xlu1 %690  ;;  %899 = vrot.lane.b32.xlu2 %v3216_v30, %s2684_s11 }
 0x155   : > { %767 = vst.msk [vmem:[#allocation3 + $0x140] sm:$0xff] %vm746_vm4, %v691_v40 }
 0x156   : > { %v695_v62 = vpop.permute.xlu0 %694  ;;  %v705_v55 = vpop.permute.xlu2 %704 }
 0x157   : > { %769 = vst.msk [vmem:[#allocation3 + $0x160] sm:$0xff] %vm746_vm4, %v695_v62  ;;  %v3460_v62 = vld [vmem:[#allocation2 + $0x82] sm:$0xff] }
 0x158   : > { %774 = vst.msk [vmem:[#allocation3 + $0x1b0] sm:$0xff] %vm746_vm4, %v705_v55  ;;  %v1822_v40 = vld [vmem:[#allocation3 + $0x68] sm:$0xff]  ;;  %v4128_v55 = vld [vmem:[#allocation10_spill] sm:$0xff] }
 0x159   : > { %1784 = vst.msk [vmem:[#allocation3 + $0x78] sm:$0xff] %vm218_vm0, %v3460_v62 }
 0x15a   : > { %1038 = vrot.lane.b32.xlu1 %v2879_v15, %s2685_s12 }
 0x15c   : > { %1042 = vrot.lane.b32.xlu0 %v2912_v27, %s2685_s12  ;;  %v697_v7 = vpop.permute.xlu1 %696  ;;  %905 = vrot.lane.b32.xlu2 %v810_v28, %s2684_s11 }
 0x15d   : > { %770 = vst.msk [vmem:[#allocation3 + $0x170] sm:$0xff] %vm746_vm4, %v697_v7 }
 0x15e   : > { %v701_v30 = vpop.permute.xlu0 %700  ;;  %v711_v23 = vpop.permute.xlu2 %710 }
 0x15f   : > { %772 = vst.msk [vmem:[#allocation3 + $0x190] sm:$0xff] %vm746_vm4, %v701_v30  ;;  %v1569_v30 = vld [vmem:[#allocation2 + $0xf9] sm:$0xff] }
 0x160   : > { %777 = vst.msk [vmem:[#allocation3 + $0x1e0] sm:$0xff] %vm746_vm4, %v711_v23  ;;  %v1552_v23 = vld [vmem:[#allocation2 + $0x31] sm:$0xff] }
 0x162   : > { %1044 = vrot.lane.b32.xlu1 %v2885_v18, %s2685_s12 }
 0x164   : > { %1048 = vrot.lane.b32.xlu0 %v2930_v33, %s2685_s12  ;;  %v703_v15 = vpop.permute.xlu1 %702  ;;  %1040 = vrot.lane.b32.xlu2 %v2893_v21, %s2685_s12 }
 0x165   : > { %773 = vst.msk [vmem:[#allocation3 + $0x1a0] sm:$0xff] %vm746_vm4, %v703_v15  ;;  %v1824_v15 = vld [vmem:[#allocation3 + $0x78] sm:$0xff] }
 0x166   : > { %v707_v27 = vpop.permute.xlu0 %706  ;;  %v846_v47 = vpop.permute.xlu2 %845 }
 0x167   : > { %775 = vst.msk [vmem:[#allocation3 + $0x1c0] sm:$0xff] %vm746_vm4, %v707_v27 }
 0x168   : > { %941 = vst.msk [vmem:[#allocation3 + $0x10] sm:$0xff] %vm939_vm5, %v846_v47 }
 0x16a   : > { %1050 = vrot.lane.b32.xlu1 %v2910_v26, %s2685_s12 }
 0x16c   : > { %1054 = vrot.lane.b32.xlu0 %v2948_v39, %s2685_s12  ;;  %v709_v18 = vpop.permute.xlu1 %708  ;;  %1046 = vrot.lane.b32.xlu2 %v2906_v25, %s2685_s12 }
 0x16d   : > { %776 = vst.msk [vmem:[#allocation3 + $0x1d0] sm:$0xff] %vm746_vm4, %v709_v18  ;;  %v1826_v18 = vld [vmem:[#allocation3 + $0x88] sm:$0xff] }
 0x16e   : > { %v713_v21 = vpop.permute.xlu0 %712  ;;  %v852_v33 = vpop.permute.xlu2 %851 }
 0x16f   : > { %778 = vst.msk [vmem:[#allocation3 + $0x1f0] sm:$0xff] %vm746_vm4, %v713_v21  ;;  %v1166_v21 = vld [vmem:[#allocation2 + $0x22] sm:$0xff] }
 0x170   : > { %944 = vst.msk [vmem:[#allocation3 + $0x40] sm:$0xff] %vm939_vm5, %v852_v33  ;;  %v4129_v33 = vld [vmem:[#allocation12_spill] sm:$0xff] }
 0x172   : > { %1056 = vrot.lane.b32.xlu1 %v2928_v32, %s2685_s12 }
 0x174   : > { %1060 = vrot.lane.b32.xlu0 %v2966_v45, %s2685_s12  ;;  %v844_v26 = vpop.permute.xlu1 %843  ;;  %1052 = vrot.lane.b32.xlu2 %v2926_v31, %s2685_s12 }
 0x175   : > { %940 = vst.msk [vmem:[#allocation3] sm:$0xff] %vm939_vm5, %v844_v26  ;;  %v3482_v26 = vld [vmem:[#allocation2 + $0x9a] sm:$0xff] }
 0x176   : > { %v848_v25 = vpop.permute.xlu0 %847  ;;  %v858_v39 = vpop.permute.xlu2 %857  ;;  %1786 = vst.msk [vmem:[#allocation3 + $0x98] sm:$0xff] %vm218_vm0, %v3482_v26 }
 0x177   : > { %942 = vst.msk [vmem:[#allocation3 + $0x20] sm:$0xff] %vm939_vm5, %v848_v25 }
 0x178   : > { %947 = vst.msk [vmem:[#allocation3 + $0x70] sm:$0xff] %vm939_vm5, %v858_v39 }
 0x17a   : > { %1062 = vrot.lane.b32.xlu1 %v2946_v38, %s2685_s12 }
 0x17c   : > { %1066 = vrot.lane.b32.xlu0 %v2982_v50, %s2685_s12  ;;  %v850_v32 = vpop.permute.xlu1 %849  ;;  %1058 = vrot.lane.b32.xlu2 %v2944_v37, %s2685_s12 }
 0x17d   : > { %943 = vst.msk [vmem:[#allocation3 + $0x30] sm:$0xff] %vm939_vm5, %v850_v32  ;;  %v1570_v32 = vld [vmem:[#allocation2 + $0x109] sm:$0xff] }
 0x17e   : > { %v854_v31 = vpop.permute.xlu0 %853  ;;  %v864_v45 = vpop.permute.xlu2 %863 }
 0x17f   : > { %945 = vst.msk [vmem:[#allocation3 + $0x50] sm:$0xff] %vm939_vm5, %v854_v31  ;;  %v1553_v31 = vld [vmem:[#allocation2 + $0x39] sm:$0xff] }
 0x180   : > { %950 = vst.msk [vmem:[#allocation3 + $0xa0] sm:$0xff] %vm939_vm5, %v864_v45  ;;  %v1828_v45 = vld [vmem:[#allocation3 + $0x98] sm:$0xff] }
 0x182   : > { %1068 = vrot.lane.b32.xlu1 %v2964_v44, %s2685_s12  ;;  %v3393_v44 = vld [vmem:[%s4104_s1 + $0x80] sm:$0xff] }
 0x183   : > { %2115 = vmatpush.msra.mxu1 %v3393_v44 }
 0x184   : > { %1072 = vrot.lane.b32.xlu0 %v2996_v54, %s2685_s12  ;;  %v856_v38 = vpop.permute.xlu1 %855  ;;  %1064 = vrot.lane.b32.xlu2 %v2962_v43, %s2685_s12  ;;  %v1810_v43 = vld [vmem:[#allocation3 + $0x8] sm:$0xff] }
 0x185   : > { %946 = vst.msk [vmem:[#allocation3 + $0x60] sm:$0xff] %vm939_vm5, %v856_v38  ;;  %2448 = vmatmul.msk.f32.vlgmr.msra.gmra.mxu1 %vm218_vm0, %v1810_v43  ;;  %v3494_v38 = vld [vmem:[#allocation2 + $0xaa] sm:$0xff]  ;;  %v1167_v43 = vld [vmem:[#allocation2 + $0x32] sm:$0xff] }
 0x186   : > { %v860_v37 = vpop.permute.xlu0 %859  ;;  %v870_v50 = vpop.permute.xlu2 %869  ;;  %1787 = vst.msk [vmem:[#allocation3 + $0xa8] sm:$0xff] %vm218_vm0, %v3494_v38 }
 0x187   : > { %948 = vst.msk [vmem:[#allocation3 + $0x80] sm:$0xff] %vm939_vm5, %v860_v37 }
 0x188   : > { %953 = vst.msk [vmem:[#allocation3 + $0xd0] sm:$0xff] %vm939_vm5, %v870_v50 }
 0x18a   : > { %1074 = vrot.lane.b32.xlu1 %v2980_v49, %s2685_s12  ;;  %v1812_v49 = vld [vmem:[#allocation3 + $0x18] sm:$0xff] }
 0x18c   : > { %1078 = vrot.lane.b32.xlu0 %v3008_v59, %s2685_s12  ;;  %v862_v41 = vpop.permute.xlu1 %861  ;;  %1070 = vrot.lane.b32.xlu2 %v2978_v48, %s2685_s12 }
 0x18d   : > { %949 = vst.msk [vmem:[#allocation3 + $0x90] sm:$0xff] %vm939_vm5, %v862_v41  ;;  %2449 = vmatmul.msk.f32.gmra.mxu1 %vm218_vm0, %v1812_v49  ;;  %v4130_v41 = vld [vmem:[#allocation15_spill] sm:$0xff] }
 0x18e   : > { %v866_v35 = vpop.permute.xlu0 %865  ;;  %v876_v63 = vpop.permute.xlu2 %875  ;;  %v1888_v49 = vld [vmem:[%s4104_s1 + $0x78] sm:$0xff] }
 0x18f   : > { %951 = vst.msk [vmem:[#allocation3 + $0xb0] sm:$0xff] %vm939_vm5, %v866_v35  ;;  %v1830_v35 = vld [vmem:[#allocation3 + $0xa8] sm:$0xff]  ;;  %2487 = vmatpush.msra.mxu2 %v1888_v49  ;;  %2488 = vmatpush.msra.mxu3 %v1888_v49 }
 0x190   : > { %956 = vst.msk [vmem:[#allocation3 + $0x100] sm:$0xff] %vm939_vm5, %v876_v63  ;;  %v3507_v63 = vld [vmem:[#allocation2 + $0xb2] sm:$0xff]  ;;  %1987 = vmatpush.msra.mxu0 %v1888_v49 }
 0x191   : > { %1788 = vst.msk [vmem:[#allocation3 + $0xb8] sm:$0xff] %vm218_vm0, %v3507_v63  ;;  %v1170_v49 = vld [vmem:[#allocation2 + $0x52] sm:$0xff] }
 0x192   : > { %1080 = vrot.lane.b32.xlu1 %v2994_v53, %s2685_s12 }
 0x194   : > { %1084 = vrot.lane.b32.xlu0 %v3017_v0, %s2685_s12  ;;  %v868_v59 = vpop.permute.xlu1 %867  ;;  %1076 = vrot.lane.b32.xlu2 %v2992_v52, %s2685_s12 }
 0x195   : > { %952 = vst.msk [vmem:[#allocation3 + $0xc0] sm:$0xff] %vm939_vm5, %v868_v59  ;;  %2450 = vmatmul.msk.f32.gmra.mxu1 %vm218_vm0, %v1814_v3  ;;  %v1886_v3 = vld [vmem:[%s4104_s1 + $0x68] sm:$0xff] }
 0x196   : > { %v872_v60 = vpop.permute.xlu0 %871  ;;  %v882_v56 = vpop.permute.xlu2 %881 }
 0x197   : > { %954 = vst.msk [vmem:[#allocation3 + $0xe0] sm:$0xff] %vm939_vm5, %v872_v60 }
 0x198   : > { %959 = vst.msk [vmem:[#allocation3 + $0x130] sm:$0xff] %vm939_vm5, %v882_v56  ;;  %v1571_v56 = vld [vmem:[#allocation2 + $0x111] sm:$0xff] }
 0x19a   : > { %1259 = vrot.lane.b32.xlu1 %v3123_v5, %s2686_s25  ;;  %v1816_v5 = vld [vmem:[#allocation3 + $0x38] sm:$0xff] }
 0x19c   : > { %1646 = vrot.lane.b32.xlu0 %v2978_v48, %s2687_s30  ;;  %v874_v52 = vpop.permute.xlu1 %873  ;;  %1082 = vrot.lane.b32.xlu2 %v3006_v57, %s2685_s12 }
 0x19d   : > { %955 = vst.msk [vmem:[#allocation3 + $0xf0] sm:$0xff] %vm939_vm5, %v874_v52  ;;  %2451 = vmatmul.msk.f32.gmra.mxu1 %vm218_vm0, %v1816_v5  ;;  %v1554_v52 = vld [vmem:[#allocation2 + $0x49] sm:$0xff] }
 0x19e   : > { %v878_v53 = vpop.permute.xlu0 %877  ;;  %v888_v0 = vpop.permute.xlu2 %887 }
 0x19f   : > { %957 = vst.msk [vmem:[#allocation3 + $0x110] sm:$0xff] %vm939_vm5, %v878_v53  ;;  %v1832_v53 = vld [vmem:[#allocation3 + $0xb8] sm:$0xff] }
 0x1a0   : > { %962 = vst.msk [vmem:[#allocation3 + $0x160] sm:$0xff] %vm939_vm5, %v888_v0  ;;  %v1885_v0 = vld [vmem:[%s4104_s1 + $0x60] sm:$0xff] }
 0x1a2   : > { %1098 = vrot.lane.b32.xlu1 %v1003_v8, %s2685_s12  ;;  %v3532_v8 = vld [vmem:[#allocation2 + $0xc2] sm:$0xff] }
 0x1a3   : > { %1789 = vst.msk [vmem:[#allocation3 + $0xc8] sm:$0xff] %vm218_vm0, %v3532_v8 }
 0x1a4   : > { %1291 = vrot.lane.b32.xlu0 %v1196_v9, %s2686_s25  ;;  %v880_v48 = vpop.permute.xlu1 %879  ;;  %1453 = vrot.lane.b32.xlu2 %v3139_v17, %s2688_s5  ;;  %v1884_v9 = vld [vmem:[%s4104_s1 + $0x58] sm:$0xff] }
 0x1a5   : > { %958 = vst.msk [vmem:[#allocation3 + $0x120] sm:$0xff] %vm939_vm5, %v880_v48  ;;  %2452 = vmatmul.msk.f32.gmra.mxu1 %vm218_vm0, %v1818_v13  ;;  %v1168_v13 = vld [vmem:[#allocation2 + $0x3a] sm:$0xff] }
 0x1a6   : > { %v884_v57 = vpop.permute.xlu0 %883  ;;  %v894_v4 = vpop.permute.xlu2 %893 }
 0x1a7   : > { %960 = vst.msk [vmem:[#allocation3 + $0x140] sm:$0xff] %vm939_vm5, %v884_v57 }
 0x1a8   : > { %965 = vst.msk [vmem:[#allocation3 + $0x190] sm:$0xff] %vm939_vm5, %v894_v4  ;;  %v1882_v4 = vld [vmem:[%s4104_s1 + $0x48] sm:$0xff] }
 0x1aa   : > { %1455 = vrot.lane.b32.xlu1 %v3125_v6, %s2688_s5  ;;  %v1390_v6 = vld [vmem:[#allocation2 + $0x1a0] sm:$0xff] }
 0x1ac   : > { %1648 = vrot.lane.b32.xlu0 %v2996_v54, %s2687_s30  ;;  %v886_v46 = vpop.permute.xlu1 %885  ;;  %1261 = vrot.lane.b32.xlu2 %v3154_v42, %s2686_s25 }
 0x1ad   : > { %961 = vst.msk [vmem:[#allocation3 + $0x150] sm:$0xff] %vm939_vm5, %v886_v46  ;;  %2453 = vmatmul.msk.f32.gmra.mxu1 %vm218_vm0, %v1820_v19  ;;  %v4131_v46 = vld [vmem:[#allocation13_spill] sm:$0xff] }
 0x1ae   : > { %v890_v17 = vpop.permute.xlu0 %889  ;;  %v900_v14 = vpop.permute.xlu2 %899 }
 0x1af   : > { %963 = vst.msk [vmem:[#allocation3 + $0x170] sm:$0xff] %vm939_vm5, %v890_v17  ;;  %v1881_v17 = vld [vmem:[%s4104_s1 + $0x40] sm:$0xff] }
 0x1b0   : > { %968 = vst.msk [vmem:[#allocation3 + $0x1c0] sm:$0xff] %vm939_vm5, %v900_v14  ;;  %v1758_v14 = vld [vmem:[#allocation2 + $0xca] sm:$0xff] }
 0x1b1   : > { %1790 = vst.msk [vmem:[#allocation3 + $0xd8] sm:$0xff] %vm218_vm0, %v1758_v14  ;;  %v1762_v14 = vld [vmem:[#allocation2 + $0xfa] sm:$0xff] }
 0x1b2   : > { %1678 = vrot.lane.b32.xlu1 %v1583_v10, %s2687_s30  ;;  %v1834_v10 = vld [vmem:[#allocation3 + $0xc8] sm:$0xff]  ;;  %1794 = vst.msk [vmem:[#allocation3 + $0x118] sm:$0xff] %vm218_vm0, %v1762_v14 }
 0x1b3   : > { %v1368_v14 = vld [vmem:[#allocation2 + $0x98] sm:$0xff] }
 0x1b4   : > { %1423 = vrot.lane.b32.xlu0 %v3023_v2, %s2688_s5  ;;  %v892_v54 = vpop.permute.xlu1 %891  ;;  %1485 = vrot.lane.b32.xlu2 %v1390_v6, %s2688_s5  ;;  %v1880_v6 = vld [vmem:[%s4104_s1 + $0x38] sm:$0xff] }
 0x1b5   : > { %964 = vst.msk [vmem:[#allocation3 + $0x180] sm:$0xff] %vm939_vm5, %v892_v54  ;;  %2454 = vmatmul.msk.f32.gmra.mxu1 %vm218_vm0, %v1822_v40  ;;  %v1363_v40 = vld [vmem:[#allocation2 + $0x60] sm:$0xff] }
 0x1b6   : > { %v896_v42 = vpop.permute.xlu0 %895  ;;  %v906_v34 = vpop.permute.xlu2 %905 }
 0x1b7   : > { %966 = vst.msk [vmem:[#allocation3 + $0x1a0] sm:$0xff] %vm939_vm5, %v896_v42 }
 0x1b8   : > { %971 = vst.msk [vmem:[#allocation3 + $0x1f0] sm:$0xff] %vm939_vm5, %v906_v34  ;;  %v1572_v34 = vld [vmem:[#allocation2 + $0x121] sm:$0xff] }
 0x1ba   : > { %1263 = vrot.lane.b32.xlu1 %v4127_v11, %s2686_s25  ;;  %v1878_v11 = vld [vmem:[%s4104_s1 + $0x28] sm:$0xff] }
 0x1bc   : > { %1457 = vrot.lane.b32.xlu0 %v3144_v29, %s2688_s5  ;;  %v898_v2 = vpop.permute.xlu1 %897  ;;  %1229 = vrot.lane.b32.xlu2 %v4128_v55, %s2686_s25  ;;  %v1836_v55 = vld [vmem:[#allocation3 + $0xd8] sm:$0xff] }
 0x1bd   : > { %967 = vst.msk [vmem:[#allocation3 + $0x1b0] sm:$0xff] %vm939_vm5, %v898_v2  ;;  %2455 = vmatmul.msk.f32.gmra.mxu1 %vm218_vm0, %v1824_v15  ;;  %v1555_v2 = vld [vmem:[#allocation2 + $0x51] sm:$0xff] }
 0x1be   : > { %v902_v28 = vpop.permute.xlu0 %901  ;;  %v1041_v7 = vpop.permute.xlu2 %1040 }
 0x1bf   : > { %969 = vst.msk [vmem:[#allocation3 + $0x1d0] sm:$0xff] %vm939_vm5, %v902_v28  ;;  %v1877_v28 = vld [vmem:[%s4104_s1 + $0x20] sm:$0xff] }
 0x1c0   : > { %1135 = vst.msk [vmem:[#allocation3 + $0x20] sm:$0xff] %vm1132_vm6, %v1041_v7  ;;  %v1759_v7 = vld [vmem:[#allocation2 + $0xda] sm:$0xff] }
 0x1c1   : > { %1791 = vst.msk [vmem:[#allocation3 + $0xe8] sm:$0xff] %vm218_vm0, %v1759_v7 }
 0x1c2   : > { %1650 = vrot.lane.b32.xlu1 %v1569_v30, %s2687_s30 }
 0x1c4   : > { %1425 = vrot.lane.b32.xlu0 %v3039_v12, %s2688_s5  ;;  %v904_v29 = vpop.permute.xlu1 %903  ;;  %1616 = vrot.lane.b32.xlu2 %v1552_v23, %s2687_s30  ;;  %v1876_v23 = vld [vmem:[%s4104_s1 + $0x18] sm:$0xff] }
 0x1c5   : > { %970 = vst.msk [vmem:[#allocation3 + $0x1e0] sm:$0xff] %vm939_vm5, %v904_v29  ;;  %2456 = vmatmul.msk.f32.gmra.mxu1 %vm218_vm0, %v1826_v18  ;;  %v3593_v18 = vld [vmem:[#allocation2 + $0x12a] sm:$0xff] }
 0x1c6   : > { %v1037_v27 = vpop.permute.xlu0 %1036  ;;  %v1047_v47 = vpop.permute.xlu2 %1046  ;;  %1798 = vst.msk [vmem:[#allocation3 + $0x158] sm:$0xff] %vm218_vm0, %v3593_v18 }
 0x1c7   : > { %1133 = vst.msk [vmem:[#allocation3] sm:$0xff] %vm1132_vm6, %v1037_v27  ;;  %v1875_v27 = vld [vmem:[%s4104_s1 + $0x10] sm:$0xff] }
 0x1c8   : > { %1138 = vst.msk [vmem:[#allocation3 + $0x50] sm:$0xff] %vm1132_vm6, %v1047_v47  ;;  %v1874_v47 = vld [vmem:[%s4104_s1 + $0x8] sm:$0xff] }
 0x1ca   : > { %1265 = vrot.lane.b32.xlu1 %v4129_v33, %s2686_s25  ;;  %v4132_v33 = vld [vmem:[#allocation14_spill] sm:$0xff] }
 0x1cc   : > { %1459 = vrot.lane.b32.xlu0 %v3166_v51, %s2688_s5  ;;  %v1039_v12 = vpop.permute.xlu1 %1038  ;;  %1231 = vrot.lane.b32.xlu2 %v1166_v21, %s2686_s25  ;;  %v1169_v21 = vld [vmem:[#allocation2 + $0x4a] sm:$0xff] }
 0x1cd   : > { %1134 = vst.msk [vmem:[#allocation3 + $0x10] sm:$0xff] %vm1132_vm6, %v1039_v12  ;;  %2457 = vmatmul.msk.f32.gmra.mxu1 %vm218_vm0, %v1828_v45  ;;  %v1873_v12 = vld [vmem:[%s4104_s1] sm:$0xff] }
 0x1ce   : > { %v1043_v25 = vpop.permute.xlu0 %1042  ;;  %v1053_v39 = vpop.permute.xlu2 %1052 }
 0x1cf   : > { %1136 = vst.msk [vmem:[#allocation3 + $0x30] sm:$0xff] %vm1132_vm6, %v1043_v25  ;;  %v1760_v25 = vld [vmem:[#allocation2 + $0xe2] sm:$0xff] }
 0x1d0   : > { %1141 = vst.msk [vmem:[#allocation3 + $0x80] sm:$0xff] %vm1132_vm6, %v1053_v39  ;;  %v1838_v39 = vld [vmem:[#allocation3 + $0xe8] sm:$0xff] }
 0x1d1   : > { %1792 = vst.msk [vmem:[#allocation3 + $0xf8] sm:$0xff] %vm218_vm0, %v1760_v25 }
 0x1d2   : > { %1652 = vrot.lane.b32.xlu1 %v1570_v32, %s2687_s30 }
 0x1d4   : > { %1427 = vrot.lane.b32.xlu0 %v3052_v16, %s2688_s5  ;;  %v1045_v51 = vpop.permute.xlu1 %1044  ;;  %1618 = vrot.lane.b32.xlu2 %v1553_v31, %s2687_s30 }
 0x1d5   : > { %1137 = vst.msk [vmem:[#allocation3 + $0x40] sm:$0xff] %vm1132_vm6, %v1045_v51  ;;  %2458 = vmatmul.msk.f32.gmra.mxu1 %vm218_vm0, %v1830_v35  ;;  %v1573_v51 = vld [vmem:[#allocation2 + $0x129] sm:$0xff] }
 0x1d6   : > { %v1049_v37 = vpop.permute.xlu0 %1048  ;;  %v1059_v50 = vpop.permute.xlu2 %1058 }
 0x1d7   : > { %1139 = vst.msk [vmem:[#allocation3 + $0x60] sm:$0xff] %vm1132_vm6, %v1049_v37  ;;  %v1364_v37 = vld [vmem:[#allocation2 + $0x68] sm:$0xff] }
 0x1d8   : > { %1144 = vst.msk [vmem:[#allocation3 + $0xb0] sm:$0xff] %vm1132_vm6, %v1059_v50  ;;  %v1556_v50 = vld [vmem:[#allocation2 + $0x61] sm:$0xff] }
 0x1da   : > { %1267 = vrot.lane.b32.xlu1 %v4130_v41, %s2686_s25 }
 0x1dc   : > { %1461 = vrot.lane.b32.xlu0 %v3149_v36, %s2688_s5  ;;  %v1051_v16 = vpop.permute.xlu1 %1050  ;;  %1233 = vrot.lane.b32.xlu2 %v1167_v43, %s2686_s25  ;;  %v1887_v36 = vld [vmem:[%s4104_s1 + $0x70] sm:$0xff] }
 0x1dd   : > { %1140 = vst.msk [vmem:[#allocation3 + $0x70] sm:$0xff] %vm1132_vm6, %v1051_v16  ;;  %2489 = vmatpush.msra.mxu2 %v1887_v36  ;;  %2490 = vmatpush.msra.mxu3 %v1887_v36  ;;  %v3620_v16 = vld [vmem:[#allocation2 + $0x13a] sm:$0xff] }
 0x1de   : > { %v1055_v59 = vpop.permute.xlu0 %1054  ;;  %v1065_v60 = vpop.permute.xlu2 %1064  ;;  %1988 = vmatpush.msra.mxu0 %v1887_v36  ;;  %2459 = vmatmul.msk.f32.gmra.mxu1 %vm218_vm0, %v1832_v53  ;;  %1799 = vst.msk [vmem:[#allocation3 + $0x168] sm:$0xff] %vm218_vm0, %v3620_v16 }
 0x1df   : > { %1142 = vst.msk [vmem:[#allocation3 + $0x90] sm:$0xff] %vm1132_vm6, %v1055_v59  ;;  %2491 = vmatpush.msra.mxu2 %v1886_v3  ;;  %2492 = vmatpush.msra.mxu3 %v1886_v3  ;;  %v4133_v59 = vld [vmem:[#allocation16_spill] sm:$0xff] }
 0x1e0   : > { %1147 = vst.msk [vmem:[#allocation3 + $0xe0] sm:$0xff] %vm1132_vm6, %v1065_v60  ;;  %1989 = vmatpush.msra.mxu0 %v1886_v3 }
 0x1e1   : > { %2493 = vmatpush.msra.mxu2 %v1885_v0  ;;  %2494 = vmatpush.msra.mxu3 %v1885_v0 }
 0x1e2   : > { %1654 = vrot.lane.b32.xlu1 %v1571_v56, %s2687_s30  ;;  %1990 = vmatpush.msra.mxu0 %v1885_v0  ;;  %v1763_v56 = vld [vmem:[#allocation2 + $0x10a] sm:$0xff]  ;;  %v1365_v0 = vld [vmem:[#allocation2 + $0x78] sm:$0xff] }
 0x1e3   : > { %2495 = vmatpush.msra.mxu2 %v1884_v9  ;;  %2496 = vmatpush.msra.mxu3 %v1884_v9  ;;  %1795 = vst.msk [vmem:[#allocation3 + $0x128] sm:$0xff] %vm218_vm0, %v1763_v56  ;;  %v3697_v56 = vld [vmem:[#allocation2 + $0x15a] sm:$0xff] }
 0x1e4   : > { %1429 = vrot.lane.b32.xlu0 %v3064_v22, %s2688_s5  ;;  %v1057_v5 = vpop.permute.xlu1 %1056  ;;  %1620 = vrot.lane.b32.xlu2 %v1554_v52, %s2687_s30  ;;  %v1883_v22 = vld [vmem:[%s4104_s1 + $0x50] sm:$0xff]  ;;  %v1574_v52 = vld [vmem:[#allocation2 + $0x139] sm:$0xff]  ;;  %1802 = vst.msk [vmem:[#allocation3 + $0x198] sm:$0xff] %vm218_vm0, %v3697_v56 }
 0x1e5   : > { %1143 = vst.msk [vmem:[#allocation3 + $0xa0] sm:$0xff] %vm1132_vm6, %v1057_v5  ;;  %2497 = vmatpush.msra.mxu2 %v1883_v22  ;;  %2498 = vmatpush.msra.mxu3 %v1883_v22 }
 0x1e6   : > { %v1061_v48 = vpop.permute.xlu0 %1060  ;;  %v1071_v57 = vpop.permute.xlu2 %1070  ;;  %1991 = vmatpush.msra.mxu0 %v1884_v9  ;;  %2460 = vmatmul.msk.f32.gmra.mxu1 %vm218_vm0, %v1834_v10 }
 0x1e7   : > { %1145 = vst.msk [vmem:[#allocation3 + $0xc0] sm:$0xff] %vm1132_vm6, %v1061_v48  ;;  %2499 = vmatpush.msra.mxu2 %v1882_v4  ;;  %2500 = vmatpush.msra.mxu3 %v1882_v4  ;;  %v1764_v48 = vld [vmem:[#allocation2 + $0x112] sm:$0xff] }
 0x1e8   : > { %1150 = vst.msk [vmem:[#allocation3 + $0x110] sm:$0xff] %vm1132_vm6, %v1071_v57  ;;  %1992 = vmatpush.msra.mxu0 %v1883_v22 }
 0x1e9   : > { %2501 = vmatpush.msra.mxu2 %v1881_v17  ;;  %2502 = vmatpush.msra.mxu3 %v1881_v17  ;;  %1796 = vst.msk [vmem:[#allocation3 + $0x138] sm:$0xff] %vm218_vm0, %v1764_v48  ;;  %v3718_v48 = vld [vmem:[#allocation2 + $0x16a] sm:$0xff] }
 0x1ea   : > { %1269 = vrot.lane.b32.xlu1 %v4131_v46, %s2686_s25  ;;  %1993 = vmatpush.msra.mxu0 %v1882_v4  ;;  %v1382_v46 = vld [vmem:[#allocation2 + $0x140] sm:$0xff]  ;;  %1803 = vst.msk [vmem:[#allocation3 + $0x1a8] sm:$0xff] %vm218_vm0, %v3718_v48 }
 0x1eb   : > { %2503 = vmatpush.msra.mxu2 %v1880_v6  ;;  %2504 = vmatpush.msra.mxu3 %v1880_v6 }
 0x1ec   : > { %1463 = vrot.lane.b32.xlu0 %v3171_v61, %s2688_s5  ;;  %v1063_v19 = vpop.permute.xlu1 %1062  ;;  %1235 = vrot.lane.b32.xlu2 %v1168_v13, %s2686_s25  ;;  %v1879_v61 = vld [vmem:[%s4104_s1 + $0x30] sm:$0xff] }
 0x1ed   : > { %1146 = vst.msk [vmem:[#allocation3 + $0xd0] sm:$0xff] %vm1132_vm6, %v1063_v19  ;;  %2505 = vmatpush.msra.mxu2 %v1879_v61  ;;  %2506 = vmatpush.msra.mxu3 %v1879_v61  ;;  %v1765_v19 = vld [vmem:[#allocation2 + $0x122] sm:$0xff] }
 0x1ee   : > { %v1067_v54 = vpop.permute.xlu0 %1066  ;;  %v1077_v42 = vpop.permute.xlu2 %1076  ;;  %1994 = vmatpush.msra.mxu0 %v1881_v17  ;;  %2461 = vmatmul.msk.f32.gmra.mxu1 %vm218_vm0, %v1836_v55  ;;  %v1171_v17 = vld [vmem:[#allocation2 + $0x62] sm:$0xff]  ;;  %1797 = vst.msk [vmem:[#allocation3 + $0x148] sm:$0xff] %vm218_vm0, %v1765_v19  ;;  %v1854_v19 = vld [vmem:[#allocation3 + $0x168] sm:$0xff] }
 0x1ef   : > { %1148 = vst.msk [vmem:[#allocation3 + $0xf0] sm:$0xff] %vm1132_vm6, %v1067_v54  ;;  %2507 = vmatpush.msra.mxu2 %v1878_v11  ;;  %2508 = vmatpush.msra.mxu3 %v1878_v11 }
 0x1f0   : > { %1153 = vst.msk [vmem:[#allocation3 + $0x140] sm:$0xff] %vm1132_vm6, %v1077_v42  ;;  %1995 = vmatpush.msra.mxu0 %v1880_v6  ;;  %v1575_v42 = vld [vmem:[#allocation2 + $0x141] sm:$0xff] }
 0x1f1   : > { %2509 = vmatpush.msra.mxu2 %v1877_v28  ;;  %2510 = vmatpush.msra.mxu3 %v1877_v28 }
 0x1f2   : > { %1656 = vrot.lane.b32.xlu1 %v1572_v34, %s2687_s30  ;;  %1996 = vmatpush.msra.mxu0 %v1879_v61  ;;  %v1366_v61 = vld [vmem:[#allocation2 + $0x80] sm:$0xff] }
 0x1f3   : > { %2511 = vmatpush.msra.mxu2 %v1876_v23  ;;  %2512 = vmatpush.msra.mxu3 %v1876_v23 }
 0x1f4   : > { %1431 = vrot.lane.b32.xlu0 %v1363_v40, %s2688_s5  ;;  %v1069_v30 = vpop.permute.xlu1 %1068  ;;  %1622 = vrot.lane.b32.xlu2 %v1555_v2, %s2687_s30  ;;  %v1844_v40 = vld [vmem:[#allocation3 + $0x118] sm:$0xff] }
 0x1f5   : > { %1149 = vst.msk [vmem:[#allocation3 + $0x100] sm:$0xff] %vm1132_vm6, %v1069_v30  ;;  %2513 = vmatpush.msra.mxu2 %v1875_v27  ;;  %1997 = vmatpush.msra.mxu0 %v1878_v11  ;;  %v1558_v11 = vld [vmem:[#allocation2 + $0x79] sm:$0xff]  ;;  %v1383_v30 = vld [vmem:[#allocation2 + $0x150] sm:$0xff] }
 0x1f6   : > { %v1073_v15 = vpop.permute.xlu0 %1072  ;;  %v1083_v29 = vpop.permute.xlu2 %1082  ;;  %2462 = vmatmul.msk.f32.gmra.mxu1 %vm218_vm0, %v1838_v39  ;;  %2514 = vmatpush.msra.mxu3 %v1875_v27  ;;  %v1559_v39 = vld [vmem:[#allocation2 + $0x81] sm:$0xff] }
 0x1f7   : > { %1151 = vst.msk [vmem:[#allocation3 + $0x120] sm:$0xff] %vm1132_vm6, %v1073_v15  ;;  %2515 = vmatpush.msra.mxu2 %v1874_v47  ;;  %1998 = vmatpush.msra.mxu0 %v1877_v28 }
 0x1f8   : > { %1156 = vst.msk [vmem:[#allocation3 + $0x170] sm:$0xff] %vm1132_vm6, %v1083_v29  ;;  %2516 = vmatpush.msra.mxu3 %v1874_v47  ;;  %v3669_v29 = vld [vmem:[#allocation2 + $0x152] sm:$0xff] }
 0x1f9   : > { %2517 = vmatpush.msra.mxu2 %v1873_v12  ;;  %1999 = vmatpush.msra.mxu0 %v1876_v23  ;;  %v1172_v23 = vld [vmem:[#allocation2 + $0x6a] sm:$0xff]  ;;  %1801 = vst.msk [vmem:[#allocation3 + $0x188] sm:$0xff] %vm218_vm0, %v3669_v29 }
 0x1fa   : > { %1271 = vrot.lane.b32.xlu1 %v4132_v33, %s2686_s25  ;;  %2518 = vmatpush.msra.mxu3 %v1873_v12 }
 0x1fb   : > { %2000 = vmatpush.msra.mxu0 %v1875_v27 }
 0x1fc   : > { %1465 = vrot.lane.b32.xlu0 %v3190_v20, %s2688_s5  ;;  %v1075_v32 = vpop.permute.xlu1 %1074  ;;  %1237 = vrot.lane.b32.xlu2 %v1169_v21, %s2686_s25  ;;  %v1840_v20 = vld [vmem:[#allocation3 + $0xf8] sm:$0xff] }
 0x1fd   : > { %1152 = vst.msk [vmem:[#allocation3 + $0x130] sm:$0xff] %vm1132_vm6, %v1075_v32  ;;  %2519 = vmatpush.msrb.mxu3 %v3388_v58  ;;  %2001 = vmatpush.msra.mxu0 %v1874_v47  ;;  %v1846_v32 = vld [vmem:[#allocation3 + $0x128] sm:$0xff] }
 0x1fe   : > { %v1079_v31 = vpop.permute.xlu0 %1078  ;;  %v1454_v45 = vpop.permute.xlu2 %1453  ;;  %2463 = vmatmul.msk.f32.gmra.mxu1 %vm218_vm0, %v1840_v20  ;;  %v1560_v20 = vld [vmem:[#allocation2 + $0x91] sm:$0xff] }
 0x1ff   : > { %1154 = vst.msk [vmem:[#allocation3 + $0x150] sm:$0xff] %vm1132_vm6, %v1079_v31  ;;  %2520 = vmatpush.msrb.mxu3 %v3393_v44  ;;  %2002 = vmatpush.msra.mxu0 %v1873_v12  ;;  %v1761_v44 = vld [vmem:[#allocation2 + $0xf2] sm:$0xff] }
 0x200   : > { %1793 = vst.msk [vmem:[#allocation3 + $0x108] sm:$0xff] %vm218_vm0, %v1761_v44  ;;  %v1576_v12 = vld [vmem:[#allocation2 + $0x151] sm:$0xff] }
 0x201   : > { %v1384_v44 = vld [vmem:[#allocation2 + $0x158] sm:$0xff] }
 0x202   : > { %1658 = vrot.lane.b32.xlu1 %v1573_v51, %s2687_s30  ;;  %v3618_v58 = vpop.f32.mrf.mxu1 }
 0x204   : > { %1433 = vrot.lane.b32.xlu0 %v1364_v37, %s2688_s5  ;;  %v1081_v43 = vpop.permute.xlu1 %1080  ;;  %1624 = vrot.lane.b32.xlu2 %v1556_v50, %s2687_s30  ;;  %v1367_v50 = vld [vmem:[#allocation2 + $0x90] sm:$0xff] }
 0x205   : > { %1155 = vst.msk [vmem:[#allocation3 + $0x160] sm:$0xff] %vm1132_vm6, %v1081_v43  ;;  %v1848_v43 = vld [vmem:[#allocation3 + $0x138] sm:$0xff] }
 0x206   : > { %v1085_v41 = vpop.permute.xlu0 %1084  ;;  %v1262_v35 = vpop.permute.xlu2 %1261 }
 0x207   : > { %1157 = vst.msk [vmem:[#allocation3 + $0x180] sm:$0xff] %vm1132_vm6, %v1085_v41  ;;  %v1842_v5 = vld [vmem:[#allocation3 + $0x108] sm:$0xff] }
 0x208   : > { %1342 = vst.msk [vmem:[#allocation3 + $0x100] sm:$0xff] %vm1325_vm7, %v1262_v35  ;;  %2464 = vmatmul.msk.f32.gmra.mxu1 %vm218_vm0, %v1842_v5 }
 0x20a   : > { %1273 = vrot.lane.b32.xlu1 %v4133_v59, %s2686_s25  ;;  %v3633_v53 = vpop.f32.mrf.mxu1 }
 0x20c   : > { %1467 = vrot.lane.b32.xlu0 %v3176_v1, %s2688_s5  ;;  %v1260_v60 = vpop.permute.xlu1 %1259  ;;  %1239 = vrot.lane.b32.xlu2 %v1170_v49, %s2686_s25  ;;  %v1557_v1 = vld [vmem:[#allocation2 + $0x69] sm:$0xff] }
 0x20d   : > { %1341 = vst.msk [vmem:[#allocation3 + $0xf0] sm:$0xff] %vm1325_vm7, %v1260_v60 }
 0x20e   : > { %1535 = vst.msk [vmem:[#allocation3 + $0xf0] sm:$0xff] %vm1519_vm8, %v1454_v45  ;;  %v1647_v36 = vpop.permute.xlu0 %1646  ;;  %v1486_v3 = vpop.permute.xlu2 %1485 }
 0x20f   : > { %1728 = vst.msk [vmem:[#allocation3 + $0xf0] sm:$0xff] %vm1712_vm9, %v1647_v36 }
 0x210   : > { %2465 = vmatmul.msk.f32.gmra.mxu1 %vm218_vm0, %v1844_v40  ;;  %v1369_v40 = vld [vmem:[#allocation2 + $0xa8] sm:$0xff] }
 0x212   : > { %1660 = vrot.lane.b32.xlu1 %v1574_v52, %s2687_s30  ;;  %v3644_v13 = vpop.f32.mrf.mxu1 }
 0x214   : > { %1435 = vrot.lane.b32.xlu0 %v1365_v0, %s2688_s5  ;;  %v1099_v9 = vpop.permute.xlu1 %1098  ;;  %1626 = vrot.lane.b32.xlu2 %v1557_v1, %s2687_s30  ;;  %v1577_v1 = vld [vmem:[#allocation2 + $0x159] sm:$0xff] }
 0x215   : > { %1164 = vst.msk [vmem:[#allocation3 + $0x1f0] sm:$0xff] %vm1132_vm6, %v1099_v9 }
 0x216   : > { %v1292_v57 = vpop.permute.xlu0 %1291  ;;  %v1839_v22 = vld [vmem:[#allocation3 + $0xf0] sm:$0xff]  ;;  %v1230_v4 = vpop.permute.xlu2 %1229 }
 0x217   : > { %1357 = vst.msk [vmem:[#allocation3 + $0x1f0] sm:$0xff] %vm1325_vm7, %v1292_v57  ;;  %2048 = vmatmul.f32.vlgmr.msra.gmra.mxu2 %v1839_v22 }
 0x218   : > { %1551 = vst.msk [vmem:[#allocation3 + $0x1f0] sm:$0xff] %vm1519_vm8, %v1486_v3 }
 0x219   : > { %1326 = vst.msk [vmem:[#allocation3] sm:$0xff] %vm1325_vm7, %v1230_v4  ;;  %v1561_v4 = vld [vmem:[#allocation2 + $0x99] sm:$0xff] }
 0x21a   : > { %1275 = vrot.lane.b32.xlu1 %v3593_v18, %s2686_s25  ;;  %v3655_v34 = vpop.f32.mrf.mxu1  ;;  %v1190_v18 = vld [vmem:[#allocation2 + $0x142] sm:$0xff] }
 0x21b   : > { %1800 = vst.msk [vmem:[#allocation3 + $0x178] sm:$0xff] %vm218_vm0, %v1190_v18 }
 0x21c   : > { %1469 = vrot.lane.b32.xlu0 %v1382_v46, %s2688_s5  ;;  %v1456_v10 = vpop.permute.xlu1 %1455  ;;  %1241 = vrot.lane.b32.xlu2 %v1171_v17, %s2686_s25  ;;  %v1578_v17 = vld [vmem:[#allocation2 + $0x169] sm:$0xff] }
 0x21d   : > { %1536 = vst.msk [vmem:[#allocation3 + $0x100] sm:$0xff] %vm1519_vm8, %v1456_v10 }
 0x21e   : > { %v1649_v6 = vpop.permute.xlu0 %1648  ;;  %v1617_v54 = vpop.permute.xlu2 %1616 }
 0x21f   : > { %1729 = vst.msk [vmem:[#allocation3 + $0x100] sm:$0xff] %vm1712_vm9, %v1649_v6 }
 0x222   : > { %1662 = vrot.lane.b32.xlu1 %v1575_v42, %s2687_s30  ;;  %v3665_v15 = vpop.f32.mrf.mxu1 }
 0x224   : > { %1437 = vrot.lane.b32.xlu0 %v1366_v61, %s2688_s5  ;;  %v1679_v2 = vpop.permute.xlu1 %1678  ;;  %1628 = vrot.lane.b32.xlu2 %v1558_v11, %s2687_s30  ;;  %v1175_v11 = vld [vmem:[#allocation2 + $0x92] sm:$0xff] }
 0x225   : > { %1744 = vst.msk [vmem:[#allocation3 + $0x1f0] sm:$0xff] %vm1712_vm9, %v1679_v2  ;;  %v1385_v2 = vld [vmem:[#allocation2 + $0x168] sm:$0xff] }
 0x226   : > { %v1424_v55 = vpop.permute.xlu0 %1423  ;;  %v1841_v28 = vld [vmem:[#allocation3 + $0x100] sm:$0xff]  ;;  %v1232_v7 = vpop.permute.xlu2 %1231 }
 0x227   : > { %1520 = vst.msk [vmem:[#allocation3] sm:$0xff] %vm1519_vm8, %v1424_v55  ;;  %2051 = vmatmul.f32.gmra.mxu2 %v1841_v28  ;;  %v1856_v55 = vld [vmem:[#allocation3 + $0x178] sm:$0xff] }
 0x228   : > { %1713 = vst.msk [vmem:[#allocation3] sm:$0xff] %vm1712_vm9, %v1617_v54  ;;  %v3730_v54 = vld [vmem:[#allocation2 + $0x172] sm:$0xff] }
 0x229   : > { %1327 = vst.msk [vmem:[#allocation3 + $0x10] sm:$0xff] %vm1325_vm7, %v1232_v7 }
 0x22a   : > { %1277 = vrot.lane.b32.xlu1 %v3620_v16, %s2686_s25  ;;  %v3679_v31 = vpop.f32.mrf.mxu1  ;;  %1804 = vst.msk [vmem:[#allocation3 + $0x1b8] sm:$0xff] %vm218_vm0, %v3730_v54 }
 0x22c   : > { %1471 = vrot.lane.b32.xlu0 %v1383_v30, %s2688_s5  ;;  %v1264_v27 = vpop.permute.xlu1 %1263  ;;  %v1871_v47 = vld [vmem:[#allocation3 + $0x1f0] sm:$0xff]  ;;  %1243 = vrot.lane.b32.xlu2 %v1172_v23, %s2686_s25 }
 0x22d   : > { %1343 = vst.msk [vmem:[#allocation3 + $0x110] sm:$0xff] %vm1325_vm7, %v1264_v27  ;;  %2096 = vmatmul.f32.vlgmr.msra.gmra.mxu3 %v1871_v47  ;;  %v3744_v23 = vld [vmem:[#allocation2 + $0x182] sm:$0xff] }
 0x22e   : > { %v1458_v21 = vpop.permute.xlu0 %1457  ;;  %v1619_v33 = vpop.permute.xlu2 %1618  ;;  %1805 = vst.msk [vmem:[#allocation3 + $0x1c8] sm:$0xff] %vm218_vm0, %v3744_v23 }
 0x22f   : > { %1537 = vst.msk [vmem:[#allocation3 + $0x110] sm:$0xff] %vm1519_vm8, %v1458_v21  ;;  %v1809_v25 = vld [vmem:[#allocation3] sm:$0xff]  ;;  %v1858_v21 = vld [vmem:[#allocation3 + $0x188] sm:$0xff] }
 0x230   : > { %2003 = vmatmul.f32.vlgmr.msra.gmra.mxu0 %v1809_v25  ;;  %v1774_v25 = vld [vmem:[#allocation2 + $0x18a] sm:$0xff] }
 0x231   : > { %1806 = vst.msk [vmem:[#allocation3 + $0x1d8] sm:$0xff] %vm218_vm0, %v1774_v25 }
 0x232   : > { %1664 = vrot.lane.b32.xlu1 %v1576_v12, %s2687_s30  ;;  %v3694_v16 = vpop.f32.mrf.mxu1 }
 0x234   : > { %1086 = vrot.lane.b32.xlu0 %v1575_v42, %s2685_s12  ;;  %v1651_v45 = vpop.permute.xlu1 %1650  ;;  %1630 = vrot.lane.b32.xlu2 %v1559_v39, %s2687_s30 }
 0x235   : > { %1730 = vst.msk [vmem:[#allocation3 + $0x110] sm:$0xff] %vm1712_vm9, %v1651_v45  ;;  %2466 = vmatmul.msk.f32.vlgmr.msrb.gmra.mxu3 %vm218_vm0, %v1846_v32  ;;  %v1579_v45 = vld [vmem:[#allocation2 + $0x171] sm:$0xff] }
 0x236   : > { %v1426_v51 = vpop.permute.xlu0 %1425  ;;  %v1234_v37 = vpop.permute.xlu2 %1233 }
 0x237   : > { %1521 = vst.msk [vmem:[#allocation3 + $0x10] sm:$0xff] %vm1519_vm8, %v1426_v51  ;;  %v1562_v51 = vld [vmem:[#allocation2 + $0xa9] sm:$0xff] }
 0x238   : > { %1714 = vst.msk [vmem:[#allocation3 + $0x10] sm:$0xff] %vm1712_vm9, %v1619_v33 }
 0x239   : > { %1328 = vst.msk [vmem:[#allocation3 + $0x20] sm:$0xff] %vm1325_vm7, %v1234_v37  ;;  %v1860_v37 = vld [vmem:[#allocation3 + $0x198] sm:$0xff] }
 0x23a   : > { %1439 = vrot.lane.b32.xlu1 %v1367_v50, %s2688_s5  ;;  %v3708_v0 = vpop.f32.mrf.mxu1 }
 0x23c   : > { %1632 = vrot.lane.b32.xlu0 %v1560_v20, %s2687_s30  ;;  %v1266_v41 = vpop.permute.xlu1 %1265  ;;  %v1843_v35 = vld [vmem:[#allocation3 + $0x110] sm:$0xff]  ;;  %1245 = vrot.lane.b32.xlu2 %v3447_v24, %s2686_s25  ;;  %v1850_v24 = vld [vmem:[#allocation3 + $0x148] sm:$0xff] }
 0x23d   : > { %1344 = vst.msk [vmem:[#allocation3 + $0x120] sm:$0xff] %vm1325_vm7, %v1266_v41  ;;  %2054 = vmatmul.f32.gmra.mxu2 %v1843_v35  ;;  %2467 = vmatmul.msk.f32.gmra.mxu3 %vm218_vm0, %v1848_v43  ;;  %v1775_v43 = vld [vmem:[#allocation2 + $0x19a] sm:$0xff] }
 0x23e   : > { %v1460_v49 = vpop.permute.xlu0 %1459  ;;  %v1621_v59 = vpop.permute.xlu2 %1620  ;;  %1807 = vst.msk [vmem:[#allocation3 + $0x1e8] sm:$0xff] %vm218_vm0, %v1775_v43 }
 0x23f   : > { %1538 = vst.msk [vmem:[#allocation3 + $0x120] sm:$0xff] %vm1519_vm8, %v1460_v49  ;;  %v1811_v60 = vld [vmem:[#allocation3 + $0x10] sm:$0xff]  ;;  %v1370_v49 = vld [vmem:[#allocation2 + $0xb0] sm:$0xff] }
 0x240   : > { %2006 = vmatmul.f32.gmra.mxu0 %v1811_v60  ;;  %v1563_v60 = vld [vmem:[#allocation2 + $0xb1] sm:$0xff] }
 0x242   : > { %1473 = vrot.lane.b32.xlu1 %v1384_v44, %s2688_s5  ;;  %v3723_v10 = vpop.f32.mrf.mxu1 }
 0x244   : > { %1247 = vrot.lane.b32.xlu0 %v3460_v62, %s2686_s25  ;;  %v1653_v36 = vpop.permute.xlu1 %1652  ;;  %1279 = vrot.lane.b32.xlu2 %v1190_v18, %s2686_s25  ;;  %v1852_v62 = vld [vmem:[#allocation3 + $0x158] sm:$0xff]  ;;  %v1386_v18 = vld [vmem:[#allocation2 + $0x170] sm:$0xff] }
 0x245   : > { %1731 = vst.msk [vmem:[#allocation3 + $0x120] sm:$0xff] %vm1712_vm9, %v1653_v36  ;;  %2468 = vmatmul.msk.f32.gmra.mxu3 %vm218_vm0, %v1850_v24  ;;  %v1776_v36 = vld [vmem:[#allocation2 + $0x1a2] sm:$0xff] }
 0x246   : > { %v1428_v3 = vpop.permute.xlu0 %1427  ;;  %v1236_v52 = vpop.permute.xlu2 %1235  ;;  %1808 = vst.msk [vmem:[#allocation3 + $0x1f8] sm:$0xff] %vm218_vm0, %v1776_v36 }
 0x247   : > { %1522 = vst.msk [vmem:[#allocation3 + $0x20] sm:$0xff] %vm1519_vm8, %v1428_v3 }
 0x248   : > { %1715 = vst.msk [vmem:[#allocation3 + $0x20] sm:$0xff] %vm1712_vm9, %v1621_v59 }
 0x249   : > { %1329 = vst.msk [vmem:[#allocation3 + $0x30] sm:$0xff] %vm1325_vm7, %v1236_v52 }
 0x24a   : > { %1088 = vrot.lane.b32.xlu1 %v1576_v12, %s2685_s12  ;;  %v3738_v28 = vpop.f32.mrf.mxu1 }
 0x24c   : > { %1281 = vrot.lane.b32.xlu0 %v3669_v29, %s2686_s25  ;;  %v1268_v5 = vpop.permute.xlu1 %1267  ;;  %v1845_v9 = vld [vmem:[#allocation3 + $0x120] sm:$0xff]  ;;  %1666 = vrot.lane.b32.xlu2 %v1577_v1, %s2687_s30 }
 0x24d   : > { %1345 = vst.msk [vmem:[#allocation3 + $0x130] sm:$0xff] %vm1325_vm7, %v1268_v5  ;;  %2057 = vmatmul.f32.gmra.mxu2 %v1845_v9  ;;  %2469 = vmatmul.msk.f32.gmra.mxu3 %vm218_vm0, %v1852_v62 }
 0x24e   : > { %v1462_v57 = vpop.permute.xlu0 %1461  ;;  %v1623_v22 = vpop.permute.xlu2 %1622 }
 0x24f   : > { %1539 = vst.msk [vmem:[#allocation3 + $0x130] sm:$0xff] %vm1519_vm8, %v1462_v57  ;;  %v1813_v46 = vld [vmem:[#allocation3 + $0x20] sm:$0xff] }
 0x250   : > { %2009 = vmatmul.f32.gmra.mxu0 %v1813_v46  ;;  %v1580_v46 = vld [vmem:[#allocation2 + $0x181] sm:$0xff] }
 0x252   : > { %1634 = vrot.lane.b32.xlu1 %v1561_v4, %s2687_s30  ;;  %v3755_v12 = vpop.f32.mrf.mxu1 }
 0x254   : > { %1668 = vrot.lane.b32.xlu0 %v1578_v17, %s2687_s30  ;;  %v1655_v6 = vpop.permute.xlu1 %1654  ;;  %1441 = vrot.lane.b32.xlu2 %v1368_v14, %s2688_s5 }
 0x255   : > { %1732 = vst.msk [vmem:[#allocation3 + $0x130] sm:$0xff] %vm1712_vm9, %v1655_v6  ;;  %2470 = vmatmul.msk.f32.gmra.mxu3 %vm218_vm0, %v1854_v19  ;;  %v1564_v6 = vld [vmem:[#allocation2 + $0xc1] sm:$0xff] }
 0x256   : > { %v1430_v42 = vpop.permute.xlu0 %1429  ;;  %v1238_v61 = vpop.permute.xlu2 %1237 }
 0x257   : > { %1523 = vst.msk [vmem:[#allocation3 + $0x30] sm:$0xff] %vm1519_vm8, %v1430_v42  ;;  %v1581_v42 = vld [vmem:[#allocation2 + $0x189] sm:$0xff] }
 0x258   : > { %1716 = vst.msk [vmem:[#allocation3 + $0x30] sm:$0xff] %vm1712_vm9, %v1623_v22 }
 0x259   : > { %1330 = vst.msk [vmem:[#allocation3 + $0x40] sm:$0xff] %vm1325_vm7, %v1238_v61  ;;  %v1371_v61 = vld [vmem:[#allocation2 + $0xc0] sm:$0xff] }
 0x25a   : > { %1249 = vrot.lane.b32.xlu1 %v1175_v11, %s2686_s25 }
 0x25b   : > { %v3768_v44 = vpop.f32.mrf.mxu1 }
 0x25c   : > { %1443 = vrot.lane.b32.xlu0 %v1369_v40, %s2688_s5  ;;  %v1270_v7 = vpop.permute.xlu1 %1269  ;;  %v1847_v30 = vld [vmem:[#allocation3 + $0x130] sm:$0xff]  ;;  %1475 = vrot.lane.b32.xlu2 %v1385_v2, %s2688_s5 }
 0x25d   : > { %1346 = vst.msk [vmem:[#allocation3 + $0x140] sm:$0xff] %vm1325_vm7, %v1270_v7  ;;  %2060 = vmatmul.f32.gmra.mxu2 %v1847_v30  ;;  %2471 = vmatmul.msk.f32.gmra.mxu3 %vm218_vm0, %v1856_v55 }
 0x25e   : > { %v1464_v29 = vpop.permute.xlu0 %1463  ;;  %v1625_v27 = vpop.permute.xlu2 %1624 }
 0x25f   : > { %1540 = vst.msk [vmem:[#allocation3 + $0x140] sm:$0xff] %vm1519_vm8, %v1464_v29  ;;  %v1815_v47 = vld [vmem:[#allocation3 + $0x30] sm:$0xff]  ;;  %v1372_v29 = vld [vmem:[#allocation2 + $0xc8] sm:$0xff] }
 0x260   : > { %2012 = vmatmul.f32.gmra.mxu0 %v1815_v47  ;;  %v1870_v47 = vld [vmem:[#allocation3 + $0x1e8] sm:$0xff] }
 0x262   : > { %1283 = vrot.lane.b32.xlu1 %v3697_v56, %s2686_s25  ;;  %v1862_v56 = vld [vmem:[#allocation3 + $0x1a8] sm:$0xff] }
 0x263   : > { %v3780_v62 = vpop.f32.mrf.mxu1 }
 0x264   : > { %1477 = vrot.lane.b32.xlu0 %v1386_v18, %s2688_s5  ;;  %v1657_v33 = vpop.permute.xlu1 %1656  ;;  %1090 = vrot.lane.b32.xlu2 %v1577_v1, %s2685_s12  ;;  %v1387_v1 = vld [vmem:[#allocation2 + $0x180] sm:$0xff] }
 0x265   : > { %1733 = vst.msk [vmem:[#allocation3 + $0x140] sm:$0xff] %vm1712_vm9, %v1657_v33  ;;  %2472 = vmatmul.msk.f32.gmra.mxu3 %vm218_vm0, %v1858_v21 }
 0x266   : > { %v1432_v39 = vpop.permute.xlu0 %1431  ;;  %v1240_v32 = vpop.permute.xlu2 %1239 }
 0x267   : > { %1524 = vst.msk [vmem:[#allocation3 + $0x40] sm:$0xff] %vm1519_vm8, %v1432_v39  ;;  %v1389_v39 = vld [vmem:[#allocation2 + $0x198] sm:$0xff] }
 0x268   : > { %1717 = vst.msk [vmem:[#allocation3 + $0x40] sm:$0xff] %vm1712_vm9, %v1625_v27  ;;  %v1388_v27 = vld [vmem:[#allocation2 + $0x188] sm:$0xff] }
 0x269   : > { %1331 = vst.msk [vmem:[#allocation3 + $0x50] sm:$0xff] %vm1325_vm7, %v1240_v32  ;;  %v1872_v32 = vld [vmem:[#allocation3 + $0x1f8] sm:$0xff] }
 0x26a   : > { %1670 = vrot.lane.b32.xlu1 %v1579_v45, %s2687_s30 }
 0x26c   : > { %1092 = vrot.lane.b32.xlu0 %v1578_v17, %s2685_s12  ;;  %v1272_v50 = vpop.permute.xlu1 %1271  ;;  %v1849_v20 = vld [vmem:[#allocation3 + $0x140] sm:$0xff]  ;;  %1636 = vrot.lane.b32.xlu2 %v1562_v51, %s2687_s30  ;;  %v3791_v17 = vpop.f32.mrf.mxu1 }
 0x26d   : > { %1347 = vst.msk [vmem:[#allocation3 + $0x150] sm:$0xff] %vm1325_vm7, %v1272_v50  ;;  %2063 = vmatmul.f32.gmra.mxu2 %v1849_v20  ;;  %2473 = vmatmul.msk.f32.gmra.mxu3 %vm218_vm0, %v1860_v37  ;;  %v3828_v37 = vld [vmem:[%s4106_s3] ss:$0 sm:$0xff] }
 0x26e   : > { %v1466_v41 = vpop.permute.xlu0 %1465  ;;  %v1627_v35 = vpop.permute.xlu2 %1626 }
 0x26f   : > { %1541 = vst.msk [vmem:[#allocation3 + $0x150] sm:$0xff] %vm1519_vm8, %v1466_v41  ;;  %v1817_v59 = vld [vmem:[#allocation3 + $0x40] sm:$0xff] }
 0x270   : > { %2015 = vmatmul.f32.gmra.mxu0 %v1817_v59 }
 0x272   : > { %1445 = vrot.lane.b32.xlu1 %v1370_v49, %s2688_s5  ;;  %v1582_v49 = vld [vmem:[#allocation2 + $0x199] sm:$0xff] }
 0x274   : > { %1638 = vrot.lane.b32.xlu0 %v1563_v60, %s2687_s30  ;;  %v1659_v24 = vpop.permute.xlu1 %1658  ;;  %1251 = vrot.lane.b32.xlu2 %v3482_v26, %s2686_s25  ;;  %v1864_v26 = vld [vmem:[#allocation3 + $0x1b8] sm:$0xff]  ;;  %v3806_v2 = vpop.f32.mrf.mxu1 }
 0x275   : > { %1734 = vst.msk [vmem:[#allocation3 + $0x150] sm:$0xff] %vm1712_vm9, %v1659_v24  ;;  %2474 = vmatmul.msk.f32.gmra.mxu3 %vm218_vm0, %v1862_v56  ;;  %v1373_v56 = vld [vmem:[#allocation2 + $0xd8] sm:$0xff]  ;;  %v1565_v24 = vld [vmem:[#allocation2 + $0xc9] sm:$0xff] }
 0x276   : > { %v1434_v3 = vpop.permute.xlu0 %1433  ;;  %v1242_v52 = vpop.permute.xlu2 %1241 }
 0x277   : > { %1525 = vst.msk [vmem:[#allocation3 + $0x50] sm:$0xff] %vm1519_vm8, %v1434_v3 }
 0x278   : > { %1718 = vst.msk [vmem:[#allocation3 + $0x50] sm:$0xff] %vm1712_vm9, %v1627_v35 }
 0x279   : > { %1332 = vst.msk [vmem:[#allocation3 + $0x60] sm:$0xff] %vm1325_vm7, %v1242_v52 }
 0x27a   : > { %1479 = vrot.lane.b32.xlu1 %v1387_v1, %s2688_s5  ;;  %v1566_v1 = vld [vmem:[#allocation2 + $0xd9] sm:$0xff] }
 0x27c   : > { %1253 = vrot.lane.b32.xlu0 %v3494_v38, %s2686_s25  ;;  %v1274_v5 = vpop.permute.xlu1 %1273  ;;  %v1851_v9 = vld [vmem:[#allocation3 + $0x150] sm:$0xff]  ;;  %1285 = vrot.lane.b32.xlu2 %v3718_v48, %s2686_s25  ;;  %v1866_v38 = vld [vmem:[#allocation3 + $0x1c8] sm:$0xff]  ;;  %v2162_v25 = vpop.f32.mrf.mxu1 }
 0x27d   : > { %1348 = vst.msk [vmem:[#allocation3 + $0x160] sm:$0xff] %vm1325_vm7, %v1274_v5  ;;  %2066 = vmatmul.f32.gmra.mxu2 %v1851_v9  ;;  %2475 = vmatmul.msk.f32.gmra.mxu3 %vm218_vm0, %v1864_v26 }
 0x27e   : > { %v1468_v57 = vpop.permute.xlu0 %1467  ;;  %v1629_v22 = vpop.permute.xlu2 %1628 }
 0x27f   : > { %1542 = vst.msk [vmem:[#allocation3 + $0x160] sm:$0xff] %vm1519_vm8, %v1468_v57  ;;  %v1819_v4 = vld [vmem:[#allocation3 + $0x50] sm:$0xff] }
 0x280   : > { %2018 = vmatmul.f32.gmra.mxu0 %v1819_v4 }
 0x282   : > { %1094 = vrot.lane.b32.xlu1 %v1579_v45, %s2685_s12 }
 0x284   : > { %1287 = vrot.lane.b32.xlu0 %v3730_v54, %s2686_s25  ;;  %v1661_v48 = vpop.permute.xlu1 %1660  ;;  %1672 = vrot.lane.b32.xlu2 %v1580_v46, %s2687_s30  ;;  %v1868_v54 = vld [vmem:[#allocation3 + $0x1d8] sm:$0xff] }
 0x285   : > { %1735 = vst.msk [vmem:[#allocation3 + $0x160] sm:$0xff] %vm1712_vm9, %v1661_v48  ;;  %2476 = vmatmul.msk.f32.gmra.mxu3 %vm218_vm0, %v1866_v38  ;;  %v2165_v26 = vpop.f32.mrf.mxu1 }
 0x286   : > { %v1436_v14 = vpop.permute.xlu0 %1435  ;;  %v1244_v19 = vpop.permute.xlu2 %1243 }
 0x287   : > { %1526 = vst.msk [vmem:[#allocation3 + $0x60] sm:$0xff] %vm1519_vm8, %v1436_v14 }
 0x288   : > { %1719 = vst.msk [vmem:[#allocation3 + $0x60] sm:$0xff] %vm1712_vm9, %v1629_v22 }
 0x289   : > { %1333 = vst.msk [vmem:[#allocation3 + $0x70] sm:$0xff] %vm1325_vm7, %v1244_v19 }
 0x28a   : > { %1640 = vrot.lane.b32.xlu1 %v1564_v6, %s2687_s30 }
 0x28c   : > { %1674 = vrot.lane.b32.xlu0 %v1581_v42, %s2687_s30  ;;  %v1276_v11 = vpop.permute.xlu1 %1275  ;;  %v1853_v40 = vld [vmem:[#allocation3 + $0x160] sm:$0xff]  ;;  %1447 = vrot.lane.b32.xlu2 %v1371_v61, %s2688_s5 }
 0x28d   : > { %1349 = vst.msk [vmem:[#allocation3 + $0x170] sm:$0xff] %vm1325_vm7, %v1276_v11  ;;  %2069 = vmatmul.f32.gmra.mxu2 %v1853_v40  ;;  %2477 = vmatmul.msk.f32.gmra.mxu3 %vm218_vm0, %v1868_v54 }
 0x28e   : > { %v1470_v55 = vpop.permute.xlu0 %1469  ;;  %v1631_v7 = vpop.permute.xlu2 %1630 }
 0x28f   : > { %1543 = vst.msk [vmem:[#allocation3 + $0x170] sm:$0xff] %vm1519_vm8, %v1470_v55  ;;  %v1821_v30 = vld [vmem:[#allocation3 + $0x60] sm:$0xff] }
 0x290   : > { %2021 = vmatmul.f32.gmra.mxu0 %v1821_v30 }
 0x292   : > { %1255 = vrot.lane.b32.xlu1 %v3507_v63, %s2686_s25  ;;  %v3821_v63 = vld [vmem:[%s4105_s2] ss:$0 sm:$0xff] }
 0x294   : > { %1449 = vrot.lane.b32.xlu0 %v1372_v29, %s2688_s5  ;;  %v1663_v18 = vpop.permute.xlu1 %1662  ;;  %1481 = vrot.lane.b32.xlu2 %v1388_v27, %s2688_s5  ;;  %v2168_v29 = vpop.f32.mrf.mxu1 }
 0x295   : > { %1736 = vst.msk [vmem:[#allocation3 + $0x170] sm:$0xff] %vm1712_vm9, %v1663_v18  ;;  %2478 = vmatmul.msk.f32.gmra.mxu3 %vm218_vm0, %v1870_v47 }
 0x296   : > { %v1438_v21 = vpop.permute.xlu0 %1437  ;;  %v1246_v33 = vpop.permute.xlu2 %1245 }
 0x297   : > { %1527 = vst.msk [vmem:[#allocation3 + $0x70] sm:$0xff] %vm1519_vm8, %v1438_v21 }
 0x298   : > { %1720 = vst.msk [vmem:[#allocation3 + $0x70] sm:$0xff] %vm1712_vm9, %v1631_v7 }
 0x299   : > { %1334 = vst.msk [vmem:[#allocation3 + $0x80] sm:$0xff] %vm1325_vm7, %v1246_v33 }
 0x29a   : > { %1289 = vrot.lane.b32.xlu1 %v3744_v23, %s2686_s25  ;;  %v2049_v45 = vpop.f32.mrf.mxu2 }
 0x29b   : > { %v2163_v51 = vadd.f32 %v2162_v25, %v2049_v45 }
 0x29c   : > { %v1278_v50 = vpop.permute.xlu1 %1277  ;;  %v1855_v20 = vld [vmem:[#allocation3 + $0x170] sm:$0xff]  ;;  %1483 = vrot.lane.b32.xlu0 %v1389_v39, %s2688_s5  ;;  %1096 = vrot.lane.b32.xlu2 %v1580_v46, %s2685_s12  ;;  %s3840_s12 = scalar_lea.vmem [#allocation7], %s2446_s8  ;;  %s2486_s8 = sshll.u32 %s2737_s19, 8 }
 0x29d   : > { %1350 = vst.msk [vmem:[#allocation3 + $0x180] sm:$0xff] %vm1325_vm7, %v1278_v50  ;;  %2072 = vmatmul.f32.gmra.mxu2 %v1855_v20  ;;  %2479 = vmatmul.msk.f32.gmra.mxu3 %vm218_vm0, %v1872_v32  ;;  %v2232_v23 = vmul.f32 %v3821_v63, %v2163_v51  ;;  %s2363_s19 = sshll.u32 %s3840_s12, 4  ;;  %s2364_s19 = int_to_ptr.vmem [resolvable:$true] %s2363_s19 }
 0x29e   : > { %v1472_v43 = vpop.permute.xlu0 %1471  ;;  %v1280_v41 = vpop.permute.xlu2 %1279 }
 0x29f   : > { %1544 = vst.msk [vmem:[#allocation3 + $0x180] sm:$0xff] %vm1519_vm8, %v1472_v43  ;;  %v2268_v35 = vadd.f32 %v3828_v37, %v2232_v23  ;;  %v1823_v59 = vld [vmem:[#allocation3 + $0x70] sm:$0xff] }
 0x2a0   : > { %2024 = vmatmul.f32.gmra.mxu0 %v1823_v59 }
 0x2a1   : > { %v2300_v60 = vmax.f32 %v2268_v35, 0.0 }
 0x2a2   : > { %1676 = vrot.lane.b32.xlu1 %v1582_v49, %s2687_s30 }
 0x2a3   : > { %2333 = vst.msk [vmem:[%s3840_s12 + $0x78] sm:$0xff] %vm2317_vm10, %v2300_v60 }
 0x2a4   : > { %v1665_v36 = vpop.permute.xlu1 %1664  ;;  %1451 = vrot.lane.b32.xlu0 %v1373_v56, %s2688_s5  ;;  %1642 = vrot.lane.b32.xlu2 %v1565_v24, %s2687_s30  ;;  %s2362_s5 = scalar_lea.hbm %s4107_s4, %s2486_s8 }
 0x2a5   : > { %1737 = vst.msk [vmem:[#allocation3 + $0x180] sm:$0xff] %vm1712_vm9, %v1665_v36  ;;  %s2365_s14 = sshll.u32 %s2362_s5, 4  ;;  %s2366_s14 = int_to_ptr.hbm [resolvable:$true] %s2365_s14 }
 0x2a6   : > { %v1087_v3 = vpop.permute.xlu0 %1086  ;;  %v1667_v52 = vpop.permute.xlu2 %1666  ;;  %s2625_s9 = sshra.s32 %s2366_s14, 4  ;;  %s2626_s9 = int_to_ptr.hbm [resolvable:$true] %s2625_s9 }
 0x2a7   : > { %1158 = vst.msk [vmem:[#allocation3 + $0x190] sm:$0xff] %vm1132_vm6, %v1087_v3  ;;  %s2627_s11 = scalar_lea.hbm %s2626_s9, 256  ;;  %p2632_p0 = scmp.lt.s32.totalorder %s2626_s9, %s4107_s4 }
 0x2a8   : > { %1351 = vst.msk [vmem:[#allocation3 + $0x190] sm:$0xff] %vm1325_vm7, %v1280_v41  ;;  %p2628_p6 = scmp.ne.s32.totalorder %s2626_s9, %s2627_s11  ;;  %p2633_p1 = scmp.lt.s32.totalorder %s2631_s22, %s2627_s11 }
 0x2aa   : > { %1644 = vrot.lane.b32.xlu1 %v1566_v1, %s2687_s30  ;;  %v2052_v5 = vpop.f32.mrf.mxu2  ;;  %p2629_p9 = pnand %p2628_p6, %p2766_p11  ;;  %p2634_p3 = por %p2633_p1, %p2632_p0 }
 0x2ab   : > { %v2166_v9 = vadd.f32 %v2165_v26, %v2052_v5 }
 0x2ac   : > { %v1440_v57 = vpop.permute.xlu1 %1439  ;;  %v1857_v22 = vld [vmem:[#allocation3 + $0x180] sm:$0xff]  ;;  %1257 = vrot.lane.b32.xlu2 %v3532_v8, %s2686_s25  ;;  %p2630_p13 = pneg %p2629_p9 }
 0x2ad   : > { %1528 = vst.msk [vmem:[#allocation3 + $0x80] sm:$0xff] %vm1519_vm8, %v1440_v57  ;;  %2075 = vmatmul.f32.gmra.mxu2 %v1857_v22  ;;  %v2233_v4 = vmul.f32 %v3821_v63, %v2166_v9  ;;  %v2004_v46 = vpop.f32.mrf.mxu0 }
 0x2ae   : > { %v1633_v38 = vpop.permute.xlu0 %1632  ;;  %v1442_v48 = vpop.permute.xlu2 %1441  ;;  %v2118_v14 = vadd.f32 %v3618_v58, %v2004_v46  ;;  %p2635_p4 = pnand %p2634_p3, %p2630_p13 }
 0x2af   : > { %1721 = vst.msk [vmem:[#allocation3 + $0x80] sm:$0xff] %vm1712_vm9, %v1633_v38  ;;  %v2269_v19 = vadd.f32 %v3828_v37, %v2233_v4 }
 0x2b0   : > { %v3857_v6 = vpop.f32.mrf.mxu3  ;;  %v2217_v42 = vmul.f32 %v3821_v63, %v2118_v14 }
 0x2b1   : > { %v2301_v8 = vmax.f32 %v2269_v19, 0.0 }
 0x2b2   : > { %v2253_v61 = vadd.f32 %v3828_v37, %v2217_v42 }
 0x2b3   : > { %2334 = vst.msk [vmem:[%s3840_s12 + $0x80] sm:$0xff] %vm2317_vm10, %v2301_v8 }
 0x2b4   : > { %v1474_v54 = vpop.permute.xlu1 %1473  ;;  %v2285_v11 = vmax.f32 %v2253_v61, 0.0 }
 0x2b5   : > { %1545 = vst.msk [vmem:[#allocation3 + $0x190] sm:$0xff] %vm1519_vm8, %v1474_v54 }
 0x2b6   : > { %1738 = vst.msk [vmem:[#allocation3 + $0x190] sm:$0xff] %vm1712_vm9, %v1667_v52  ;;  %v1248_v58 = vpop.permute.xlu0 %1247  ;;  %v1825_v40 = vld [vmem:[#allocation3 + $0x80] sm:$0xff]  ;;  %v1476_v55 = vpop.permute.xlu2 %1475 }
 0x2b7   : > { %1335 = vst.msk [vmem:[#allocation3 + $0x90] sm:$0xff] %vm1325_vm7, %v1248_v58  ;;  %2027 = vmatmul.f32.gmra.mxu0 %v1825_v40 }
 0x2b8   : > { %1529 = vst.msk [vmem:[#allocation3 + $0x90] sm:$0xff] %vm1519_vm8, %v1442_v48  ;;  %v2171_v7 = vpop.f32.mrf.mxu3 }
 0x2b9   : > { %2318 = vst.msk [vmem:[%s3840_s12] sm:$0xff] %vm2317_vm10, %v2285_v11 }
 0x2bc   : > { %v1089_v30 = vpop.permute.xlu1 %1088 }
 0x2bd   : > { %1159 = vst.msk [vmem:[#allocation3 + $0x1a0] sm:$0xff] %vm1132_vm6, %v1089_v30  ;;  %v1859_v27 = vld [vmem:[#allocation3 + $0x190] sm:$0xff]  ;;  %v2007_v47 = vpop.f32.mrf.mxu0 }
 0x2be   : > { %v1282_v18 = vpop.permute.xlu0 %1281  ;;  %2078 = vmatmul.f32.gmra.mxu2 %v1859_v27  ;;  %v1091_v21 = vpop.permute.xlu2 %1090  ;;  %v2121_v33 = vadd.f32 %v3633_v53, %v2007_v47 }
 0x2bf   : > { %1352 = vst.msk [vmem:[#allocation3 + $0x1a0] sm:$0xff] %vm1325_vm7, %v1282_v18 }
 0x2c0   : > { %1546 = vst.msk [vmem:[#allocation3 + $0x1a0] sm:$0xff] %vm1519_vm8, %v1476_v55  ;;  %v2055_v25 = vpop.f32.mrf.mxu2  ;;  %v2174_v39 = vpop.f32.mrf.mxu3  ;;  %v2218_v32 = vmul.f32 %v3821_v63, %v2121_v33 }
 0x2c1   : > { %v2169_v45 = vadd.f32 %v2168_v29, %v2055_v25  ;;  %1160 = vst.msk [vmem:[#allocation3 + $0x1b0] sm:$0xff] %vm1132_vm6, %v1091_v21 }
 0x2c2   : > { %v2254_v51 = vadd.f32 %v3828_v37, %v2218_v32 }
 0x2c3   : > { %v2234_v50 = vmul.f32 %v3821_v63, %v2169_v45 }
 0x2c4   : > { %v1635_v20 = vpop.permute.xlu1 %1634  ;;  %v2286_v23 = vmax.f32 %v2254_v51, 0.0 }
 0x2c5   : > { %v2270_v53 = vadd.f32 %v3828_v37, %v2234_v50  ;;  %1722 = vst.msk [vmem:[#allocation3 + $0x90] sm:$0xff] %vm1712_vm9, %v1635_v20 }
 0x2c6   : > { %v1669_v43 = vpop.permute.xlu0 %1668  ;;  %2319 = vst.msk [vmem:[%s3840_s12 + $0x8] sm:$0xff] %vm2317_vm10, %v2286_v23  ;;  %v1637_v41 = vpop.permute.xlu2 %1636 }
 0x2c7   : > { %v2302_v35 = vmax.f32 %v2270_v53, 0.0  ;;  %1739 = vst.msk [vmem:[#allocation3 + $0x1a0] sm:$0xff] %vm1712_vm9, %v1669_v43 }
 0x2c8   : > { %v3882_v49 = vpop.f32.mrf.mxu3 }
 0x2c9   : > { %2335 = vst.msk [vmem:[%s3840_s12 + $0x88] sm:$0xff] %vm2317_vm10, %v2302_v35 }
 0x2cc   : > { %v1250_v59 = vpop.permute.xlu1 %1249  ;;  %v1827_v60 = vld [vmem:[#allocation3 + $0x90] sm:$0xff] }
 0x2cd   : > { %1336 = vst.msk [vmem:[#allocation3 + $0xa0] sm:$0xff] %vm1325_vm7, %v1250_v59  ;;  %2030 = vmatmul.f32.gmra.mxu0 %v1827_v60  ;;  %v2010_v56 = vpop.f32.mrf.mxu0 }
 0x2ce   : > { %v1444_v24 = vpop.permute.xlu0 %1443  ;;  %v1861_v36 = vld [vmem:[#allocation3 + $0x1a0] sm:$0xff]  ;;  %v1252_v3 = vpop.permute.xlu2 %1251  ;;  %v2124_v52 = vadd.f32 %v3644_v13, %v2010_v56 }
 0x2cf   : > { %1530 = vst.msk [vmem:[#allocation3 + $0xa0] sm:$0xff] %vm1519_vm8, %v1444_v24  ;;  %2081 = vmatmul.f32.gmra.mxu2 %v1861_v36 }
 0x2d0   : > { %1723 = vst.msk [vmem:[#allocation3 + $0xa0] sm:$0xff] %vm1712_vm9, %v1637_v41  ;;  %v2058_v1 = vpop.f32.mrf.mxu2  ;;  %v3890_v26 = vpop.f32.mrf.mxu3  ;;  %v2219_v5 = vmul.f32 %v3821_v63, %v2124_v52 }
 0x2d1   : > { %v2172_v9 = vadd.f32 %v2171_v7, %v2058_v1  ;;  %1337 = vst.msk [vmem:[#allocation3 + $0xb0] sm:$0xff] %vm1325_vm7, %v1252_v3 }
 0x2d2   : > { %v2255_v57 = vadd.f32 %v3828_v37, %v2219_v5 }
 0x2d3   : > { %v2235_v22 = vmul.f32 %v3821_v63, %v2172_v9 }
 0x2d4   : > { %v1284_v13 = vpop.permute.xlu1 %1283  ;;  %v2287_v4 = vmax.f32 %v2255_v57, 0.0 }
 0x2d5   : > { %v2271_v46 = vadd.f32 %v3828_v37, %v2235_v22  ;;  %1353 = vst.msk [vmem:[#allocation3 + $0x1b0] sm:$0xff] %vm1325_vm7, %v1284_v13 }
 0x2d6   : > { %v1478_v38 = vpop.permute.xlu0 %1477  ;;  %2320 = vst.msk [vmem:[%s3840_s12 + $0x10] sm:$0xff] %vm2317_vm10, %v2287_v4  ;;  %v1286_v48 = vpop.permute.xlu2 %1285 }
 0x2d7   : > { %v2303_v14 = vmax.f32 %v2271_v46, 0.0  ;;  %1547 = vst.msk [vmem:[#allocation3 + $0x1b0] sm:$0xff] %vm1519_vm8, %v1478_v38  ;;  %v1829_v19 = vld [vmem:[#allocation3 + $0xa0] sm:$0xff] }
 0x2d8   : > { %v3901_v42 = vpop.f32.mrf.mxu3  ;;  %2033 = vmatmul.f32.gmra.mxu0 %v1829_v19 }
 0x2d9   : > { %2336 = vst.msk [vmem:[%s3840_s12 + $0x90] sm:$0xff] %vm2317_vm10, %v2303_v14 }
 0x2dc   : > { %v1671_v8 = vpop.permute.xlu1 %1670 }
 0x2dd   : > { %1740 = vst.msk [vmem:[#allocation3 + $0x1b0] sm:$0xff] %vm1712_vm9, %v1671_v8  ;;  %v2013_v61 = vpop.f32.mrf.mxu0 }
 0x2de   : > { %v1093_v54 = vpop.permute.xlu0 %1092  ;;  %v1673_v11 = vpop.permute.xlu2 %1672  ;;  %v2127_v58 = vadd.f32 %v3655_v34, %v2013_v61 }
 0x2df   : > { %1161 = vst.msk [vmem:[#allocation3 + $0x1c0] sm:$0xff] %vm1132_vm6, %v1093_v54 }
 0x2e0   : > { %1354 = vst.msk [vmem:[#allocation3 + $0x1c0] sm:$0xff] %vm1325_vm7, %v1286_v48  ;;  %v2061_v40 = vpop.f32.mrf.mxu2  ;;  %v3909_v55 = vpop.f32.mrf.mxu3  ;;  %v2220_v7 = vmul.f32 %v3821_v63, %v2127_v58 }
 0x2e1   : > { %v2175_v30 = vadd.f32 %v2174_v39, %v2061_v40 }
 0x2e2   : > { %v2256_v29 = vadd.f32 %v3828_v37, %v2220_v7 }
 0x2e3   : > { %v2236_v27 = vmul.f32 %v3821_v63, %v2175_v30 }
 0x2e4   : > { %v1446_v47 = vpop.permute.xlu1 %1445  ;;  %v1863_v18 = vld [vmem:[#allocation3 + $0x1b0] sm:$0xff]  ;;  %v2288_v21 = vmax.f32 %v2256_v29, 0.0 }
 0x2e5   : > { %v2272_v34 = vadd.f32 %v3828_v37, %v2236_v27  ;;  %1531 = vst.msk [vmem:[#allocation3 + $0xb0] sm:$0xff] %vm1519_vm8, %v1446_v47  ;;  %2084 = vmatmul.f32.gmra.mxu2 %v1863_v18 }
 0x2e6   : > { %v1639_v33 = vpop.permute.xlu0 %1638  ;;  %2321 = vst.msk [vmem:[%s3840_s12 + $0x18] sm:$0xff] %vm2317_vm10, %v2288_v21  ;;  %v1448_v25 = vpop.permute.xlu2 %1447 }
 0x2e7   : > { %v2304_v32 = vmax.f32 %v2272_v34, 0.0  ;;  %1724 = vst.msk [vmem:[#allocation3 + $0xb0] sm:$0xff] %vm1712_vm9, %v1639_v33 }
 0x2e8   : > { %v3919_v39 = vpop.f32.mrf.mxu3 }
 0x2e9   : > { %2337 = vst.msk [vmem:[%s3840_s12 + $0x98] sm:$0xff] %vm2317_vm10, %v2304_v32 }
 0x2ec   : > { %v1480_v45 = vpop.permute.xlu1 %1479 }
 0x2ed   : > { %1548 = vst.msk [vmem:[#allocation3 + $0x1c0] sm:$0xff] %vm1519_vm8, %v1480_v45  ;;  %v2016_v51 = vpop.f32.mrf.mxu0 }
 0x2ee   : > { %1741 = vst.msk [vmem:[#allocation3 + $0x1c0] sm:$0xff] %vm1712_vm9, %v1673_v11  ;;  %v1254_v50 = vpop.permute.xlu0 %1253  ;;  %v1831_v20 = vld [vmem:[#allocation3 + $0xb0] sm:$0xff]  ;;  %v1482_v23 = vpop.permute.xlu2 %1481  ;;  %v2130_v53 = vadd.f32 %v3665_v15, %v2016_v51 }
 0x2ef   : > { %1338 = vst.msk [vmem:[#allocation3 + $0xc0] sm:$0xff] %vm1325_vm7, %v1254_v50  ;;  %2036 = vmatmul.f32.gmra.mxu0 %v1831_v20 }
 0x2f0   : > { %1532 = vst.msk [vmem:[#allocation3 + $0xc0] sm:$0xff] %vm1519_vm8, %v1448_v25  ;;  %v2064_v43 = vpop.f32.mrf.mxu2  ;;  %v3928_v41 = vpop.f32.mrf.mxu3  ;;  %v2221_v35 = vmul.f32 %v3821_v63, %v2130_v53 }
 0x2f1   : > { %v2178_v59 = vadd.f32 %v3882_v49, %v2064_v43 }
 0x2f2   : > { %v2257_v60 = vadd.f32 %v3828_v37, %v2221_v35 }
 0x2f3   : > { %v2237_v56 = vmul.f32 %v3821_v63, %v2178_v59 }
 0x2f4   : > { %v1095_v24 = vpop.permute.xlu1 %1094  ;;  %v2289_v15 = vmax.f32 %v2257_v60, 0.0 }
 0x2f5   : > { %v2273_v36 = vadd.f32 %v3828_v37, %v2237_v56  ;;  %1162 = vst.msk [vmem:[#allocation3 + $0x1d0] sm:$0xff] %vm1132_vm6, %v1095_v24  ;;  %v1865_v3 = vld [vmem:[#allocation3 + $0x1c0] sm:$0xff] }
 0x2f6   : > { %v1288_v52 = vpop.permute.xlu0 %1287  ;;  %2322 = vst.msk [vmem:[%s3840_s12 + $0x20] sm:$0xff] %vm2317_vm10, %v2289_v15  ;;  %2087 = vmatmul.f32.gmra.mxu2 %v1865_v3  ;;  %v1097_v1 = vpop.permute.xlu2 %1096 }
 0x2f7   : > { %v2305_v5 = vmax.f32 %v2273_v36, 0.0  ;;  %1355 = vst.msk [vmem:[#allocation3 + $0x1d0] sm:$0xff] %vm1325_vm7, %v1288_v52 }
 0x2f8   : > { %1549 = vst.msk [vmem:[#allocation3 + $0x1d0] sm:$0xff] %vm1519_vm8, %v1482_v23  ;;  %v3940_v49 = vpop.f32.mrf.mxu3 }
 0x2f9   : > { %2338 = vst.msk [vmem:[%s3840_s12 + $0xa0] sm:$0xff] %vm2317_vm10, %v2305_v5 }
 0x2fa   : > { %1163 = vst.msk [vmem:[#allocation3 + $0x1e0] sm:$0xff] %vm1132_vm6, %v1097_v1 }
 0x2fc   : > { %v1641_v9 = vpop.permute.xlu1 %1640 }
 0x2fd   : > { %1725 = vst.msk [vmem:[#allocation3 + $0xc0] sm:$0xff] %vm1712_vm9, %v1641_v9  ;;  %v2019_v57 = vpop.f32.mrf.mxu0 }
 0x2fe   : > { %v1675_v22 = vpop.permute.xlu0 %1674  ;;  %v2133_v13 = vadd.f32 %v3679_v31, %v2019_v57  ;;  %v1643_v4 = vpop.permute.xlu2 %1642 }
 0x2ff   : > { %1742 = vst.msk [vmem:[#allocation3 + $0x1d0] sm:$0xff] %vm1712_vm9, %v1675_v22 }
 0x300   : > { %v2067_v46 = vpop.f32.mrf.mxu2  ;;  %v3948_v38 = vpop.f32.mrf.mxu3  ;;  %v2222_v48 = vmul.f32 %v3821_v63, %v2133_v13 }
 0x301   : > { %v2181_v14 = vadd.f32 %v3890_v26, %v2067_v46 }
 0x302   : > { %v2258_v19 = vadd.f32 %v3828_v37, %v2222_v48 }
 0x303   : > { %v2238_v8 = vmul.f32 %v3821_v63, %v2181_v14 }
 0x304   : > { %v1256_v61 = vpop.permute.xlu1 %1255  ;;  %v1833_v54 = vld [vmem:[#allocation3 + $0xc0] sm:$0xff]  ;;  %v2290_v11 = vmax.f32 %v2258_v19, 0.0 }
 0x305   : > { %v2274_v31 = vadd.f32 %v3828_v37, %v2238_v8  ;;  %1339 = vst.msk [vmem:[#allocation3 + $0xd0] sm:$0xff] %vm1325_vm7, %v1256_v61  ;;  %2039 = vmatmul.f32.gmra.mxu0 %v1833_v54 }
 0x306   : > { %v1450_v58 = vpop.permute.xlu0 %1449  ;;  %2323 = vst.msk [vmem:[%s3840_s12 + $0x28] sm:$0xff] %vm2317_vm10, %v2290_v11  ;;  %v1867_v40 = vld [vmem:[#allocation3 + $0x1d0] sm:$0xff]  ;;  %v1258_v26 = vpop.permute.xlu2 %1257 }
 0x307   : > { %v2306_v7 = vmax.f32 %v2274_v31, 0.0  ;;  %1533 = vst.msk [vmem:[#allocation3 + $0xd0] sm:$0xff] %vm1519_vm8, %v1450_v58  ;;  %2090 = vmatmul.f32.gmra.mxu2 %v1867_v40 }
 0x308   : > { %1726 = vst.msk [vmem:[#allocation3 + $0xd0] sm:$0xff] %vm1712_vm9, %v1643_v4  ;;  %v3960_v30 = vpop.f32.mrf.mxu3 }
 0x309   : > { %2339 = vst.msk [vmem:[%s3840_s12 + $0xa8] sm:$0xff] %vm2317_vm10, %v2306_v7 }
 0x30a   : > { %1340 = vst.msk [vmem:[#allocation3 + $0xe0] sm:$0xff] %vm1325_vm7, %v1258_v26 }
 0x30c   : > { %v1290_v29 = vpop.permute.xlu1 %1289 }
 0x30d   : > { %1356 = vst.msk [vmem:[#allocation3 + $0x1e0] sm:$0xff] %vm1325_vm7, %v1290_v29  ;;  %v2022_v27 = vpop.f32.mrf.mxu0 }
 0x30e   : > { %v1484_v47 = vpop.permute.xlu0 %1483  ;;  %v2136_v18 = vadd.f32 %v3694_v16, %v2022_v27 }
 0x30f   : > { %v1835_v21 = vld [vmem:[#allocation3 + $0xd0] sm:$0xff]  ;;  %1550 = vst.msk [vmem:[#allocation3 + $0x1e0] sm:$0xff] %vm1519_vm8, %v1484_v47 }
 0x310   : > { %2042 = vmatmul.f32.gmra.mxu0 %v1835_v21  ;;  %v2070_v34 = vpop.f32.mrf.mxu2  ;;  %v3968_v33 = vpop.f32.mrf.mxu3  ;;  %v2223_v25 = vmul.f32 %v3821_v63, %v2136_v18 }
 0x311   : > { %v2184_v32 = vadd.f32 %v3901_v42, %v2070_v34 }
 0x312   : > { %v2259_v45 = vadd.f32 %v3828_v37, %v2223_v25 }
 0x313   : > { %v2239_v51 = vmul.f32 %v3821_v63, %v2184_v32 }
 0x314   : > { %v1677_v50 = vpop.permute.xlu1 %1676  ;;  %v2291_v20 = vmax.f32 %v2259_v45, 0.0 }
 0x315   : > { %v2275_v16 = vadd.f32 %v3828_v37, %v2239_v51  ;;  %1743 = vst.msk [vmem:[#allocation3 + $0x1e0] sm:$0xff] %vm1712_vm9, %v1677_v50 }
 0x316   : > { %2324 = vst.msk [vmem:[%s3840_s12 + $0x30] sm:$0xff] %vm2317_vm10, %v2291_v20  ;;  %v1452_v23 = vpop.permute.xlu0 %1451 }
 0x317   : > { %v2307_v53 = vmax.f32 %v2275_v16, 0.0  ;;  %1534 = vst.msk [vmem:[#allocation3 + $0xe0] sm:$0xff] %vm1519_vm8, %v1452_v23 }
 0x318   : > { %v3979_v43 = vpop.f32.mrf.mxu3 }
 0x319   : > { %2340 = vst.msk [vmem:[%s3840_s12 + $0xb0] sm:$0xff] %vm2317_vm10, %v2307_v53 }
 0x31c   : > { %v1645_v42 = vpop.permute.xlu1 %1644  ;;  %v1869_v35 = vld [vmem:[#allocation3 + $0x1e0] sm:$0xff] }
 0x31d   : > { %1727 = vst.msk [vmem:[#allocation3 + $0xe0] sm:$0xff] %vm1712_vm9, %v1645_v42  ;;  %2093 = vmatmul.f32.gmra.mxu2 %v1869_v35  ;;  %v2025_v59 = vpop.f32.mrf.mxu0 }
 0x31e   : > { %v2139_v60 = vadd.f32 %v3708_v0, %v2025_v59 }
 0x320   : > { %v2073_v56 = vpop.f32.mrf.mxu2  ;;  %v2210_v24 = vpop.f32.mrf.mxu3  ;;  %v2224_v15 = vmul.f32 %v3821_v63, %v2139_v60 }
 0x321   : > { %v2187_v36 = vadd.f32 %v3909_v55, %v2073_v56  ;;  %v2211_v3 = vadd.f32 %v2210_v24, %v3857_v6 }
 0x322   : > { %v2260_v52 = vadd.f32 %v3828_v37, %v2224_v15 }
 0x323   : > { %v2240_v1 = vmul.f32 %v3821_v63, %v2187_v36  ;;  %v2248_v5 = vmul.f32 %v3821_v63, %v2211_v3 }
 0x324   : > { %v1837_v9 = vld [vmem:[#allocation3 + $0xe0] sm:$0xff]  ;;  %v2292_v57 = vmax.f32 %v2260_v52, 0.0 }
 0x325   : > { %v2276_v0 = vadd.f32 %v3828_v37, %v2240_v1  ;;  %v2284_v22 = vadd.f32 %v3828_v37, %v2248_v5  ;;  %2045 = vmatmul.f32.gmra.mxu0 %v1837_v9 }
 0x326   : > { %2325 = vst.msk [vmem:[%s3840_s12 + $0x38] sm:$0xff] %vm2317_vm10, %v2292_v57 }
 0x327   : > { %v2308_v55 = vmax.f32 %v2276_v0, 0.0  ;;  %v2316_v13 = vmax.f32 %v2284_v22, 0.0 }
 0x329   : > { %2341 = vst.msk [vmem:[%s3840_s12 + $0xb8] sm:$0xff] %vm2317_vm10, %v2308_v55 }
 0x32a   : > { %2349 = vst.msk [vmem:[%s3840_s12 + $0xf8] sm:$0xff] %vm2317_vm10, %v2316_v13 }
 0x330   : > { %v2076_v6 = vpop.f32.mrf.mxu2 }
 0x331   : > { %v2190_v4 = vadd.f32 %v3919_v39, %v2076_v6 }
 0x333   : > { %v2241_v46 = vmul.f32 %v3821_v63, %v2190_v4 }
 0x334   : > { %v2028_v48 = vpop.f32.mrf.mxu0 }
 0x335   : > { %v2277_v14 = vadd.f32 %v3828_v37, %v2241_v46  ;;  %v2142_v19 = vadd.f32 %v3723_v10, %v2028_v48 }
 0x337   : > { %v2309_v8 = vmax.f32 %v2277_v14, 0.0  ;;  %v2225_v61 = vmul.f32 %v3821_v63, %v2142_v19 }
 0x339   : > { %2342 = vst.msk [vmem:[%s3840_s12 + $0xc0] sm:$0xff] %vm2317_vm10, %v2309_v8  ;;  %v2261_v54 = vadd.f32 %v3828_v37, %v2225_v61 }
 0x33b   : > { %v2293_v11 = vmax.f32 %v2261_v54, 0.0 }
 0x33d   : > { %2326 = vst.msk [vmem:[%s3840_s12 + $0x40] sm:$0xff] %vm2317_vm10, %v2293_v11 }
 0x341   : > { %v2079_v39 = vpop.f32.mrf.mxu2 }
 0x342   : > { %v2193_v31 = vadd.f32 %v3928_v41, %v2079_v39 }
 0x344   : > { %v2242_v58 = vmul.f32 %v3821_v63, %v2193_v31 }
 0x346   : > { %v2278_v40 = vadd.f32 %v3828_v37, %v2242_v58 }
 0x348   : > { %v2310_v7 = vmax.f32 %v2278_v40, 0.0 }
 0x34a   : > { %2343 = vst.msk [vmem:[%s3840_s12 + $0xc8] sm:$0xff] %vm2317_vm10, %v2310_v7  ;;  %v2031_v10 = vpop.f32.mrf.mxu0 }
 0x34b   : > { %v2145_v26 = vadd.f32 %v3738_v28, %v2031_v10 }
 0x34d   : > { %v2226_v29 = vmul.f32 %v3821_v63, %v2145_v26 }
 0x34f   : > { %v2262_v27 = vadd.f32 %v3828_v37, %v2226_v29 }
 0x351   : > { %v2294_v47 = vmax.f32 %v2262_v27, 0.0 }
 0x352   : > { %v2082_v18 = vpop.f32.mrf.mxu2 }
 0x353   : > { %2327 = vst.msk [vmem:[%s3840_s12 + $0x48] sm:$0xff] %vm2317_vm10, %v2294_v47  ;;  %v2196_v41 = vadd.f32 %v3940_v49, %v2082_v18 }
 0x355   : > { %v2243_v21 = vmul.f32 %v3821_v63, %v2196_v41  ;;  %v2034_v34 = vpop.f32.mrf.mxu0 }
 0x356   : > { %v2148_v25 = vadd.f32 %v3755_v12, %v2034_v34 }
 0x357   : > { %v2279_v32 = vadd.f32 %v3828_v37, %v2243_v21 }
 0x358   : > { %v2227_v28 = vmul.f32 %v3821_v63, %v2148_v25 }
 0x359   : > { %v2311_v45 = vmax.f32 %v2279_v32, 0.0 }
 0x35a   : > { %v2263_v51 = vadd.f32 %v3828_v37, %v2227_v28 }
 0x35b   : > { %2344 = vst.msk [vmem:[%s3840_s12 + $0xd0] sm:$0xff] %vm2317_vm10, %v2311_v45 }
 0x35c   : > { %v2295_v50 = vmax.f32 %v2263_v51, 0.0 }
 0x35e   : > { %2328 = vst.msk [vmem:[%s3840_s12 + $0x50] sm:$0xff] %vm2317_vm10, %v2295_v50 }
 0x368   : > { %v2085_v49 = vpop.f32.mrf.mxu2 }
 0x369   : > { %v2199_v20 = vadd.f32 %v3948_v38, %v2085_v49 }
 0x36b   : > { %v2244_v12 = vmul.f32 %v3821_v63, %v2199_v20 }
 0x36c   : > { %v2037_v16 = vpop.f32.mrf.mxu0 }
 0x36d   : > { %v2280_v23 = vadd.f32 %v3828_v37, %v2244_v12  ;;  %v2151_v53 = vadd.f32 %v3768_v44, %v2037_v16 }
 0x36f   : > { %v2312_v42 = vmax.f32 %v2280_v23, 0.0  ;;  %v2228_v35 = vmul.f32 %v3821_v63, %v2151_v53 }
 0x371   : > { %2345 = vst.msk [vmem:[%s3840_s12 + $0xd8] sm:$0xff] %vm2317_vm10, %v2312_v42  ;;  %v2264_v59 = vadd.f32 %v3828_v37, %v2228_v35 }
 0x373   : > { %v2296_v60 = vmax.f32 %v2264_v59, 0.0 }
 0x375   : > { %2329 = vst.msk [vmem:[%s3840_s12 + $0x58] sm:$0xff] %vm2317_vm10, %v2296_v60 }
 0x379   : > { %v2088_v38 = vpop.f32.mrf.mxu2 }
 0x37a   : > { %v2202_v56 = vadd.f32 %v3960_v30, %v2088_v38 }
 0x37c   : > { %v2245_v24 = vmul.f32 %v3821_v63, %v2202_v56 }
 0x37e   : > { %v2281_v15 = vadd.f32 %v3828_v37, %v2245_v24 }
 0x380   : > { %v2313_v36 = vmax.f32 %v2281_v15, 0.0 }
 0x382   : > { %2346 = vst.msk [vmem:[%s3840_s12 + $0xe0] sm:$0xff] %vm2317_vm10, %v2313_v36  ;;  %v2040_v44 = vpop.f32.mrf.mxu0 }
 0x383   : > { %v2154_v3 = vadd.f32 %v3780_v62, %v2040_v44 }
 0x385   : > { %v2229_v52 = vmul.f32 %v3821_v63, %v2154_v3 }
 0x387   : > { %v2265_v1 = vadd.f32 %v3828_v37, %v2229_v52 }
 0x389   : > { %v2297_v5 = vmax.f32 %v2265_v1, 0.0 }
 0x38a   : > { %v2091_v9 = vpop.f32.mrf.mxu2 }
 0x38b   : > { %2330 = vst.msk [vmem:[%s3840_s12 + $0x60] sm:$0xff] %vm2317_vm10, %v2297_v5  ;;  %v2205_v30 = vadd.f32 %v3968_v33, %v2091_v9 }
 0x38d   : > { %v2043_v57 = vpop.f32.mrf.mxu0  ;;  %v2246_v0 = vmul.f32 %v3821_v63, %v2205_v30 }
 0x38e   : > { %v2157_v22 = vadd.f32 %v3791_v17, %v2043_v57 }
 0x38f   : > { %v2282_v55 = vadd.f32 %v3828_v37, %v2246_v0 }
 0x390   : > { %v2230_v62 = vmul.f32 %v3821_v63, %v2157_v22 }
 0x391   : > { %v2314_v13 = vmax.f32 %v2282_v55, 0.0 }
 0x392   : > { %v2266_v6 = vadd.f32 %v3828_v37, %v2230_v62 }
 0x393   : > { %2347 = vst.msk [vmem:[%s3840_s12 + $0xe8] sm:$0xff] %vm2317_vm10, %v2314_v13 }
 0x394   : > { %v2298_v4 = vmax.f32 %v2266_v6, 0.0 }
 0x396   : > { %2331 = vst.msk [vmem:[%s3840_s12 + $0x68] sm:$0xff] %vm2317_vm10, %v2298_v4 }
 0x3a0   : > { %v2094_v33 = vpop.f32.mrf.mxu2 }
 0x3a1   : > { %v2208_v46 = vadd.f32 %v3979_v43, %v2094_v33 }
 0x3a2   : > { %v2046_v17 = vpop.f32.mrf.mxu0 }
 0x3a3   : > { %v2247_v48 = vmul.f32 %v3821_v63, %v2208_v46  ;;  %v2160_v14 = vadd.f32 %v3806_v2, %v2046_v17 }
 0x3a5   : > { %v2283_v19 = vadd.f32 %v3828_v37, %v2247_v48  ;;  %v2231_v8 = vmul.f32 %v3821_v63, %v2160_v14 }
 0x3a7   : > { %v2315_v61 = vmax.f32 %v2283_v19, 0.0  ;;  %v2267_v43 = vadd.f32 %v3828_v37, %v2231_v8 }
 0x3a9   : > { %2348 = vst.msk [vmem:[%s3840_s12 + $0xf0] sm:$0xff] %vm2317_vm10, %v2315_v61  ;;  %v2299_v54 = vmax.f32 %v2267_v43, 0.0 }
 0x3ab   : > { %2332 = vst.msk [vmem:[%s3840_s12 + $0x70] sm:$0xff] %vm2317_vm10, %v2299_v54 }
 0x3ac   : > { %2638 = shalt.err (!%p2635_p4)
}
 0x3ad   : > { %s2689_s7 = smov 128   ;;  %s2690_s6 = smov 8  }
 0x3ae   : > { %2523 = dma.vmem_to_hbm [thread:$0]  (%p2766_p11), %s2364_s19, 4096, %s2366_s14, %s2351_s26, %s2689_s7, %s2689_s7, %s2690_s6  }
 0x3af PF: > { %s2380_s10 = sand.u32 1, %s2665_s15   ;;  %p4134_p7 = scmp.ge.s32.totalorder %s2677_s18, 2 }
 0x3b0   : > { %s2381_s12 = scalar_lea.sflag [#allocation6], %s2380_s10 }
 0x3b1   : > { %p2530_p5 = pnand %p4134_p7, %p2770_p12 }
 0x3b3   : > { %p2531_p8 = pneg %p2530_p5 }
 0x3b5   : > { %2660 = dma.done.wait (%p2531_p8), %s2381_s12, 4096  }
 0x3b6   : > { %2662 = vsyncadd (%p2531_p8), %s2381_s12, 4294963200  ;;  %p17_p10 = scmp.ge.s32.totalorder %s2741_s21, 4   ;;  %s4135_s15 = smov %s2669_s16 }
 0x3b7   : > { %s4136_s16 = smov %s2673_s17  ;;  %s4137_s17 = smov %s2753_s24 }
 0x3b8   : > { %s4138_s18 = smov %s2741_s21  ;;  %19 = sbr.rel (!%p17_p10) target bundleno = 5 (0x5), region = 84 }
 0x3bd   :  { %2387 = vsyncpa [#allocation5], 1 }
 0x3be   :  { %2389 = vsyncpa [#allocation5 + $0x1], 1 }
 0x3bf   :  { %2390 = vsyncpa [#allocation6], 1 }
 0x3c0   :  { %2392 = vsyncpa [#allocation6 + $0x1], 1 }

</bundles_post_ra>
